<compile_context>
chip_gen: v6e
topology: v6e:2x2x1
jax: 0.10.0
libtpu: 0.0.40
codegen_flags: <defaults>
</compile_context>

<pallas_src>
import functools

import jax
import jax.numpy as jnp
import numpy as np
from jax.experimental import pallas as pl
from jax.experimental.pallas import tpu as pltpu


def _round_up(x, n):
    return ((x + n - 1) // n) * n


def _vq_kernel(x_ref, e_ref, esq_ref, q_ref, sse_ref, *, m_true, m_padded):
    # x_ref   : (TM, D) tile of flattened inputs (native dtype)
    # e_ref   : (K, D) full codebook (native dtype)
    # esq_ref : (1, K) precomputed |e_k|^2 in f32 (hoisted out of the grid loop)
    # q_ref   : (TM, D) quantized output tile
    # sse_ref : (1, 1, 1) per-tile partial sum of squared error
    i = pl.program_id(0)

    x = x_ref[...]                                   # (TM, D) native dtype -> MXU
    e = e_ref[...]                                   # (K, D)  native dtype -> MXU
    e_sq = esq_ref[...]                              # (1, K) f32

    tm, d = x.shape
    k = e.shape[0]

    # x @ e^T on the MXU without materializing a transpose; f32 accumulate.
    xe = jax.lax.dot_general(
        x, e, (((1,), (1,)), ((), ())),
        preferred_element_type=jnp.float32)          # (TM, K)

    # argmin_k |x - e_k|^2 == argmin_k (|e_k|^2 - 2 x.e_k): the per-row |x|^2
    # constant is dropped (saves a (TM,D) multiply + row reduction per tile).
    dist = e_sq - 2.0 * xe                           # (TM, K) f32

    # argmin over K with first-occurrence tie break (matches torch.argmin),
    # kept fully 2-D for TPU-friendly layouts.
    iota_k = jax.lax.broadcasted_iota(jnp.int32, (tm, k), 1)
    min_d = jnp.min(dist, axis=1, keepdims=True)     # (TM, 1)
    cand = jnp.where(dist == min_d, iota_k, k)       # (TM, K)
    idx = jnp.min(cand, axis=1, keepdims=True)       # (TM, 1)
    onehot = (iota_k == idx).astype(e.dtype)         # (TM, K), exact 0/1

    # Codebook gather as onehot @ E on the MXU (exact for 0/1 weights).
    quant = jnp.dot(onehot, e, preferred_element_type=jnp.float32)  # (TM, D) f32
    q_ref[...] = quant.astype(q_ref.dtype)

    diff = quant - x.astype(jnp.float32)
    if m_padded != m_true:
        # Mask rows added by padding M up to a multiple of the tile size.
        row = i * tm + jax.lax.broadcasted_iota(jnp.int32, (tm, d), 0)
        diff = jnp.where(row < m_true, diff, 0.0)

    sse = jnp.sum(diff * diff, keepdims=True)        # (1, 1)
    sse_ref[...] = sse[None]                         # (1, 1, 1) per-tile partial


# Design budget kept well under the smallest scoped VMEM we raise to (v7x has
# only 64 MiB physical per TensorCore), so one tiling works on every gen.
_VMEM_DESIGN_BUDGET = 24 * 1024 * 1024
_VMEM_LIMIT_BYTES = 64 * 1024 * 1024


def _pick_tile_m(m, k, d, x_bytes, e_bytes, budget=_VMEM_DESIGN_BUDGET):
    """Largest tile_m (multiple of 8) whose working set fits the VMEM budget."""
    tm = 8
    for cand in (2048, 1024, 512, 256, 128, 64, 32, 16, 8):
        est = (2 * cand * d * x_bytes      # double-buffered input tile
               + 2 * cand * d * x_bytes    # double-buffered output tile
               + 2 * k * d * e_bytes       # resident codebook
               + 2 * k * 4                 # |e|^2
               + 6 * cand * k * 4          # live (TM, K) f32/int32 intermediates
               + (1 << 20))                # slack
        if est <= budget:
            tm = cand
            break
    return min(tm, _round_up(m, 8))


@functools.partial(jax.jit, static_argnames=("commitment_cost", "tile_m"))
def vector_quantizer_forward(inputs_nchw, embedding, commitment_cost=0.25,
                             tile_m=None):
    """inputs_nchw: (N, C, H, W) with C == embedding_dim.
       embedding:   (num_embeddings, embedding_dim) codebook.
       Returns (quantized_nchw, loss)."""
    n, c, h, w = inputs_nchw.shape
    k, d = embedding.shape
    assert c == d, "channel dim must equal embedding_dim"

    # NCHW -> NHWC -> (M, D)   (glue)
    x_nhwc = jnp.transpose(inputs_nchw, (0, 2, 3, 1))
    flat = x_nhwc.reshape(-1, d)
    m = flat.shape[0]

    x_bytes = jnp.dtype(flat.dtype).itemsize
    e_bytes = jnp.dtype(embedding.dtype).itemsize
    if tile_m is None:
        tile_m = _pick_tile_m(m, k, d, x_bytes, e_bytes)
    assert tile_m % 8 == 0, "tile_m must be a multiple of 8"

    m_pad = _round_up(m, tile_m)
    flat_in = flat if m_pad == m else jnp.pad(flat, ((0, m_pad - m), (0, 0)))
    num_tiles = m_pad // tile_m

    # |e_k|^2 computed once here (not per grid step), passed as (1, K) f32.
    e_sq = jnp.sum(jnp.square(embedding.astype(jnp.float32)),
                   axis=1).reshape(1, k)

    kernel = functools.partial(_vq_kernel, m_true=m, m_padded=m_pad)

    flops = int(4 * m_pad * k * d + 8 * m_pad * k)
    bytes_accessed = int(2 * m_pad * d * x_bytes   # read x tile + write q tile
                         + k * d * e_bytes + k * 4 + num_tiles * 4)

    quant_flat, sse_partials = pl.pallas_call(
        kernel,
        out_shape=(
            jax.ShapeDtypeStruct((m_pad, d), flat.dtype),
            jax.ShapeDtypeStruct((num_tiles, 1, 1), jnp.float32),
        ),
        grid_spec=pltpu.PrefetchScalarGridSpec(
            num_scalar_prefetch=0,
            grid=(num_tiles,),
            in_specs=[
                pl.BlockSpec((tile_m, d), lambda i: (i, 0)),   # input tile
                pl.BlockSpec((k, d), lambda i: (0, 0)),        # full codebook
                pl.BlockSpec((1, k), lambda i: (0, 0)),        # |e|^2
            ],
            out_specs=[
                pl.BlockSpec((tile_m, d), lambda i: (i, 0)),     # quantized tile
                pl.BlockSpec((1, 1, 1), lambda i: (i, 0, 0)),    # per-tile SSE
            ],
        ),
        compiler_params=pltpu.CompilerParams(
            dimension_semantics=("parallel",),
            vmem_limit_bytes=_VMEM_LIMIT_BYTES),
        cost_estimate=pl.CostEstimate(
            flops=flops, transcendentals=0, bytes_accessed=bytes_accessed),
    )(flat_in, embedding, e_sq)

    # Loss: q_latent + commitment * e_latent, both equal MSE(q, x) in value.
    sse = jnp.sum(sse_partials)
    mse = sse / jnp.float32(m * d)
    loss = (1.0 + commitment_cost) * mse

    # Straight-through estimator is identity on the forward value.
    quant_nhwc = quant_flat[:m].reshape(n, h, w, d)
    quant_nchw = jnp.transpose(quant_nhwc, (0, 3, 1, 2))
    return quant_nchw, loss


if __name__ == "__main__":
    # Small shapes consistent with the module.
    num_embeddings = 8
    embedding_dim = 4
    commitment_cost = 0.25
    N, C, H, W = 2, embedding_dim, 16, 16

    key = jax.random.PRNGKey(0)
    k_x, k_e = jax.random.split(key)

    x = jax.random.normal(k_x, (N, C, H, W), dtype=jnp.float32)
    # Deterministic init matching nn.Embedding.weight.data.uniform_(-1/K, 1/K).
    embedding = jax.random.uniform(
        k_e, (num_embeddings, embedding_dim), dtype=jnp.float32,
        minval=-1.0 / num_embeddings, maxval=1.0 / num_embeddings)

    quantized, loss = vector_quantizer_forward(
        x, embedding, commitment_cost=commitment_cost)
    jax.block_until_ready((quantized, loss))

    assert quantized.shape == (N, C, H, W)
    assert loss.shape == ()

    # --- correctness checks against the module's math (tie-tolerant) ---
    flat_np = np.asarray(jnp.transpose(x, (0, 2, 3, 1)).reshape(-1, embedding_dim))
    e_np = np.asarray(embedding)
    q_np = np.asarray(
        jnp.transpose(quantized, (0, 2, 3, 1)).reshape(-1, embedding_dim))

    # 1) every output row is an exact codebook row
    row_err = np.abs(q_np[:, None, :] - e_np[None, :, :]).max(-1).min(-1)
    assert row_err.max() < 1e-5, "output rows are not codebook entries"

    # 2) every output row is a nearest codeword (up to fp ties)
    d_sel = ((flat_np - q_np) ** 2).sum(-1)
    d_min = ((flat_np[:, None, :] - e_np[None, :, :]) ** 2).sum(-1).min(-1)
    assert np.all(d_sel <= d_min + 1e-4), "non-minimal codeword selected"

    # 3) loss matches the PyTorch formula for the selected codewords
    loss_ref = (1.0 + commitment_cost) * np.mean((q_np - flat_np) ** 2)
    assert abs(float(loss) - float(loss_ref)) < 1e-5, "loss mismatch"

    print("KERNEL_OK")
</pallas_src>

<mosaic_0001>
module attributes {stable_mosaic.version = 11 : i64} {
  func.func @_vq_kernel(%arg0: i32, %arg1: memref<512x4xf32, #tpu.memory_space<vmem>>, %arg2: memref<8x4xf32, #tpu.memory_space<vmem>>, %arg3: memref<1x8xf32, #tpu.memory_space<vmem>>, %arg4: memref<512x4xf32, #tpu.memory_space<vmem>>, %arg5: memref<1x1x1xf32, #tpu.memory_space<vmem>>) attributes {dimension_semantics = [#tpu.dimension_semantics<parallel>], iteration_bounds = array<i64: 1>, scalar_prefetch = 0 : i64, scratch_operands = 0 : i64, tpu.core_type = #tpu.core_type<tc>, window_params = [{transform_indices = @transform_0, window_bounds = array<i64: 512, 4>}, {pipeline_mode = #tpu.pipeline_mode<synchronous>, transform_indices = @transform_1, window_bounds = array<i64: 8, 4>}, {pipeline_mode = #tpu.pipeline_mode<synchronous>, transform_indices = @transform_2, window_bounds = array<i64: 1, 8>}, {transform_indices = @transform_3, window_bounds = array<i64: 512, 4>}, {transform_indices = @transform_4, window_bounds = array<i64: 1, 1, 1>}]} {
    %c0 = arith.constant 0 : index
    %c0_0 = arith.constant 0 : index
    %0 = vector.load %arg1[%c0, %c0_0] : memref<512x4xf32, #tpu.memory_space<vmem>>, vector<512x4xf32>
    %c0_1 = arith.constant 0 : index
    %c0_2 = arith.constant 0 : index
    %1 = vector.load %arg2[%c0_1, %c0_2] : memref<8x4xf32, #tpu.memory_space<vmem>>, vector<8x4xf32>
    %c0_3 = arith.constant 0 : index
    %c0_4 = arith.constant 0 : index
    %2 = vector.load %arg3[%c0_3, %c0_4] : memref<1x8xf32, #tpu.memory_space<vmem>>, vector<1x8xf32>
    %cst = arith.constant dense<0.000000e+00> : vector<512x8xf32>
    %3 = tpu.matmul %0, %1, %cst {dimension_numbers = #tpu.dot_dimension_numbers<[1], [1], [0], [0], [0, 0, 1, 0], [], []>} : vector<512x4xf32>, vector<8x4xf32>, vector<512x8xf32> -> vector<512x8xf32>
    %cst_5 = arith.constant 2.000000e+00 : f32
    %4 = vector.broadcast %cst_5 : f32 to vector<512x8xf32>
    %5 = arith.mulf %4, %3 : vector<512x8xf32>
    %6 = vector.broadcast %2 : vector<1x8xf32> to vector<512x8xf32>
    %7 = arith.subf %6, %5 : vector<512x8xf32>
    %8 = tpu.iota {dimensions = array<i32: 1>} : vector<512x8xi32>
    %cst_6 = arith.constant dense<0x7F800000> : vector<512xf32>
    %9 = vector.multi_reduction <minimumf>, %7, %cst_6 [1] : vector<512x8xf32> to vector<512xf32>
    %10 = vector.shape_cast %9 : vector<512xf32> to vector<512x1xf32>
    %11 = vector.broadcast %10 : vector<512x1xf32> to vector<512x8xf32>
    %12 = arith.cmpf oeq, %7, %11 : vector<512x8xf32>
    %c8_i32 = arith.constant 8 : i32
    %13 = vector.broadcast %c8_i32 : i32 to vector<512x8xi32>
    %14 = arith.select %12, %8, %13 : vector<512x8xi1>, vector<512x8xi32>
    %cst_7 = arith.constant dense<2147483647> : vector<512xi32>
    %15 = vector.multi_reduction <minsi>, %14, %cst_7 [1] : vector<512x8xi32> to vector<512xi32>
    %16 = vector.shape_cast %15 : vector<512xi32> to vector<512x1xi32>
    %17 = vector.broadcast %16 : vector<512x1xi32> to vector<512x8xi32>
    %18 = arith.cmpi eq, %8, %17 : vector<512x8xi32>
    %19 = arith.extui %18 : vector<512x8xi1> to vector<512x8xi32>
    %20 = arith.sitofp %19 : vector<512x8xi32> to vector<512x8xf32>
    %cst_8 = arith.constant dense<0.000000e+00> : vector<512x4xf32>
    %21 = tpu.matmul %20, %1, %cst_8 {dimension_numbers = #tpu.dot_dimension_numbers<[1], [0], [0], [1], [0, 0, 1, 1], [], []>} : vector<512x8xf32>, vector<8x4xf32>, vector<512x4xf32> -> vector<512x4xf32>
    %c0_9 = arith.constant 0 : index
    %c0_10 = arith.constant 0 : index
    %22 = vector.load %arg4[%c0_9, %c0_10] : memref<512x4xf32, #tpu.memory_space<vmem>>, vector<512x4xf32>
    tpu.vector_store %arg4[%c0_9, %c0_10], %21 {strides = array<i32>} : memref<512x4xf32, #tpu.memory_space<vmem>>, vector<512x4xf32>,
    %23 = arith.subf %21, %0 : vector<512x4xf32>
    %24 = arith.mulf %23, %23 : vector<512x4xf32>
    %25 = vector.shape_cast %24 : vector<512x4xf32> to vector<1x512x4xf32>
    %cst_11 = arith.constant dense<0.000000e+00> : vector<1xf32>
    %26 = vector.multi_reduction <add>, %25, %cst_11 [1, 2] : vector<1x512x4xf32> to vector<1xf32>
    %27 = vector.shape_cast %26 : vector<1xf32> to vector<1x1x1xf32>
    %28 = vector.extract %27[0, 0, 0] : f32 from vector<1x1x1xf32>
    %29 = vector.broadcast %28 : f32 to vector<1x1xf32>
    %30 = vector.shape_cast %29 : vector<1x1xf32> to vector<1x1x1xf32>
    %c0_12 = arith.constant 0 : index
    %c0_13 = arith.constant 0 : index
    %c0_14 = arith.constant 0 : index
    %31 = vector.load %arg5[%c0_12, %c0_13, %c0_14] : memref<1x1x1xf32, #tpu.memory_space<vmem>>, vector<1x1x1xf32>
    tpu.vector_store %arg5[%c0_12, %c0_13, %c0_14], %30 {strides = array<i32>} : memref<1x1x1xf32, #tpu.memory_space<vmem>>, vector<1x1x1xf32>,
    return
  }
  func.func @transform_0(%arg0: i32) -> (i32, i32) {
    %c0_i32 = arith.constant 0 : i32
    %c0_i32_0 = arith.constant 0 : i32
    return %arg0, %c0_i32 : i32, i32
  }
  func.func @transform_1(%arg0: i32) -> (i32, i32) {
    %c0_i32 = arith.constant 0 : i32
    %c0_i32_0 = arith.constant 0 : i32
    %c0_i32_1 = arith.constant 0 : i32
    return %c0_i32, %c0_i32_0 : i32, i32
  }
  func.func @transform_2(%arg0: i32) -> (i32, i32) {
    %c0_i32 = arith.constant 0 : i32
    %c0_i32_0 = arith.constant 0 : i32
    %c0_i32_1 = arith.constant 0 : i32
    return %c0_i32, %c0_i32_0 : i32, i32
  }
  func.func @transform_3(%arg0: i32) -> (i32, i32) {
    %c0_i32 = arith.constant 0 : i32
    %c0_i32_0 = arith.constant 0 : i32
    return %arg0, %c0_i32 : i32, i32
  }
  func.func @transform_4(%arg0: i32) -> (i32, i32, i32) {
    %c0_i32 = arith.constant 0 : i32
    %c0_i32_0 = arith.constant 0 : i32
    %c0_i32_1 = arith.constant 0 : i32
    return %arg0, %c0_i32, %c0_i32_0 : i32, i32, i32
  }
}

</mosaic_0001>

<bundles_post_ra>
// kernel: vector_quantizer_forward.1
= control target key start
LH: loop header
LB: loop body
LE: loop exit
PB: predicated region body
PF: predicated region fallthrough
CT: control target
= control target key end

     0   :  { %vm83_vm0 = vcmask 31744   ;;  %s6115_s0 = inlined_call_operand.vmem [shape: f32[512,4], index: 0, kind: input, shape index: {}]   ;;  %s6116_s1 = inlined_call_operand.vmem [shape: f32[8,4], index: 1, kind: input, shape index: {}]   ;;  %s6117_s2 = inlined_call_operand.vmem [shape: f32[1,8], index: 2, kind: input, shape index: {}]   ;;  %s6118_s3 = inlined_call_operand.vmem [shape: f32[512,4], index: 3, kind: output, shape index: {0}]   ;;  %s6119_s4 = inlined_call_operand.hbm [shape: f32[1,1,1], index: 4, kind: output, shape index: {1}]  }
   0x1   :  { %v81_v0 = vld [vmem:[%s6116_s1] sm:$0xff]  ;;  %v18_v2 = vld [vmem:[%s6115_s0 + $0x8] sm:$0xff]  ;;  %v19_v3 = vld [vmem:[%s6115_s0 + $0x10] sm:$0xff] }
   0x2   :  { %v17_v1 = vld [vmem:[%s6115_s0] sm:$0xff]  ;;  %3523 = vmatprep.subr.msk.mxu0 %vm83_vm0, %v81_v0  ;;  %3621 = vmatprep.subr.mxu1 %v81_v0  ;;  %v20_v4 = vld [vmem:[%s6115_s0 + $0x18] sm:$0xff]  ;;  %v22_v6 = vld [vmem:[%s6115_s0 + $0x28] sm:$0xff] }
   0x3   :  { %3525 = vmatprep.mubr.msk.f32.mxu0 %vm83_vm0, %v17_v1  ;;  %3524 = vmatpush3.xpose.msk.msra.mxu0 %vm83_vm0, %v81_v0  ;;  %v21_v5 = vld [vmem:[%s6115_s0 + $0x20] sm:$0xff]  ;;  %v23_v7 = vld [vmem:[%s6115_s0 + $0x30] sm:$0xff]  ;;  %v24_v8 = vld [vmem:[%s6115_s0 + $0x38] sm:$0xff] }
   0x4   :  { %3622 = vmatpush3.msra.mxu1 %v81_v0  ;;  %v25_v9 = vld [vmem:[%s6115_s0 + $0x40] sm:$0xff]  ;;  %v26_v10 = vld [vmem:[%s6115_s0 + $0x48] sm:$0xff]  ;;  %v27_v11 = vld [vmem:[%s6115_s0 + $0x50] sm:$0xff] }
   0x6   :  { %3526 = vmatmul.mubr.msk.f32.vlgmr.msra.gmra.mxu0 %vm83_vm0, %v18_v2 }
   0x7   :  { %3528 = vmatprep.mubr.msk.f32.mxu0 %vm83_vm0, %v19_v3 }
   0xa   :  { %3529 = vmatmul.mubr.msk.f32.gmra.mxu0 %vm83_vm0, %v20_v4 }
   0xb   :  { %3531 = vmatprep.mubr.msk.f32.mxu0 %vm83_vm0, %v21_v5 }
   0xe   :  { %3532 = vmatmul.mubr.msk.f32.gmra.mxu0 %vm83_vm0, %v22_v6 }
   0xf   :  { %3534 = vmatprep.mubr.msk.f32.mxu0 %vm83_vm0, %v23_v7 }
  0x12   :  { %3535 = vmatmul.mubr.msk.f32.gmra.mxu0 %vm83_vm0, %v24_v8 }
  0x13   :  { %3537 = vmatprep.mubr.msk.f32.mxu0 %vm83_vm0, %v25_v9 }
  0x16   :  { %3538 = vmatmul.mubr.msk.f32.gmra.mxu0 %vm83_vm0, %v26_v10 }
  0x17   :  { %10 = vsyncpa [#allocation3], 0  ;;  %3540 = vmatprep.mubr.msk.f32.mxu0 %vm83_vm0, %v27_v11  ;;  %v28_v12 = vld [vmem:[%s6115_s0 + $0x58] sm:$0xff]  ;;  %v29_v13 = vld [vmem:[%s6115_s0 + $0x60] sm:$0xff]  ;;  %vm800_vm1 = vcmask 64512  }
  0x18   :  { %v30_v14 = vld [vmem:[%s6115_s0 + $0x68] sm:$0xff]  ;;  %v31_v15 = vld [vmem:[%s6115_s0 + $0x70] sm:$0xff]  ;;  %v32_v16 = vld [vmem:[%s6115_s0 + $0x78] sm:$0xff] }
  0x19   :  { %v33_v17 = vld [vmem:[%s6115_s0 + $0x80] sm:$0xff]  ;;  %v34_v18 = vld [vmem:[%s6115_s0 + $0x88] sm:$0xff]  ;;  %v35_v19 = vld [vmem:[%s6115_s0 + $0x90] sm:$0xff] }
  0x1a   :  { %3541 = vmatmul.mubr.msk.f32.gmra.mxu0 %vm83_vm0, %v28_v12  ;;  %v36_v20 = vld [vmem:[%s6115_s0 + $0x98] sm:$0xff]  ;;  %v37_v21 = vld [vmem:[%s6115_s0 + $0xa0] sm:$0xff]  ;;  %v38_v22 = vld [vmem:[%s6115_s0 + $0xa8] sm:$0xff] }
  0x1b   :  { %3543 = vmatprep.mubr.msk.f32.mxu0 %vm83_vm0, %v29_v13  ;;  %v39_v23 = vld [vmem:[%s6115_s0 + $0xb0] sm:$0xff]  ;;  %v40_v24 = vld [vmem:[%s6115_s0 + $0xb8] sm:$0xff]  ;;  %v41_v25 = vld [vmem:[%s6115_s0 + $0xc0] sm:$0xff] }
  0x1c   :  { %v42_v26 = vld [vmem:[%s6115_s0 + $0xc8] sm:$0xff]  ;;  %v43_v27 = vld [vmem:[%s6115_s0 + $0xd0] sm:$0xff]  ;;  %v44_v28 = vld [vmem:[%s6115_s0 + $0xd8] sm:$0xff] }
  0x1d   :  { %v45_v29 = vld [vmem:[%s6115_s0 + $0xe0] sm:$0xff]  ;;  %v46_v30 = vld [vmem:[%s6115_s0 + $0xe8] sm:$0xff]  ;;  %v47_v31 = vld [vmem:[%s6115_s0 + $0xf0] sm:$0xff] }
  0x1e   :  { %3544 = vmatmul.mubr.msk.f32.gmra.mxu0 %vm83_vm0, %v30_v14  ;;  %v48_v32 = vld [vmem:[%s6115_s0 + $0xf8] sm:$0xff]  ;;  %v49_v33 = vld [vmem:[%s6115_s0 + $0x100] sm:$0xff]  ;;  %v50_v34 = vld [vmem:[%s6115_s0 + $0x108] sm:$0xff] }
  0x1f   :  { %3546 = vmatprep.mubr.msk.f32.mxu0 %vm83_vm0, %v31_v15  ;;  %v51_v35 = vld [vmem:[%s6115_s0 + $0x110] sm:$0xff]  ;;  %v52_v36 = vld [vmem:[%s6115_s0 + $0x118] sm:$0xff]  ;;  %v53_v37 = vld [vmem:[%s6115_s0 + $0x120] sm:$0xff] }
  0x20   :  { %v54_v38 = vld [vmem:[%s6115_s0 + $0x128] sm:$0xff]  ;;  %v55_v39 = vld [vmem:[%s6115_s0 + $0x130] sm:$0xff]  ;;  %v56_v40 = vld [vmem:[%s6115_s0 + $0x138] sm:$0xff] }
  0x21   :  { %v57_v41 = vld [vmem:[%s6115_s0 + $0x140] sm:$0xff]  ;;  %v58_v42 = vld [vmem:[%s6115_s0 + $0x148] sm:$0xff]  ;;  %v59_v43 = vld [vmem:[%s6115_s0 + $0x150] sm:$0xff] }
  0x22   :  { %3547 = vmatmul.mubr.msk.f32.gmra.mxu0 %vm83_vm0, %v32_v16  ;;  %v60_v44 = vld [vmem:[%s6115_s0 + $0x158] sm:$0xff]  ;;  %v61_v45 = vld [vmem:[%s6115_s0 + $0x160] sm:$0xff]  ;;  %v62_v46 = vld [vmem:[%s6115_s0 + $0x168] sm:$0xff] }
  0x23   :  { %3549 = vmatprep.mubr.msk.f32.mxu0 %vm83_vm0, %v33_v17  ;;  %v63_v47 = vld [vmem:[%s6115_s0 + $0x170] sm:$0xff]  ;;  %v64_v48 = vld [vmem:[%s6115_s0 + $0x178] sm:$0xff]  ;;  %v65_v49 = vld [vmem:[%s6115_s0 + $0x180] sm:$0xff] }
  0x24   :  { %v66_v50 = vld [vmem:[%s6115_s0 + $0x188] sm:$0xff]  ;;  %v67_v51 = vld [vmem:[%s6115_s0 + $0x190] sm:$0xff]  ;;  %v68_v52 = vld [vmem:[%s6115_s0 + $0x198] sm:$0xff] }
  0x25   :  { %v69_v53 = vld [vmem:[%s6115_s0 + $0x1a0] sm:$0xff]  ;;  %v70_v54 = vld [vmem:[%s6115_s0 + $0x1a8] sm:$0xff]  ;;  %v71_v55 = vld [vmem:[%s6115_s0 + $0x1b0] sm:$0xff] }
  0x26   :  { %3550 = vmatmul.mubr.msk.f32.gmra.mxu0 %vm83_vm0, %v34_v18  ;;  %v72_v56 = vld [vmem:[%s6115_s0 + $0x1b8] sm:$0xff]  ;;  %v73_v57 = vld [vmem:[%s6115_s0 + $0x1c0] sm:$0xff]  ;;  %v74_v58 = vld [vmem:[%s6115_s0 + $0x1c8] sm:$0xff] }
  0x27   :  { %3552 = vmatprep.mubr.msk.f32.mxu0 %vm83_vm0, %v35_v19  ;;  %v75_v59 = vld [vmem:[%s6115_s0 + $0x1d0] sm:$0xff]  ;;  %v76_v60 = vld [vmem:[%s6115_s0 + $0x1d8] sm:$0xff]  ;;  %v77_v61 = vld [vmem:[%s6115_s0 + $0x1e0] sm:$0xff] }
  0x28   :  { %v78_v62 = vld [vmem:[%s6115_s0 + $0x1e8] sm:$0xff]  ;;  %v79_v63 = vld [vmem:[%s6115_s0 + $0x1f0] sm:$0xff]  ;;  %v80_v0 = vld [vmem:[%s6115_s0 + $0x1f8] sm:$0xff] }
  0x29   :  { %v4100_v2 = vld [vmem:[%s6117_s2] ss:$0 sm:$0xff] }
  0x2a   :  { %3553 = vmatmul.mubr.msk.f32.gmra.mxu0 %vm83_vm0, %v36_v20 }
  0x2b   :  { %3555 = vmatprep.mubr.msk.f32.mxu0 %vm83_vm0, %v37_v21 }
  0x2e   :  { %3556 = vmatmul.mubr.msk.f32.gmra.mxu0 %vm83_vm0, %v38_v22 }
  0x2f   :  { %3558 = vmatprep.mubr.msk.f32.mxu0 %vm83_vm0, %v39_v23 }
  0x32   :  { %3559 = vmatmul.mubr.msk.f32.gmra.mxu0 %vm83_vm0, %v40_v24 }
  0x33   :  { %3561 = vmatprep.mubr.msk.f32.mxu0 %vm83_vm0, %v41_v25 }
  0x36   :  { %3562 = vmatmul.mubr.msk.f32.gmra.mxu0 %vm83_vm0, %v42_v26 }
  0x37   :  { %3564 = vmatprep.mubr.msk.f32.mxu0 %vm83_vm0, %v43_v27 }
  0x3a   :  { %3565 = vmatmul.mubr.msk.f32.gmra.mxu0 %vm83_vm0, %v44_v28 }
  0x3b   :  { %3567 = vmatprep.mubr.msk.f32.mxu0 %vm83_vm0, %v45_v29 }
  0x3e   :  { %3568 = vmatmul.mubr.msk.f32.gmra.mxu0 %vm83_vm0, %v46_v30 }
  0x3f   :  { %3570 = vmatprep.mubr.msk.f32.mxu0 %vm83_vm0, %v47_v31 }
  0x42   :  { %3571 = vmatmul.mubr.msk.f32.gmra.mxu0 %vm83_vm0, %v48_v32 }
  0x43   :  { %3573 = vmatprep.mubr.msk.f32.mxu0 %vm83_vm0, %v49_v33 }
  0x46   :  { %3574 = vmatmul.mubr.msk.f32.gmra.mxu0 %vm83_vm0, %v50_v34 }
  0x47   :  { %3576 = vmatprep.mubr.msk.f32.mxu0 %vm83_vm0, %v51_v35 }
  0x4a   :  { %3577 = vmatmul.mubr.msk.f32.gmra.mxu0 %vm83_vm0, %v52_v36 }
  0x4b   :  { %3579 = vmatprep.mubr.msk.f32.mxu0 %vm83_vm0, %v53_v37 }
  0x4e   :  { %3580 = vmatmul.mubr.msk.f32.gmra.mxu0 %vm83_vm0, %v54_v38 }
  0x4f   :  { %3582 = vmatprep.mubr.msk.f32.mxu0 %vm83_vm0, %v55_v39 }
  0x52   :  { %3583 = vmatmul.mubr.msk.f32.gmra.mxu0 %vm83_vm0, %v56_v40 }
  0x53   :  { %3585 = vmatprep.mubr.msk.f32.mxu0 %vm83_vm0, %v57_v41 }
  0x56   :  { %3586 = vmatmul.mubr.msk.f32.gmra.mxu0 %vm83_vm0, %v58_v42 }
  0x57   :  { %3588 = vmatprep.mubr.msk.f32.mxu0 %vm83_vm0, %v59_v43 }
  0x5a   :  { %3589 = vmatmul.mubr.msk.f32.gmra.mxu0 %vm83_vm0, %v60_v44 }
  0x5b   :  { %3591 = vmatprep.mubr.msk.f32.mxu0 %vm83_vm0, %v61_v45 }
  0x5e   :  { %3592 = vmatmul.mubr.msk.f32.gmra.mxu0 %vm83_vm0, %v62_v46 }
  0x5f   :  { %3594 = vmatprep.mubr.msk.f32.mxu0 %vm83_vm0, %v63_v47 }
  0x62   :  { %3595 = vmatmul.mubr.msk.f32.gmra.mxu0 %vm83_vm0, %v64_v48 }
  0x63   :  { %3597 = vmatprep.mubr.msk.f32.mxu0 %vm83_vm0, %v65_v49 }
  0x66   :  { %3598 = vmatmul.mubr.msk.f32.gmra.mxu0 %vm83_vm0, %v66_v50 }
  0x67   :  { %3600 = vmatprep.mubr.msk.f32.mxu0 %vm83_vm0, %v67_v51 }
  0x6a   :  { %3601 = vmatmul.mubr.msk.f32.gmra.mxu0 %vm83_vm0, %v68_v52 }
  0x6b   :  { %3603 = vmatprep.mubr.msk.f32.mxu0 %vm83_vm0, %v69_v53 }
  0x6e   :  { %3604 = vmatmul.mubr.msk.f32.gmra.mxu0 %vm83_vm0, %v70_v54 }
  0x6f   :  { %3606 = vmatprep.mubr.msk.f32.mxu0 %vm83_vm0, %v71_v55 }
  0x72   :  { %3607 = vmatmul.mubr.msk.f32.gmra.mxu0 %vm83_vm0, %v72_v56 }
  0x73   :  { %3609 = vmatprep.mubr.msk.f32.mxu0 %vm83_vm0, %v73_v57 }
  0x76   :  { %3610 = vmatmul.mubr.msk.f32.gmra.mxu0 %vm83_vm0, %v74_v58 }
  0x77   :  { %3612 = vmatprep.mubr.msk.f32.mxu0 %vm83_vm0, %v75_v59 }
  0x7a   :  { %3613 = vmatmul.mubr.msk.f32.gmra.mxu0 %vm83_vm0, %v76_v60 }
  0x7b   :  { %3615 = vmatprep.mubr.msk.f32.mxu0 %vm83_vm0, %v77_v61 }
  0x7e   :  { %3616 = vmatmul.mubr.msk.f32.gmra.mxu0 %vm83_vm0, %v78_v62 }
  0x7f   :  { %3618 = vmatprep.mubr.msk.f32.mxu0 %vm83_vm0, %v79_v63 }
  0x82   :  { %3619 = vmatmul.mubr.msk.f32.gmra.mxu0 %vm83_vm0, %v80_v0 }
  0xc6   :  { %v3527_v1 = vpop.f32.mrf.mxu0 }
  0xc7   :  { %v665_v3 = vmul.f32 2.0, %v3527_v1 }
  0xc8   :  { %v345_v4 = vpop.f32.mrf.mxu0 }
  0xc9   :  { %v664_v5 = vmul.f32 2.0, %v345_v4  ;;  %v4103_v6 = vsub.f32 %v4100_v2, %v665_v3 }
  0xca   :  { %v3530_v7 = vpop.f32.mrf.mxu0 }
  0xcb   :  { %v667_v8 = vmul.f32 2.0, %v3530_v7  ;;  %v804_v9 = vsel %vm800_vm1, %v4103_v6, inf  ;;  %v4108_v10 = vsub.f32 %v4100_v2, %v664_v5 }
  0xcc   :  { %805 = vmin.xlane.f32.xlu0 %v804_v9  ;;  %v355_v11 = vpop.f32.mrf.mxu0 }
  0xcd   :  { %v666_v12 = vmul.f32 2.0, %v355_v11  ;;  %v4111_v13 = vsub.f32 %v4100_v2, %v667_v8  ;;  %v801_v16 = vsel %vm800_vm1, %v4108_v10, inf }
  0xce   :  { %v3533_v14 = vpop.f32.mrf.mxu0 }
  0xcf   :  { %v669_v15 = vmul.f32 2.0, %v3533_v14  ;;  %v810_v17 = vsel %vm800_vm1, %v4111_v13, inf  ;;  %v4118_v18 = vsub.f32 %v4100_v2, %v666_v12 }
  0xd0   :  { %802 = vmin.xlane.f32.xlu0 %v801_v16  ;;  %811 = vmin.xlane.f32.xlu1 %v810_v17  ;;  %v365_v19 = vpop.f32.mrf.mxu0 }
  0xd1   :  { %v668_v20 = vmul.f32 2.0, %v365_v19  ;;  %v4121_v21 = vsub.f32 %v4100_v2, %v669_v15  ;;  %v807_v24 = vsel %vm800_vm1, %v4118_v18, inf }
  0xd2   :  { %v3536_v22 = vpop.f32.mrf.mxu0 }
  0xd3   :  { %v671_v23 = vmul.f32 2.0, %v3536_v22  ;;  %v4126_v25 = vsub.f32 %v4100_v2, %v668_v20  ;;  %v816_v29 = vsel %vm800_vm1, %v4121_v21, inf }
  0xd4   :  { %808 = vmin.xlane.f32.xlu1 %v807_v24  ;;  %v375_v26 = vpop.f32.mrf.mxu0 }
  0xd5   :  { %v670_v27 = vmul.f32 2.0, %v375_v26  ;;  %v813_v28 = vsel %vm800_vm1, %v4126_v25, inf  ;;  %v4133_v30 = vsub.f32 %v4100_v2, %v671_v23 }
  0xd6   :  { %814 = vmin.xlane.f32.xlu0 %v813_v28  ;;  %v3539_v31 = vpop.f32.mrf.mxu0 }
  0xd7   :  { %v673_v32 = vmul.f32 2.0, %v3539_v31  ;;  %v4136_v33 = vsub.f32 %v4100_v2, %v670_v27  ;;  %v822_v37 = vsel %vm800_vm1, %v4133_v30, inf }
  0xd8   :  { %817 = vmin.xlane.f32.xlu1 %v816_v29  ;;  %v385_v34 = vpop.f32.mrf.mxu0 }
  0xd9   :  { %v672_v35 = vmul.f32 2.0, %v385_v34  ;;  %v819_v36 = vsel %vm800_vm1, %v4136_v33, inf  ;;  %v4143_v38 = vsub.f32 %v4100_v2, %v673_v32 }
  0xda   :  { %820 = vmin.xlane.f32.xlu0 %v819_v36  ;;  %v3542_v39 = vpop.f32.mrf.mxu0 }
  0xdb   :  { %v675_v40 = vmul.f32 2.0, %v3542_v39  ;;  %v4146_v41 = vsub.f32 %v4100_v2, %v672_v35  ;;  %v828_v45 = vsel %vm800_vm1, %v4143_v38, inf }
  0xdc   :  { %823 = vmin.xlane.f32.xlu1 %v822_v37  ;;  %v395_v42 = vpop.f32.mrf.mxu0 }
  0xdd   :  { %v674_v43 = vmul.f32 2.0, %v395_v42  ;;  %v825_v44 = vsel %vm800_vm1, %v4146_v41, inf  ;;  %v4153_v46 = vsub.f32 %v4100_v2, %v675_v40 }
  0xde   :  { %826 = vmin.xlane.f32.xlu0 %v825_v44  ;;  %v3545_v47 = vpop.f32.mrf.mxu0 }
  0xdf   :  { %v677_v48 = vmul.f32 2.0, %v3545_v47  ;;  %v4156_v49 = vsub.f32 %v4100_v2, %v674_v43  ;;  %v834_v53 = vsel %vm800_vm1, %v4153_v46, inf }
  0xe0   :  { %829 = vmin.xlane.f32.xlu1 %v828_v45  ;;  %v405_v50 = vpop.f32.mrf.mxu0 }
  0xe1   :  { %v676_v51 = vmul.f32 2.0, %v405_v50  ;;  %v831_v52 = vsel %vm800_vm1, %v4156_v49, inf  ;;  %v4163_v54 = vsub.f32 %v4100_v2, %v677_v48 }
  0xe2   :  { %832 = vmin.xlane.f32.xlu0 %v831_v52  ;;  %v3548_v55 = vpop.f32.mrf.mxu0 }
  0xe3   :  { %v679_v56 = vmul.f32 2.0, %v3548_v55  ;;  %v4166_v57 = vsub.f32 %v4100_v2, %v676_v51  ;;  %v840_v61 = vsel %vm800_vm1, %v4163_v54, inf }
  0xe4   :  { %835 = vmin.xlane.f32.xlu1 %v834_v53  ;;  %v415_v58 = vpop.f32.mrf.mxu0 }
  0xe5   :  { %v678_v59 = vmul.f32 2.0, %v415_v58  ;;  %v837_v60 = vsel %vm800_vm1, %v4166_v57, inf  ;;  %v4173_v62 = vsub.f32 %v4100_v2, %v679_v56 }
  0xe6   :  { %838 = vmin.xlane.f32.xlu0 %v837_v60  ;;  %v3551_v63 = vpop.f32.mrf.mxu0 }
  0xe7   :  { %v681_v0 = vmul.f32 2.0, %v3551_v63  ;;  %v4176_v1 = vsub.f32 %v4100_v2, %v678_v59  ;;  %v846_v7 = vsel %vm800_vm1, %v4173_v62, inf }
  0xe8   :  { %841 = vmin.xlane.f32.xlu1 %v840_v61  ;;  %v425_v3 = vpop.f32.mrf.mxu0 }
  0xe9   :  { %v680_v4 = vmul.f32 2.0, %v425_v3  ;;  %v843_v5 = vsel %vm800_vm1, %v4176_v1, inf  ;;  %v4183_v8 = vsub.f32 %v4100_v2, %v681_v0 }
  0xea   :  { %844 = vmin.xlane.f32.xlu0 %v843_v5  ;;  %v3554_v9 = vpop.f32.mrf.mxu0 }
  0xeb   :  { %v683_v11 = vmul.f32 2.0, %v3554_v9  ;;  %v4186_v12 = vsub.f32 %v4100_v2, %v680_v4  ;;  %v852_v17 = vsel %vm800_vm1, %v4183_v8, inf }
  0xec   :  { %847 = vmin.xlane.f32.xlu1 %v846_v7  ;;  %v435_v14 = vpop.f32.mrf.mxu0 }
  0xed   :  { %v682_v15 = vmul.f32 2.0, %v435_v14  ;;  %v849_v16 = vsel %vm800_vm1, %v4186_v12, inf  ;;  %v4193_v19 = vsub.f32 %v4100_v2, %v683_v11 }
  0xee   :  { %850 = vmin.xlane.f32.xlu0 %v849_v16  ;;  %v3557_v20 = vpop.f32.mrf.mxu0 }
  0xef   :  { %v685_v22 = vmul.f32 2.0, %v3557_v20  ;;  %v4196_v23 = vsub.f32 %v4100_v2, %v682_v15  ;;  %v858_v28 = vsel %vm800_vm1, %v4193_v19, inf }
  0xf0   :  { %853 = vmin.xlane.f32.xlu1 %v852_v17  ;;  %v445_v24 = vpop.f32.mrf.mxu0 }
  0xf1   :  { %v684_v26 = vmul.f32 2.0, %v445_v24  ;;  %v855_v27 = vsel %vm800_vm1, %v4196_v23, inf  ;;  %v4203_v29 = vsub.f32 %v4100_v2, %v685_v22 }
  0xf2   :  { %856 = vmin.xlane.f32.xlu0 %v855_v27  ;;  %v3560_v31 = vpop.f32.mrf.mxu0 }
  0xf3   :  { %v687_v32 = vmul.f32 2.0, %v3560_v31  ;;  %v4206_v34 = vsub.f32 %v4100_v2, %v684_v26  ;;  %v864_v39 = vsel %vm800_vm1, %v4203_v29, inf }
  0xf4   :  { %859 = vmin.xlane.f32.xlu1 %v858_v28  ;;  %v455_v35 = vpop.f32.mrf.mxu0 }
  0xf5   :  { %v686_v36 = vmul.f32 2.0, %v455_v35  ;;  %v861_v37 = vsel %vm800_vm1, %v4206_v34, inf  ;;  %v4213_v40 = vsub.f32 %v4100_v2, %v687_v32 }
  0xf6   :  { %862 = vmin.xlane.f32.xlu0 %v861_v37  ;;  %v3563_v42 = vpop.f32.mrf.mxu0 }
  0xf7   :  { %v689_v43 = vmul.f32 2.0, %v3563_v42  ;;  %v4216_v44 = vsub.f32 %v4100_v2, %v686_v36  ;;  %v870_v50 = vsel %vm800_vm1, %v4213_v40, inf }
  0xf8   :  { %865 = vmin.xlane.f32.xlu1 %v864_v39  ;;  %v465_v45 = vpop.f32.mrf.mxu0 }
  0xf9   :  { %v688_v47 = vmul.f32 2.0, %v465_v45  ;;  %v867_v48 = vsel %vm800_vm1, %v4216_v44, inf  ;;  %v4223_v51 = vsub.f32 %v4100_v2, %v689_v43 }
  0xfa   :  { %868 = vmin.xlane.f32.xlu0 %v867_v48  ;;  %v3566_v52 = vpop.f32.mrf.mxu0 }
  0xfb   :  { %v691_v53 = vmul.f32 2.0, %v3566_v52  ;;  %v4226_v55 = vsub.f32 %v4100_v2, %v688_v47  ;;  %v876_v60 = vsel %vm800_vm1, %v4223_v51, inf }
  0xfc   :  { %871 = vmin.xlane.f32.xlu1 %v870_v50  ;;  %v475_v56 = vpop.f32.mrf.mxu0 }
  0xfd   :  { %v690_v58 = vmul.f32 2.0, %v475_v56  ;;  %v873_v59 = vsel %vm800_vm1, %v4226_v55, inf  ;;  %v4233_v61 = vsub.f32 %v4100_v2, %v691_v53 }
  0xfe   :  { %874 = vmin.xlane.f32.xlu0 %v873_v59  ;;  %v3569_v63 = vpop.f32.mrf.mxu0 }
  0xff   :  { %v693_v0 = vmul.f32 2.0, %v3569_v63  ;;  %v4236_v3 = vsub.f32 %v4100_v2, %v690_v58  ;;  %v882_v9 = vsel %vm800_vm1, %v4233_v61, inf }
 0x100   :  { %877 = vmin.xlane.f32.xlu1 %v876_v60  ;;  %v485_v4 = vpop.f32.mrf.mxu0 }
 0x101   :  { %v692_v5 = vmul.f32 2.0, %v485_v4  ;;  %v879_v7 = vsel %vm800_vm1, %v4236_v3, inf  ;;  %v4243_v11 = vsub.f32 %v4100_v2, %v693_v0 }
 0x102   :  { %880 = vmin.xlane.f32.xlu0 %v879_v7  ;;  %v3572_v14 = vpop.f32.mrf.mxu0 }
 0x103   :  { %v695_v15 = vmul.f32 2.0, %v3572_v14  ;;  %v4246_v16 = vsub.f32 %v4100_v2, %v692_v5  ;;  %v888_v24 = vsel %vm800_vm1, %v4243_v11, inf }
 0x104   :  { %883 = vmin.xlane.f32.xlu1 %v882_v9  ;;  %v495_v17 = vpop.f32.mrf.mxu0 }
 0x105   :  { %v694_v20 = vmul.f32 2.0, %v495_v17  ;;  %v885_v22 = vsel %vm800_vm1, %v4246_v16, inf  ;;  %v4253_v26 = vsub.f32 %v4100_v2, %v695_v15 }
 0x106   :  { %886 = vmin.xlane.f32.xlu0 %v885_v22  ;;  %v3575_v27 = vpop.f32.mrf.mxu0 }
 0x107   :  { %v697_v28 = vmul.f32 2.0, %v3575_v27  ;;  %v4256_v31 = vsub.f32 %v4100_v2, %v694_v20  ;;  %v894_v37 = vsel %vm800_vm1, %v4253_v26, inf }
 0x108   :  { %889 = vmin.xlane.f32.xlu1 %v888_v24  ;;  %v505_v32 = vpop.f32.mrf.mxu0 }
 0x109   :  { %v696_v35 = vmul.f32 2.0, %v505_v32  ;;  %v891_v36 = vsel %vm800_vm1, %v4256_v31, inf  ;;  %v4263_v39 = vsub.f32 %v4100_v2, %v697_v28 }
 0x10a   :  { %892 = vmin.xlane.f32.xlu0 %v891_v36  ;;  %v3578_v42 = vpop.f32.mrf.mxu0 }
 0x10b   :  { %v699_v43 = vmul.f32 2.0, %v3578_v42  ;;  %v4266_v45 = vsub.f32 %v4100_v2, %v696_v35  ;;  %v900_v52 = vsel %vm800_vm1, %v4263_v39, inf }
 0x10c   :  { %895 = vmin.xlane.f32.xlu1 %v894_v37  ;;  %v515_v47 = vpop.f32.mrf.mxu0 }
 0x10d   :  { %v698_v48 = vmul.f32 2.0, %v515_v47  ;;  %v897_v50 = vsel %vm800_vm1, %v4266_v45, inf  ;;  %v4273_v53 = vsub.f32 %v4100_v2, %v699_v43 }
 0x10e   :  { %898 = vmin.xlane.f32.xlu0 %v897_v50  ;;  %v3581_v56 = vpop.f32.mrf.mxu0 }
 0x10f   :  { %v701_v58 = vmul.f32 2.0, %v3581_v56  ;;  %v4276_v59 = vsub.f32 %v4100_v2, %v698_v48  ;;  %v906_v4 = vsel %vm800_vm1, %v4273_v53, inf }
 0x110   :  { %901 = vmin.xlane.f32.xlu1 %v900_v52  ;;  %v525_v60 = vpop.f32.mrf.mxu0 }
 0x111   :  { %v700_v63 = vmul.f32 2.0, %v525_v60  ;;  %v903_v0 = vsel %vm800_vm1, %v4276_v59, inf  ;;  %v4283_v5 = vsub.f32 %v4100_v2, %v701_v58 }
 0x112   :  { %904 = vmin.xlane.f32.xlu0 %v903_v0  ;;  %v3584_v7 = vpop.f32.mrf.mxu0 }
 0x113   :  { %v703_v9 = vmul.f32 2.0, %v3584_v7  ;;  %v4286_v14 = vsub.f32 %v4100_v2, %v700_v63  ;;  %v912_v22 = vsel %vm800_vm1, %v4283_v5, inf }
 0x114   :  { %907 = vmin.xlane.f32.xlu1 %v906_v4  ;;  %v535_v15 = vpop.f32.mrf.mxu0 }
 0x115   :  { %v702_v17 = vmul.f32 2.0, %v535_v15  ;;  %v909_v20 = vsel %vm800_vm1, %v4286_v14, inf  ;;  %v4293_v24 = vsub.f32 %v4100_v2, %v703_v9 }
 0x116   :  { %910 = vmin.xlane.f32.xlu0 %v909_v20  ;;  %v3587_v27 = vpop.f32.mrf.mxu0 }
 0x117   :  { %v705_v28 = vmul.f32 2.0, %v3587_v27  ;;  %v4296_v32 = vsub.f32 %v4100_v2, %v702_v17  ;;  %v918_v42 = vsel %vm800_vm1, %v4293_v24, inf }
 0x118   :  { %913 = vmin.xlane.f32.xlu1 %v912_v22  ;;  %v545_v35 = vpop.f32.mrf.mxu0 }
 0x119   :  { %v704_v36 = vmul.f32 2.0, %v545_v35  ;;  %v915_v37 = vsel %vm800_vm1, %v4296_v32, inf  ;;  %v4303_v43 = vsub.f32 %v4100_v2, %v705_v28 }
 0x11a   :  { %916 = vmin.xlane.f32.xlu0 %v915_v37  ;;  %v3590_v47 = vpop.f32.mrf.mxu0 }
 0x11b   :  { %v707_v48 = vmul.f32 2.0, %v3590_v47  ;;  %v4306_v50 = vsub.f32 %v4100_v2, %v704_v36  ;;  %v924_v60 = vsel %vm800_vm1, %v4303_v43, inf }
 0x11c   :  { %919 = vmin.xlane.f32.xlu1 %v918_v42  ;;  %v555_v52 = vpop.f32.mrf.mxu0 }
 0x11d   :  { %v706_v56 = vmul.f32 2.0, %v555_v52  ;;  %v921_v58 = vsel %vm800_vm1, %v4306_v50, inf  ;;  %v4313_v63 = vsub.f32 %v4100_v2, %v707_v48 }
 0x11e   :  { %922 = vmin.xlane.f32.xlu0 %v921_v58  ;;  %v3593_v0 = vpop.f32.mrf.mxu0 }
 0x11f   :  { %v709_v4 = vmul.f32 2.0, %v3593_v0  ;;  %v4316_v7 = vsub.f32 %v4100_v2, %v706_v56  ;;  %v930_v20 = vsel %vm800_vm1, %v4313_v63, inf }
 0x120   :  { %925 = vmin.xlane.f32.xlu1 %v924_v60  ;;  %v565_v9 = vpop.f32.mrf.mxu0 }
 0x121   :  { %v708_v15 = vmul.f32 2.0, %v565_v9  ;;  %v927_v17 = vsel %vm800_vm1, %v4316_v7, inf  ;;  %v4323_v22 = vsub.f32 %v4100_v2, %v709_v4 }
 0x122   :  { %928 = vmin.xlane.f32.xlu0 %v927_v17  ;;  %v3596_v27 = vpop.f32.mrf.mxu0 }
 0x123   :  { %v711_v28 = vmul.f32 2.0, %v3596_v27  ;;  %v4326_v35 = vsub.f32 %v4100_v2, %v708_v15  ;;  %v936_v47 = vsel %vm800_vm1, %v4323_v22, inf }
 0x124   :  { %931 = vmin.xlane.f32.xlu1 %v930_v20  ;;  %v575_v36 = vpop.f32.mrf.mxu0 }
 0x125   :  { %v710_v37 = vmul.f32 2.0, %v575_v36  ;;  %v933_v42 = vsel %vm800_vm1, %v4326_v35, inf  ;;  %v4333_v48 = vsub.f32 %v4100_v2, %v711_v28 }
 0x126   :  { %934 = vmin.xlane.f32.xlu0 %v933_v42  ;;  %v3599_v52 = vpop.f32.mrf.mxu0 }
 0x127   :  { %v713_v56 = vmul.f32 2.0, %v3599_v52  ;;  %v4336_v58 = vsub.f32 %v4100_v2, %v710_v37  ;;  %v942_v9 = vsel %vm800_vm1, %v4333_v48, inf }
 0x128   :  { %937 = vmin.xlane.f32.xlu1 %v936_v47  ;;  %v585_v60 = vpop.f32.mrf.mxu0 }
 0x129   :  { %v712_v0 = vmul.f32 2.0, %v585_v60  ;;  %v939_v4 = vsel %vm800_vm1, %v4336_v58, inf  ;;  %v4343_v15 = vsub.f32 %v4100_v2, %v713_v56 }
 0x12a   :  { %940 = vmin.xlane.f32.xlu0 %v939_v4  ;;  %v3602_v17 = vpop.f32.mrf.mxu0 }
 0x12b   :  { %v715_v20 = vmul.f32 2.0, %v3602_v17  ;;  %v4346_v27 = vsub.f32 %v4100_v2, %v712_v0  ;;  %v948_v42 = vsel %vm800_vm1, %v4343_v15, inf }
 0x12c   :  { %943 = vmin.xlane.f32.xlu1 %v942_v9  ;;  %v595_v28 = vpop.f32.mrf.mxu0 }
 0x12d   :  { %v714_v36 = vmul.f32 2.0, %v595_v28  ;;  %v945_v37 = vsel %vm800_vm1, %v4346_v27, inf  ;;  %v4353_v47 = vsub.f32 %v4100_v2, %v715_v20 }
 0x12e   :  { %946 = vmin.xlane.f32.xlu0 %v945_v37  ;;  %v3605_v52 = vpop.f32.mrf.mxu0 }
 0x12f   :  { %6227 = vst [vmem:[#allocation5_spill] sm:$0xff] %v4353_v47  ;;  %v717_v56 = vmul.f32 2.0, %v3605_v52  ;;  %v4356_v60 = vsub.f32 %v4100_v2, %v714_v36  ;;  %v954_v17 = vsel %vm800_vm1, %v4353_v47, inf }
 0x130   :  { %949 = vmin.xlane.f32.xlu1 %v948_v42  ;;  %v605_v0 = vpop.f32.mrf.mxu0 }
 0x131   :  { %6228 = vst [vmem:[#allocation6_spill] sm:$0xff] %v4356_v60  ;;  %v716_v4 = vmul.f32 2.0, %v605_v0  ;;  %v951_v9 = vsel %vm800_vm1, %v4356_v60, inf  ;;  %v4363_v28 = vsub.f32 %v4100_v2, %v717_v56 }
 0x132   :  { %952 = vmin.xlane.f32.xlu0 %v951_v9  ;;  %v3608_v20 = vpop.f32.mrf.mxu0 }
 0x133   :  { %6229 = vst [vmem:[#allocation7_spill] sm:$0xff] %v4363_v28  ;;  %v719_v37 = vmul.f32 2.0, %v3608_v20  ;;  %v4366_v52 = vsub.f32 %v4100_v2, %v716_v4  ;;  %v960_v60 = vsel %vm800_vm1, %v4363_v28, inf }
 0x134   :  { %955 = vmin.xlane.f32.xlu1 %v954_v17  ;;  %v615_v36 = vpop.f32.mrf.mxu0 }
 0x135   :  { %6230 = vst [vmem:[#allocation8_spill] sm:$0xff] %v4366_v52  ;;  %v718_v42 = vmul.f32 2.0, %v615_v36  ;;  %v957_v0 = vsel %vm800_vm1, %v4366_v52, inf  ;;  %v4373_v47 = vsub.f32 %v4100_v2, %v719_v37 }
 0x136   :  { %958 = vmin.xlane.f32.xlu0 %v957_v0  ;;  %v3611_v56 = vpop.f32.mrf.mxu0 }
 0x137   :  { %6231 = vst [vmem:[#allocation9_spill] sm:$0xff] %v4373_v47  ;;  %v721_v9 = vmul.f32 2.0, %v3611_v56  ;;  %v4376_v20 = vsub.f32 %v4100_v2, %v718_v42  ;;  %v966_v52 = vsel %vm800_vm1, %v4373_v47, inf }
 0x138   :  { %961 = vmin.xlane.f32.xlu1 %v960_v60  ;;  %v625_v4 = vpop.f32.mrf.mxu0 }
 0x139   :  { %6232 = vst [vmem:[#allocation10_spill] sm:$0xff] %v4376_v20  ;;  %v720_v17 = vmul.f32 2.0, %v625_v4  ;;  %v963_v36 = vsel %vm800_vm1, %v4376_v20, inf  ;;  %v4383_v28 = vsub.f32 %v4100_v2, %v721_v9 }
 0x13a   :  { %964 = vmin.xlane.f32.xlu0 %v963_v36  ;;  %v3614_v37 = vpop.f32.mrf.mxu0 }
 0x13b   :  { %6233 = vst [vmem:[#allocation11_spill] sm:$0xff] %v4383_v28  ;;  %v723_v0 = vmul.f32 2.0, %v3614_v37  ;;  %v4386_v56 = vsub.f32 %v4100_v2, %v720_v17  ;;  %v972_v20 = vsel %vm800_vm1, %v4383_v28, inf }
 0x13c   :  { %967 = vmin.xlane.f32.xlu1 %v966_v52  ;;  %v635_v42 = vpop.f32.mrf.mxu0 }
 0x13d   :  { %6234 = vst [vmem:[#allocation12_spill] sm:$0xff] %v4386_v56  ;;  %v722_v60 = vmul.f32 2.0, %v635_v42  ;;  %v969_v4 = vsel %vm800_vm1, %v4386_v56, inf  ;;  %v4393_v47 = vsub.f32 %v4100_v2, %v723_v0 }
 0x13e   :  { %970 = vmin.xlane.f32.xlu0 %v969_v4  ;;  %v3617_v9 = vpop.f32.mrf.mxu0 }
 0x13f   :  { %6235 = vst [vmem:[#allocation13_spill] sm:$0xff] %v4393_v47  ;;  %v725_v36 = vmul.f32 2.0, %v3617_v9  ;;  %v4396_v37 = vsub.f32 %v4100_v2, %v722_v60  ;;  %v978_v56 = vsel %vm800_vm1, %v4393_v47, inf }
 0x140   :  { %973 = vmin.xlane.f32.xlu1 %v972_v20  ;;  %v645_v17 = vpop.f32.mrf.mxu0 }
 0x141   :  { %6236 = vst [vmem:[#allocation14_spill] sm:$0xff] %v4396_v37  ;;  %v724_v52 = vmul.f32 2.0, %v645_v17  ;;  %v975_v42 = vsel %vm800_vm1, %v4396_v37, inf  ;;  %v4403_v28 = vsub.f32 %v4100_v2, %v725_v36 }
 0x142   :  { %976 = vmin.xlane.f32.xlu0 %v975_v42  ;;  %v3620_v0 = vpop.f32.mrf.mxu0  ;;  %v798_v42 = vlaneseq }
 0x143   :  { %6237 = vst [vmem:[#allocation15_spill] sm:$0xff] %v4403_v28  ;;  %v727_v4 = vmul.f32 2.0, %v3620_v0  ;;  %v4406_v9 = vsub.f32 %v4100_v2, %v724_v52  ;;  %v984_v37 = vsel %vm800_vm1, %v4403_v28, inf }
 0x144   :  { %979 = vmin.xlane.f32.xlu1 %v978_v56  ;;  %v655_v60 = vpop.f32.mrf.mxu0  ;;  %v4422_v0 = vand.u32 127, %v798_v42 }
 0x145   :  { %6238 = vst [vmem:[#allocation16_spill] sm:$0xff] %v4406_v9  ;;  %v726_v20 = vmul.f32 2.0, %v655_v60  ;;  %v981_v17 = vsel %vm800_vm1, %v4406_v9, inf  ;;  %v4413_v47 = vsub.f32 %v4100_v2, %v727_v4 }
 0x146   :  { %982 = vmin.xlane.f32.xlu0 %v981_v17 }
 0x147   :  { %6239 = vst [vmem:[#allocation17_spill] sm:$0xff] %v4413_v47  ;;  %v4416_v36 = vsub.f32 %v4100_v2, %v726_v20  ;;  %v990_v56 = vsel %vm800_vm1, %v4413_v47, inf }
 0x148   :  { %985 = vmin.xlane.f32.xlu1 %v984_v37 }
 0x149   :  { %6240 = vst [vmem:[#allocation18_spill] sm:$0xff] %v4416_v36  ;;  %v987_v52 = vsel %vm800_vm1, %v4416_v36, inf }
 0x14a   :  { %988 = vmin.xlane.f32.xlu0 %v987_v52 }
 0x14c   :  { %991 = vmin.xlane.f32.xlu1 %v990_v56 }
 0x155   :  { %v806_v60 = vpop.xlane.xlu0 %805 }
 0x156   :  { %vm994_vm2 = vcmp.eq.f32.partialorder %v4103_v6, %v806_v60 }
 0x157   :  { %v1058_v4 = vsel %vm994_vm2, %v4422_v0, 8 }
 0x158   :  { %v4427_v2 = vsel %vm800_vm1, %v1058_v4, 2147483647 }
 0x159   :  { %v803_v37 = vpop.xlane.xlu0 %802  ;;  %v812_v20 = vpop.xlane.xlu1 %811  ;;  %v1138_v17 = vshra.s32 %v4427_v2, 16 }
 0x15a   :  { %vm993_vm3 = vcmp.eq.f32.partialorder %v4108_v10, %v803_v37  ;;  %vm996_vm4 = vcmp.eq.f32.partialorder %v4111_v13, %v812_v20 }
 0x15b   :  { %v1057_v52 = vsel %vm993_vm3, %v4422_v0, 8  ;;  %v1060_v56 = vsel %vm996_vm4, %v4422_v0, 8  ;;  %v4434_v42 = vcvt.s32.f32 %v1138_v17 }
 0x15c   :  { %v4437_v6 = vsel %vm800_vm1, %v1060_v56, 2147483647  ;;  %v4440_v60 = vsel %vm800_vm1, %v1057_v52, 2147483647 }
 0x15d   :  { %v809_v4 = vpop.xlane.xlu1 %808  ;;  %1141 = vmin.xlane.f32.xlu1 %v4434_v42  ;;  %v1168_v47 = vshra.s32 %v4437_v6, 16  ;;  %v1123_v10 = vshra.s32 %v4440_v60, 16 }
 0x15e   :  { %vm995_vm5 = vcmp.eq.f32.partialorder %v4118_v18, %v809_v4 }
 0x15f   :  { %v1059_v13 = vsel %vm995_vm5, %v4422_v0, 8  ;;  %v815_v37 = vpop.xlane.xlu0 %814  ;;  %v4447_v20 = vcvt.s32.f32 %v1168_v47  ;;  %v4449_v17 = vcvt.s32.f32 %v1123_v10 }
 0x160   :  { %vm997_vm6 = vcmp.eq.f32.partialorder %v4126_v25, %v815_v37  ;;  %v4453_v52 = vsel %vm800_vm1, %v1059_v13, 2147483647 }
 0x161   :  { %v1061_v56 = vsel %vm997_vm6, %v4422_v0, 8  ;;  %v818_v36 = vpop.xlane.xlu1 %817  ;;  %1171 = vmin.xlane.f32.xlu1 %v4447_v20  ;;  %1126 = vmin.xlane.f32.xlu0 %v4449_v17  ;;  %v1153_v18 = vshra.s32 %v4453_v52, 16 }
 0x162   :  { %vm998_vm7 = vcmp.eq.f32.partialorder %v4121_v21, %v818_v36  ;;  %v4461_v47 = vsel %vm800_vm1, %v1061_v56, 2147483647 }
 0x163   :  { %6241 = vst [vmem:[#allocation19_spill] sm:$0xff] %v4461_v47  ;;  %v1062_v4 = vsel %vm998_vm7, %v4422_v0, 8  ;;  %v821_v25 = vpop.xlane.xlu0 %820  ;;  %v4464_v10 = vcvt.s32.f32 %v1153_v18  ;;  %v1183_v13 = vshra.s32 %v4461_v47, 16 }
 0x164   :  { %vm999_vm8 = vcmp.eq.f32.partialorder %v4136_v33, %v821_v25  ;;  %v4469_v37 = vsel %vm800_vm1, %v1062_v4, 2147483647 }
 0x165   :  { %6242 = vst [vmem:[#allocation20_spill] sm:$0xff] %v4469_v37  ;;  %v1063_v9 = vsel %vm999_vm8, %v4422_v0, 8  ;;  %v824_v28 = vpop.xlane.xlu1 %823  ;;  %1156 = vmin.xlane.f32.xlu0 %v4464_v10  ;;  %v1198_v21 = vshra.s32 %v4469_v37, 16  ;;  %v4481_v33 = vcvt.s32.f32 %v1183_v13 }
 0x166   :  { %vm1000_vm9 = vcmp.eq.f32.partialorder %v4133_v30, %v824_v28  ;;  %v4476_v36 = vsel %vm800_vm1, %v1063_v9, 2147483647 }
 0x167   :  { %6243 = vst [vmem:[#allocation21_spill] sm:$0xff] %v4476_v36  ;;  %v1064_v56 = vsel %vm1000_vm9, %v4422_v0, 8  ;;  %v827_v18 = vpop.xlane.xlu0 %826  ;;  %v4479_v47 = vcvt.s32.f32 %v1198_v21  ;;  %v1213_v4 = vshra.s32 %v4476_v36, 16 }
 0x168   :  { %vm1001_vm10 = vcmp.eq.f32.partialorder %v4146_v41, %v827_v18  ;;  %v4486_v25 = vsel %vm800_vm1, %v1064_v56, 2147483647 }
 0x169   :  { %6244 = vst [vmem:[#allocation22_spill] sm:$0xff] %v4486_v25  ;;  %v1065_v37 = vsel %vm1001_vm10, %v4422_v0, 8  ;;  %v830_v30 = vpop.xlane.xlu1 %829  ;;  %1201 = vmin.xlane.f32.xlu1 %v4479_v47  ;;  %1186 = vmin.xlane.f32.xlu0 %v4481_v33  ;;  %v1228_v28 = vshra.s32 %v4486_v25, 16  ;;  %v4499_v56 = vcvt.s32.f32 %v1213_v4 }
 0x16a   :  { %vm1002_vm11 = vcmp.eq.f32.partialorder %v4143_v38, %v830_v30  ;;  %v4494_v9 = vsel %vm800_vm1, %v1065_v37, 2147483647 }
 0x16b   :  { %6245 = vst [vmem:[#allocation23_spill] sm:$0xff] %v4494_v9  ;;  %v1066_v13 = vsel %vm1002_vm11, %v4422_v0, 8  ;;  %v833_v41 = vpop.xlane.xlu0 %832  ;;  %v4497_v21 = vcvt.s32.f32 %v1228_v28  ;;  %v1243_v18 = vshra.s32 %v4494_v9, 16 }
 0x16c   :  { %vm1003_vm12 = vcmp.eq.f32.partialorder %v4156_v49, %v833_v41  ;;  %v4504_v36 = vsel %vm800_vm1, %v1066_v13, 2147483647 }
 0x16d   :  { %6246 = vst [vmem:[#allocation24_spill] sm:$0xff] %v4504_v36  ;;  %v1067_v25 = vsel %vm1003_vm12, %v4422_v0, 8  ;;  %v836_v38 = vpop.xlane.xlu1 %835  ;;  %1231 = vmin.xlane.f32.xlu1 %v4497_v21  ;;  %1216 = vmin.xlane.f32.xlu0 %v4499_v56  ;;  %v1258_v37 = vshra.s32 %v4504_v36, 16  ;;  %v4517_v13 = vcvt.s32.f32 %v1243_v18 }
 0x16e   :  { %vm1004_vm13 = vcmp.eq.f32.partialorder %v4153_v46, %v836_v38  ;;  %v4512_v4 = vsel %vm800_vm1, %v1067_v25, 2147483647 }
 0x16f   :  { %6247 = vst [vmem:[#allocation25_spill] sm:$0xff] %v4512_v4  ;;  %v1068_v30 = vsel %vm1004_vm13, %v4422_v0, 8  ;;  %v839_v49 = vpop.xlane.xlu0 %838  ;;  %v4515_v28 = vcvt.s32.f32 %v1258_v37  ;;  %v1273_v41 = vshra.s32 %v4512_v4, 16 }
 0x170   :  { %vm1005_vm14 = vcmp.eq.f32.partialorder %v4166_v57, %v839_v49  ;;  %v4522_v9 = vsel %vm800_vm1, %v1068_v30, 2147483647 }
 0x171   :  { %6248 = vst [vmem:[#allocation26_spill] sm:$0xff] %v4522_v9  ;;  %v1069_v36 = vsel %vm1005_vm14, %v4422_v0, 8  ;;  %v842_v46 = vpop.xlane.xlu1 %841  ;;  %1261 = vmin.xlane.f32.xlu1 %v4515_v28  ;;  %1246 = vmin.xlane.f32.xlu0 %v4517_v13  ;;  %v1288_v25 = vshra.s32 %v4522_v9, 16  ;;  %v4535_v30 = vcvt.s32.f32 %v1273_v41 }
 0x172   :  { %vm1006_vm15 = vcmp.eq.f32.partialorder %v4163_v54, %v842_v46  ;;  %v4530_v18 = vsel %vm800_vm1, %v1069_v36, 2147483647 }
 0x173   :  { %6249 = vst [vmem:[#allocation27_spill] sm:$0xff] %v4530_v18  ;;  %v1070_v38 = vsel %vm1006_vm15, %v4422_v0, 8  ;;  %v845_v57 = vpop.xlane.xlu0 %844  ;;  %v4533_v37 = vcvt.s32.f32 %v1288_v25  ;;  %v1303_v49 = vshra.s32 %v4530_v18, 16 }
 0x174   :  { %vm1007_vm2 = vcmp.eq.f32.partialorder %v4176_v1, %v845_v57  ;;  %v4540_v4 = vsel %vm800_vm1, %v1070_v38, 2147483647 }
 0x175   :  { %6250 = vst [vmem:[#allocation28_spill] sm:$0xff] %v4540_v4  ;;  %v1071_v9 = vsel %vm1007_vm2, %v4422_v0, 8  ;;  %v848_v54 = vpop.xlane.xlu1 %847  ;;  %1291 = vmin.xlane.f32.xlu1 %v4533_v37  ;;  %1276 = vmin.xlane.f32.xlu0 %v4535_v30  ;;  %v1318_v36 = vshra.s32 %v4540_v4, 16  ;;  %v4553_v38 = vcvt.s32.f32 %v1303_v49 }
 0x176   :  { %vm1008_vm3 = vcmp.eq.f32.partialorder %v4173_v62, %v848_v54  ;;  %v4548_v41 = vsel %vm800_vm1, %v1071_v9, 2147483647 }
 0x177   :  { %6251 = vst [vmem:[#allocation29_spill] sm:$0xff] %v4548_v41  ;;  %v1072_v46 = vsel %vm1008_vm3, %v4422_v0, 8  ;;  %v851_v1 = vpop.xlane.xlu0 %850  ;;  %v4551_v25 = vcvt.s32.f32 %v1318_v36  ;;  %v1333_v57 = vshra.s32 %v4548_v41, 16 }
 0x178   :  { %vm1009_vm4 = vcmp.eq.f32.partialorder %v4186_v12, %v851_v1  ;;  %v4558_v18 = vsel %vm800_vm1, %v1072_v46, 2147483647 }
 0x179   :  { %6252 = vst [vmem:[#allocation30_spill] sm:$0xff] %v4558_v18  ;;  %v1073_v4 = vsel %vm1009_vm4, %v4422_v0, 8  ;;  %v854_v62 = vpop.xlane.xlu1 %853  ;;  %1321 = vmin.xlane.f32.xlu1 %v4551_v25  ;;  %1306 = vmin.xlane.f32.xlu0 %v4553_v38  ;;  %v1348_v9 = vshra.s32 %v4558_v18, 16  ;;  %v4571_v46 = vcvt.s32.f32 %v1333_v57 }
 0x17a   :  { %vm1010_vm5 = vcmp.eq.f32.partialorder %v4183_v8, %v854_v62  ;;  %v4566_v49 = vsel %vm800_vm1, %v1073_v4, 2147483647 }
 0x17b   :  { %6253 = vst [vmem:[#allocation31_spill] sm:$0xff] %v4566_v49  ;;  %v1074_v54 = vsel %vm1010_vm5, %v4422_v0, 8  ;;  %v857_v12 = vpop.xlane.xlu0 %856  ;;  %v4569_v36 = vcvt.s32.f32 %v1348_v9  ;;  %v1363_v1 = vshra.s32 %v4566_v49, 16 }
 0x17c   :  { %vm1011_vm6 = vcmp.eq.f32.partialorder %v4196_v23, %v857_v12  ;;  %v4576_v41 = vsel %vm800_vm1, %v1074_v54, 2147483647 }
 0x17d   :  { %6254 = vst [vmem:[#allocation32_spill] sm:$0xff] %v4576_v41  ;;  %v1075_v18 = vsel %vm1011_vm6, %v4422_v0, 8  ;;  %v860_v8 = vpop.xlane.xlu1 %859  ;;  %1351 = vmin.xlane.f32.xlu1 %v4569_v36  ;;  %1336 = vmin.xlane.f32.xlu0 %v4571_v46  ;;  %v1378_v4 = vshra.s32 %v4576_v41, 16  ;;  %v4589_v54 = vcvt.s32.f32 %v1363_v1 }
 0x17e   :  { %vm1012_vm7 = vcmp.eq.f32.partialorder %v4193_v19, %v860_v8  ;;  %v4584_v57 = vsel %vm800_vm1, %v1075_v18, 2147483647 }
 0x17f   :  { %6255 = vst [vmem:[#allocation33_spill] sm:$0xff] %v4584_v57  ;;  %v1076_v62 = vsel %vm1012_vm7, %v4422_v0, 8  ;;  %v863_v23 = vpop.xlane.xlu0 %862  ;;  %v4587_v9 = vcvt.s32.f32 %v1378_v4  ;;  %v1393_v12 = vshra.s32 %v4584_v57, 16 }
 0x180   :  { %vm1013_vm8 = vcmp.eq.f32.partialorder %v4206_v34, %v863_v23  ;;  %v4594_v49 = vsel %vm800_vm1, %v1076_v62, 2147483647 }
 0x181   :  { %6256 = vst [vmem:[#allocation34_spill] sm:$0xff] %v4594_v49  ;;  %v1077_v41 = vsel %vm1013_vm8, %v4422_v0, 8  ;;  %v866_v19 = vpop.xlane.xlu1 %865  ;;  %1381 = vmin.xlane.f32.xlu1 %v4587_v9  ;;  %1366 = vmin.xlane.f32.xlu0 %v4589_v54  ;;  %v1408_v18 = vshra.s32 %v4594_v49, 16  ;;  %v4607_v62 = vcvt.s32.f32 %v1393_v12 }
 0x182   :  { %vm1014_vm9 = vcmp.eq.f32.partialorder %v4203_v29, %v866_v19  ;;  %v4602_v1 = vsel %vm800_vm1, %v1077_v41, 2147483647 }
 0x183   :  { %6257 = vst [vmem:[#allocation35_spill] sm:$0xff] %v4602_v1  ;;  %v1078_v8 = vsel %vm1014_vm9, %v4422_v0, 8  ;;  %v869_v34 = vpop.xlane.xlu0 %868  ;;  %v4605_v4 = vcvt.s32.f32 %v1408_v18  ;;  %v1423_v23 = vshra.s32 %v4602_v1, 16 }
 0x184   :  { %vm1015_vm10 = vcmp.eq.f32.partialorder %v4216_v44, %v869_v34  ;;  %v4612_v57 = vsel %vm800_vm1, %v1078_v8, 2147483647 }
 0x185   :  { %6258 = vst [vmem:[#allocation36_spill] sm:$0xff] %v4612_v57  ;;  %v1079_v49 = vsel %vm1015_vm10, %v4422_v0, 8  ;;  %v872_v29 = vpop.xlane.xlu1 %871  ;;  %1411 = vmin.xlane.f32.xlu1 %v4605_v4  ;;  %1396 = vmin.xlane.f32.xlu0 %v4607_v62  ;;  %v1438_v41 = vshra.s32 %v4612_v57, 16  ;;  %v4625_v8 = vcvt.s32.f32 %v1423_v23 }
 0x186   :  { %vm1016_vm11 = vcmp.eq.f32.partialorder %v4213_v40, %v872_v29  ;;  %v4620_v12 = vsel %vm800_vm1, %v1079_v49, 2147483647 }
 0x187   :  { %6259 = vst [vmem:[#allocation37_spill] sm:$0xff] %v4620_v12  ;;  %v1080_v19 = vsel %vm1016_vm11, %v4422_v0, 8  ;;  %v875_v44 = vpop.xlane.xlu0 %874  ;;  %v4623_v18 = vcvt.s32.f32 %v1438_v41  ;;  %v1453_v34 = vshra.s32 %v4620_v12, 16 }
 0x188   :  { %vm1017_vm12 = vcmp.eq.f32.partialorder %v4226_v55, %v875_v44  ;;  %v4630_v1 = vsel %vm800_vm1, %v1080_v19, 2147483647 }
 0x189   :  { %6260 = vst [vmem:[#allocation38_spill] sm:$0xff] %v4630_v1  ;;  %v1081_v57 = vsel %vm1017_vm12, %v4422_v0, 8  ;;  %v878_v40 = vpop.xlane.xlu1 %877  ;;  %1441 = vmin.xlane.f32.xlu1 %v4623_v18  ;;  %1426 = vmin.xlane.f32.xlu0 %v4625_v8  ;;  %v1468_v49 = vshra.s32 %v4630_v1, 16  ;;  %v4643_v19 = vcvt.s32.f32 %v1453_v34 }
 0x18a   :  { %vm1018_vm13 = vcmp.eq.f32.partialorder %v4223_v51, %v878_v40  ;;  %v4638_v23 = vsel %vm800_vm1, %v1081_v57, 2147483647 }
 0x18b   :  { %6261 = vst [vmem:[#allocation39_spill] sm:$0xff] %v4638_v23  ;;  %v1082_v29 = vsel %vm1018_vm13, %v4422_v0, 8  ;;  %v881_v55 = vpop.xlane.xlu0 %880  ;;  %v4641_v41 = vcvt.s32.f32 %v1468_v49  ;;  %v1483_v44 = vshra.s32 %v4638_v23, 16 }
 0x18c   :  { %vm1019_vm14 = vcmp.eq.f32.partialorder %v4236_v3, %v881_v55  ;;  %v4648_v12 = vsel %vm800_vm1, %v1082_v29, 2147483647 }
 0x18d   :  { %6262 = vst [vmem:[#allocation40_spill] sm:$0xff] %v4648_v12  ;;  %v1083_v1 = vsel %vm1019_vm14, %v4422_v0, 8  ;;  %v884_v51 = vpop.xlane.xlu1 %883  ;;  %1471 = vmin.xlane.f32.xlu1 %v4641_v41  ;;  %1456 = vmin.xlane.f32.xlu0 %v4643_v19  ;;  %v1498_v57 = vshra.s32 %v4648_v12, 16  ;;  %v4661_v29 = vcvt.s32.f32 %v1483_v44 }
 0x18e   :  { %vm1020_vm15 = vcmp.eq.f32.partialorder %v4233_v61, %v884_v51  ;;  %v4656_v34 = vsel %vm800_vm1, %v1083_v1, 2147483647 }
 0x18f   :  { %6263 = vst [vmem:[#allocation41_spill] sm:$0xff] %v4656_v34  ;;  %v1084_v40 = vsel %vm1020_vm15, %v4422_v0, 8  ;;  %v887_v3 = vpop.xlane.xlu0 %886  ;;  %v4659_v49 = vcvt.s32.f32 %v1498_v57  ;;  %6265 = vst [vmem:[#allocation43_spill] sm:$0xff] %v4661_v29  ;;  %v1513_v55 = vshra.s32 %v4656_v34, 16 }
 0x190   :  { %vm1021_vm2 = vcmp.eq.f32.partialorder %v4246_v16, %v887_v3  ;;  %v4666_v23 = vsel %vm800_vm1, %v1084_v40, 2147483647 }
 0x191   :  { %6264 = vst [vmem:[#allocation42_spill] sm:$0xff] %v4659_v49  ;;  %6266 = vst [vmem:[#allocation44_spill] sm:$0xff] %v4666_v23  ;;  %v1085_v12 = vsel %vm1021_vm2, %v4422_v0, 8  ;;  %v890_v61 = vpop.xlane.xlu1 %889  ;;  %1501 = vmin.xlane.f32.xlu1 %v4659_v49  ;;  %1486 = vmin.xlane.f32.xlu0 %v4661_v29  ;;  %v1528_v1 = vshra.s32 %v4666_v23, 16  ;;  %v4679_v40 = vcvt.s32.f32 %v1513_v55 }
 0x192   :  { %vm1022_vm3 = vcmp.eq.f32.partialorder %v4243_v11, %v890_v61  ;;  %v4674_v44 = vsel %vm800_vm1, %v1085_v12, 2147483647 }
 0x193   :  { %6267 = vst [vmem:[#allocation45_spill] sm:$0xff] %v4674_v44  ;;  %v1086_v51 = vsel %vm1022_vm3, %v4422_v0, 8  ;;  %v893_v16 = vpop.xlane.xlu0 %892  ;;  %v4677_v57 = vcvt.s32.f32 %v1528_v1  ;;  %6269 = vst [vmem:[#allocation47_spill] sm:$0xff] %v4679_v40  ;;  %v1543_v3 = vshra.s32 %v4674_v44, 16 }
 0x194   :  { %vm1023_vm4 = vcmp.eq.f32.partialorder %v4256_v31, %v893_v16  ;;  %v4684_v34 = vsel %vm800_vm1, %v1086_v51, 2147483647 }
 0x195   :  { %6268 = vst [vmem:[#allocation46_spill] sm:$0xff] %v4677_v57  ;;  %v1087_v23 = vsel %vm1023_vm4, %v4422_v0, 8  ;;  %v896_v11 = vpop.xlane.xlu1 %895  ;;  %1531 = vmin.xlane.f32.xlu1 %v4677_v57  ;;  %1516 = vmin.xlane.f32.xlu0 %v4679_v40  ;;  %v1558_v12 = vshra.s32 %v4684_v34, 16  ;;  %v4697_v51 = vcvt.s32.f32 %v1543_v3 }
 0x196   :  { %vm1024_vm5 = vcmp.eq.f32.partialorder %v4253_v26, %v896_v11  ;;  %v4692_v55 = vsel %vm800_vm1, %v1087_v23, 2147483647 }
 0x197   :  { %6270 = vst [vmem:[#allocation48_spill] sm:$0xff] %v4692_v55  ;;  %v1088_v61 = vsel %vm1024_vm5, %v4422_v0, 8  ;;  %v899_v31 = vpop.xlane.xlu0 %898  ;;  %v4695_v1 = vcvt.s32.f32 %v1558_v12  ;;  %6271 = vst [vmem:[#allocation49_spill] sm:$0xff] %v4697_v51  ;;  %v1573_v16 = vshra.s32 %v4692_v55, 16 }
 0x198   :  { %vm1025_vm6 = vcmp.eq.f32.partialorder %v4266_v45, %v899_v31  ;;  %v4702_v44 = vsel %vm800_vm1, %v1088_v61, 2147483647 }
 0x199   :  { %v1089_v40 = vsel %vm1025_vm6, %v4422_v0, 8  ;;  %v902_v26 = vpop.xlane.xlu1 %901  ;;  %1561 = vmin.xlane.f32.xlu1 %v4695_v1  ;;  %1546 = vmin.xlane.f32.xlu0 %v4697_v51  ;;  %v1588_v23 = vshra.s32 %v4702_v44, 16  ;;  %v4715_v61 = vcvt.s32.f32 %v1573_v16 }
 0x19a   :  { %vm1026_vm7 = vcmp.eq.f32.partialorder %v4263_v39, %v902_v26  ;;  %v4710_v3 = vsel %vm800_vm1, %v1089_v40, 2147483647 }
 0x19b   :  { %6272 = vst [vmem:[#allocation50_spill] sm:$0xff] %v4710_v3  ;;  %v1090_v11 = vsel %vm1026_vm7, %v4422_v0, 8  ;;  %v905_v45 = vpop.xlane.xlu0 %904  ;;  %v4713_v12 = vcvt.s32.f32 %v1588_v23  ;;  %6273 = vst [vmem:[#allocation51_spill] sm:$0xff] %v4715_v61  ;;  %v1603_v31 = vshra.s32 %v4710_v3, 16 }
 0x19c   :  { %vm1027_vm8 = vcmp.eq.f32.partialorder %v4276_v59, %v905_v45  ;;  %v4720_v55 = vsel %vm800_vm1, %v1090_v11, 2147483647 }
 0x19d   :  { %v1091_v51 = vsel %vm1027_vm8, %v4422_v0, 8  ;;  %v908_v39 = vpop.xlane.xlu1 %907  ;;  %1591 = vmin.xlane.f32.xlu1 %v4713_v12  ;;  %1576 = vmin.xlane.f32.xlu0 %v4715_v61  ;;  %v1618_v40 = vshra.s32 %v4720_v55, 16  ;;  %v4733_v11 = vcvt.s32.f32 %v1603_v31 }
 0x19e   :  { %v4727_v26 = vsel %vm800_vm1, %v1091_v51, 2147483647  ;;  %vm1028_vm9 = vcmp.eq.f32.partialorder %v4273_v53, %v908_v39 }
 0x19f   :  { %6274 = vst [vmem:[#allocation52_spill] sm:$0xff] %v4727_v26  ;;  %v1092_v16 = vsel %vm1028_vm9, %v4422_v0, 8  ;;  %v911_v59 = vpop.xlane.xlu0 %910  ;;  %v4731_v23 = vcvt.s32.f32 %v1618_v40  ;;  %6275 = vst [vmem:[#allocation53_spill] sm:$0xff] %v4733_v11  ;;  %v1633_v45 = vshra.s32 %v4727_v26, 16 }
 0x1a0   :  { %v4737_v3 = vsel %vm800_vm1, %v1092_v16, 2147483647  ;;  %vm1029_vm10 = vcmp.eq.f32.partialorder %v4286_v14, %v911_v59 }
 0x1a1   :  { %v1093_v61 = vsel %vm1029_vm10, %v4422_v0, 8  ;;  %v914_v51 = vpop.xlane.xlu1 %913  ;;  %1621 = vmin.xlane.f32.xlu1 %v4731_v23  ;;  %1606 = vmin.xlane.f32.xlu0 %v4733_v11  ;;  %v1648_v53 = vshra.s32 %v4737_v3, 16  ;;  %v4748_v16 = vcvt.s32.f32 %v1633_v45 }
 0x1a2   :  { %vm1030_vm11 = vcmp.eq.f32.partialorder %v4283_v5, %v914_v51  ;;  %v4751_v14 = vsel %vm800_vm1, %v1093_v61, 2147483647 }
 0x1a3   :  { %v1094_v31 = vsel %vm1030_vm11, %v4422_v0, 8  ;;  %v917_v39 = vpop.xlane.xlu0 %916  ;;  %v4746_v40 = vcvt.s32.f32 %v1648_v53  ;;  %6276 = vst [vmem:[#allocation54_spill] sm:$0xff] %v4748_v16  ;;  %6277 = vst [vmem:[#allocation55_spill] sm:$0xff] %v4751_v14  ;;  %v1663_v61 = vshra.s32 %v4751_v14, 16 }
 0x1a4   :  { %v4754_v59 = vsel %vm800_vm1, %v1094_v31, 2147483647  ;;  %vm1031_vm12 = vcmp.eq.f32.partialorder %v4296_v32, %v917_v39 }
 0x1a5   :  { %v920_v26 = vpop.xlane.xlu1 %919  ;;  %1651 = vmin.xlane.f32.xlu1 %v4746_v40  ;;  %1636 = vmin.xlane.f32.xlu0 %v4748_v16  ;;  %v1678_v5 = vshra.s32 %v4754_v59, 16  ;;  %v1095_v11 = vsel %vm1031_vm12, %v4422_v0, 8  ;;  %v4771_v39 = vcvt.s32.f32 %v1663_v61 }
 0x1a6   :  { %vm1032_vm13 = vcmp.eq.f32.partialorder %v4293_v24, %v920_v26  ;;  %v4775_v26 = vsel %vm800_vm1, %v1095_v11, 2147483647 }
 0x1a7   :  { %v1096_v45 = vsel %vm1032_vm13, %v4422_v0, 8  ;;  %v923_v51 = vpop.xlane.xlu0 %922  ;;  %v4762_v53 = vcvt.s32.f32 %v1678_v5  ;;  %6278 = vst [vmem:[#allocation56_spill] sm:$0xff] %v4771_v39  ;;  %6279 = vst [vmem:[#allocation57_spill] sm:$0xff] %v4775_v26  ;;  %v1693_v16 = vshra.s32 %v4775_v26, 16 }
 0x1a8   :  { %v4766_v31 = vsel %vm800_vm1, %v1096_v45, 2147483647  ;;  %vm1033_vm15 = vcmp.eq.f32.partialorder %v4306_v50, %v923_v51 }
 0x1a9   :  { %v926_v57 = vpop.xlane.xlu1 %925  ;;  %1681 = vmin.xlane.f32.xlu1 %v4762_v53  ;;  %v1708_v24 = vshra.s32 %v4766_v31, 16  ;;  %v1097_v61 = vsel %vm1033_vm15, %v4422_v0, 8  ;;  %v4789_v11 = vcvt.s32.f32 %v1693_v16 }
 0x1aa   :  { %vm1034_vm14 = vcmp.eq.f32.partialorder %v4303_v43, %v926_v57  ;;  %v4793_v50 = vsel %vm800_vm1, %v1097_v61, 2147483647 }
 0x1ab   :  { %v929_v32 = vpop.xlane.xlu0 %928  ;;  %v1098_v5 = vsel %vm1034_vm14, %v4422_v0, 8  ;;  %v4780_v45 = vcvt.s32.f32 %v1708_v24  ;;  %6280 = vst [vmem:[#allocation58_spill] sm:$0xff] %v4789_v11  ;;  %6281 = vst [vmem:[#allocation59_spill] sm:$0xff] %v4793_v50  ;;  %v1723_v49 = vshra.s32 %v4793_v50, 16 }
 0x1ac   :  { %v4784_v43 = vsel %vm800_vm1, %v1098_v5, 2147483647  ;;  %vm1035_vm3 = vcmp.eq.f32.partialorder %v4316_v7, %v929_v32 }
 0x1ad   :  { %v932_v14 = vpop.xlane.xlu1 %931  ;;  %1666 = vmin.xlane.f32.xlu1 %v4771_v39  ;;  %v1738_v39 = vshra.s32 %v4784_v43, 16  ;;  %v1099_v16 = vsel %vm1035_vm3, %v4422_v0, 8  ;;  %v4807_v61 = vcvt.s32.f32 %v1723_v49 }
 0x1ae   :  { %vm1036_vm2 = vcmp.eq.f32.partialorder %v4313_v63, %v932_v14  ;;  %v4811_v7 = vsel %vm800_vm1, %v1099_v16, 2147483647 }
 0x1af   :  { %v935_v57 = vpop.xlane.xlu0 %934  ;;  %v1100_v51 = vsel %vm1036_vm2, %v4422_v0, 8  ;;  %v4798_v26 = vcvt.s32.f32 %v1738_v39  ;;  %6283 = vst [vmem:[#allocation61_spill] sm:$0xff] %v4807_v61  ;;  %6284 = vst [vmem:[#allocation62_spill] sm:$0xff] %v4811_v7 }
 0x1b0   :  { %v4802_v63 = vsel %vm800_vm1, %v1100_v51, 2147483647  ;;  %vm1037_vm5 = vcmp.eq.f32.partialorder %v4326_v35, %v935_v57 }
 0x1b1   :  { %v938_v29 = vpop.xlane.xlu1 %937  ;;  %1711 = vmin.xlane.f32.xlu1 %v4780_v45  ;;  %6282 = vst [vmem:[#allocation60_spill] sm:$0xff] %v4798_v26  ;;  %v1101_v49 = vsel %vm1037_vm5, %v4422_v0, 8 }
 0x1b2   :  { %vm1038_vm4 = vcmp.eq.f32.partialorder %v4323_v22, %v938_v29  ;;  %v4829_v35 = vsel %vm800_vm1, %v1101_v49, 2147483647 }
 0x1b3   :  { %v941_v5 = vpop.xlane.xlu0 %940  ;;  %v1102_v39 = vsel %vm1038_vm4, %v4422_v0, 8  ;;  %6287 = vst [vmem:[#allocation65_spill] sm:$0xff] %v4829_v35 }
 0x1b4   :  { %v4820_v22 = vsel %vm800_vm1, %v1102_v39, 2147483647  ;;  %vm1039_vm7 = vcmp.eq.f32.partialorder %v4336_v58, %v941_v5 }
 0x1b5   :  { %v944_v24 = vpop.xlane.xlu1 %943  ;;  %1696 = vmin.xlane.f32.xlu1 %v4789_v11  ;;  %v1768_v11 = vshra.s32 %v4802_v63, 16  ;;  %6285 = vst [vmem:[#allocation63_spill] sm:$0xff] %v4820_v22 }
 0x1b6   :  { %vm1040_vm6 = vcmp.eq.f32.partialorder %v4333_v48, %v944_v24  ;;  %v1103_v24 = vsel %vm1039_vm7, %v4422_v0, 8 }
 0x1b7   :  { %v947_v32 = vpop.xlane.xlu0 %946  ;;  %v4816_v50 = vcvt.s32.f32 %v1768_v11  ;;  %v1104_v11 = vsel %vm1040_vm6, %v4422_v0, 8  ;;  %v4847_v58 = vsel %vm800_vm1, %v1103_v24, 2147483647  ;;  %v6294_v24 = vld [vmem:[#allocation5_spill] sm:$0xff] }
 0x1b8   :  { %v4838_v48 = vsel %vm800_vm1, %v1104_v11, 2147483647  ;;  %6291 = vst [vmem:[#allocation69_spill] sm:$0xff] %v4847_v58  ;;  %vm1041_vm9 = vcmp.eq.f32.partialorder %v4346_v27, %v947_v32 }
 0x1b9   :  { %v950_v14 = vpop.xlane.xlu1 %949  ;;  %1741 = vmin.xlane.f32.xlu1 %v4798_v26  ;;  %v1753_v26 = vshra.s32 %v4811_v7, 16  ;;  %v1783_v7 = vshra.s32 %v4829_v35, 16  ;;  %6289 = vst [vmem:[#allocation67_spill] sm:$0xff] %v4838_v48  ;;  %v1813_v35 = vshra.s32 %v4847_v58, 16  ;;  %v6297_v58 = vld [vmem:[#allocation6_spill] sm:$0xff] }
 0x1ba   :  { %vm1042_vm8 = vcmp.eq.f32.partialorder %v4343_v15, %v950_v14 }
 0x1bb   :  { %v953_v29 = vpop.xlane.xlu0 %952  ;;  %v4825_v16 = vcvt.s32.f32 %v1753_v26  ;;  %v1106_v5 = vsel %vm1042_vm8, %v4422_v0, 8 }
 0x1bc   :  { %v4856_v15 = vsel %vm800_vm1, %v1106_v5, 2147483647  ;;  %vm1043_vm11 = vcmp.eq.f32.partialorder %v6297_v58, %v953_v29 }
 0x1bd   :  { %1726 = vmin.xlane.f32.xlu1 %v4807_v61  ;;  %v956_v51 = vpop.xlane.xlu1 %955  ;;  %6286 = vst [vmem:[#allocation64_spill] sm:$0xff] %v4825_v16  ;;  %v1798_v61 = vshra.s32 %v4820_v22, 16  ;;  %v4843_v22 = vcvt.s32.f32 %v1783_v7  ;;  %6293 = vst [vmem:[#allocation71_spill] sm:$0xff] %v4856_v15  ;;  %v1105_v7 = vsel %vm1041_vm9, %v4422_v0, 8  ;;  %v1858_v27 = vshra.s32 %v4856_v15, 16 }
 0x1be   :  { %vm1044_vm10 = vcmp.eq.f32.partialorder %v6294_v24, %v956_v51  ;;  %v4867_v32 = vsel %vm800_vm1, %v1105_v7, 2147483647  ;;  %v1107_v7 = vsel %vm1043_vm11, %v4422_v0, 8  ;;  %v6300_v24 = vld [vmem:[#allocation7_spill] sm:$0xff] }
 0x1bf   :  { %v4834_v39 = vcvt.s32.f32 %v1798_v61  ;;  %v959_v26 = vpop.xlane.xlu0 %958  ;;  %6290 = vst [vmem:[#allocation68_spill] sm:$0xff] %v4843_v22  ;;  %6296 = vst [vmem:[#allocation72_spill] sm:$0xff] %v4867_v32  ;;  %v1108_v5 = vsel %vm1044_vm10, %v4422_v0, 8  ;;  %v1843_v51 = vshra.s32 %v4867_v32, 16  ;;  %v4891_v58 = vsel %vm800_vm1, %v1107_v7, 2147483647 }
 0x1c0   :  { %6302 = vst [vmem:[#allocation74_spill] sm:$0xff] %v4891_v58  ;;  %v6303_v32 = vld [vmem:[#allocation8_spill] sm:$0xff] }
 0x1c1   :  { %1771 = vmin.xlane.f32.xlu1 %v4816_v50  ;;  %v962_v57 = vpop.xlane.xlu1 %961  ;;  %6288 = vst [vmem:[#allocation66_spill] sm:$0xff] %v4834_v39  ;;  %vm1045_vm13 = vcmp.eq.f32.partialorder %v6303_v32, %v959_v26 }
 0x1c2   :  { %vm1046_vm12 = vcmp.eq.f32.partialorder %v6300_v24, %v962_v57  ;;  %v1873_v57 = vshra.s32 %v4891_v58, 16  ;;  %v1109_v7 = vsel %vm1045_vm13, %v4422_v0, 8  ;;  %v1122_v58 = vand.u32 65535, %v4440_v60 }
 0x1c3   :  { %v965_v61 = vpop.xlane.xlu0 %964 }
 0x1c4   :  { %v4912_v26 = vcvt.s32.f32 %v1873_v57 }
 0x1c5   :  { %1756 = vmin.xlane.f32.xlu1 %v4825_v16  ;;  %v968_v49 = vpop.xlane.xlu1 %967  ;;  %v1828_v16 = vshra.s32 %v4838_v48, 16  ;;  %v4863_v48 = vcvt.s32.f32 %v1813_v35  ;;  %v4880_v35 = vsel %vm800_vm1, %v1108_v5, 2147483647  ;;  %v1110_v5 = vsel %vm1046_vm12, %v4422_v0, 8 }
 0x1c6   :  { %6299 = vst [vmem:[#allocation73_spill] sm:$0xff] %v4880_v35  ;;  %v1888_v29 = vshra.s32 %v4880_v35, 16  ;;  %v1137_v35 = vand.u32 65535, %v4427_v2 }
 0x1c7   :  { %v4852_v11 = vcvt.s32.f32 %v1828_v16  ;;  %6295 = vst [vmem:[#allocation5_spill] sm:$0xff] %v4863_v48  ;;  %v4869_v16 = vpop.xlane.xlu0 %970 }
 0x1c9   :  { %1801 = vmin.xlane.f32.xlu1 %v4834_v39  ;;  %6292 = vst [vmem:[#allocation70_spill] sm:$0xff] %v4852_v11  ;;  %v4858_v14 = vpop.xlane.xlu1 %973  ;;  %v6306_v39 = vld [vmem:[#allocation9_spill] sm:$0xff] }
 0x1ca   :  { %vm1048_vm14 = vcmp.eq.f32.partialorder %v6306_v39, %v968_v49  ;;  %6307 = vst [vmem:[#allocation9_spill] sm:$0xff] %v4912_v26  ;;  %v1139_v49 = vcvt.s32.f32 %v1137_v35 }
 0x1cb   :  { %v4885_v15 = vpop.xlane.xlu0 %976 }
 0x1cd   :  { %1786 = vmin.xlane.f32.xlu1 %v4843_v22  ;;  %v4874_v22 = vpop.xlane.xlu1 %979 }
 0x1cf   :  { %v4904_v24 = vpop.xlane.xlu0 %982 }
 0x1d1   :  { %1831 = vmin.xlane.f32.xlu1 %v4852_v11  ;;  %v4876_v11 = vcvt.s32.f32 %v1858_v27  ;;  %v4893_v27 = vpop.xlane.xlu1 %985 }
 0x1d3   :  { %6298 = vst [vmem:[#allocation6_spill] sm:$0xff] %v4876_v11  ;;  %v4922_v2 = vpop.xlane.xlu0 %988 }
 0x1d5   :  { %1816 = vmin.xlane.f32.xlu1 %v4863_v48  ;;  %v4887_v48 = vcvt.s32.f32 %v1843_v51  ;;  %v4902_v51 = vsel %vm800_vm1, %v1110_v5, 2147483647  ;;  %v1112_v5 = vsel %vm1048_vm14, %v4422_v0, 8 }
 0x1d6   :  { %6305 = vst [vmem:[#allocation75_spill] sm:$0xff] %v4902_v51  ;;  %v1918_v32 = vshra.s32 %v4902_v51, 16  ;;  %v4932_v51 = vsel %vm800_vm1, %v1112_v5, 2147483647 }
 0x1d7   :  { %6301 = vst [vmem:[#allocation7_spill] sm:$0xff] %v4887_v48  ;;  %v1948_v5 = vshra.s32 %v4932_v51, 16 }
 0x1d8   :  { %v4926_v57 = vcvt.s32.f32 %v1918_v32 }
 0x1d9   :  { %1861 = vmin.xlane.f32.xlu1 %v4876_v11  ;;  %v4898_v11 = vcvt.s32.f32 %v1888_v29  ;;  %v4916_v29 = vsel %vm800_vm1, %v1109_v7, 2147483647 }
 0x1da   :  { %6308 = vst [vmem:[#allocation76_spill] sm:$0xff] %v4916_v29  ;;  %v1903_v7 = vshra.s32 %v4916_v29, 16 }
 0x1db   :  { %6304 = vst [vmem:[#allocation8_spill] sm:$0xff] %v4898_v11 }
 0x1dc   :  { %v4943_v29 = vcvt.s32.f32 %v1903_v7 }
 0x1dd   :  { %1846 = vmin.xlane.f32.xlu1 %v4887_v48  ;;  %v4910_v48 = vpop.xlane.xlu1 %991 }
 0x1e1   :  { %1891 = vmin.xlane.f32.xlu1 %v4898_v11  ;;  %v6309_v11 = vld [vmem:[#allocation10_spill] sm:$0xff] }
 0x1e2   :  { %vm1047_vm15 = vcmp.eq.f32.partialorder %v6309_v11, %v965_v61  ;;  %v1167_v61 = vand.u32 65535, %v4437_v6  ;;  %v6310_v11 = vld [vmem:[#allocation11_spill] sm:$0xff]  ;;  %6311 = vst [vmem:[#allocation10_spill] sm:$0xff] %v4943_v29 }
 0x1e3   :  { %v1111_v60 = vsel %vm1047_vm15, %v4422_v0, 8  ;;  %vm1050_vm3 = vcmp.eq.f32.partialorder %v6310_v11, %v4858_v14  ;;  %v1152_v14 = vand.u32 65535, %v4453_v52  ;;  %v4960_v11 = vcvt.s32.f32 %v1948_v5 }
 0x1e4   :  { %v1114_v6 = vsel %vm1050_vm3, %v4422_v0, 8  ;;  %v1169_v7 = vcvt.s32.f32 %v1167_v61 }
 0x1e5   :  { %1876 = vmin.xlane.f32.xlu1 %v4912_v26  ;;  %v1154_v5 = vcvt.s32.f32 %v1152_v14  ;;  %v6319_v14 = vld [vmem:[#allocation14_spill] sm:$0xff] }
 0x1e6   :  { %v4924_v39 = vpop.xlane.xlu1 %1141  ;;  %vm1051_vm10 = vcmp.eq.f32.partialorder %v6319_v14, %v4885_v15  ;;  %v6321_v15 = vld [vmem:[#allocation22_spill] sm:$0xff] }
 0x1e7   :  { %vm1143_vm2 = vcmp.eq.f32.partialorder %v4434_v42, %v4924_v39  ;;  %v1124_v42 = vcvt.s32.f32 %v1122_v58  ;;  %v6313_v58 = vld [vmem:[#allocation12_spill] sm:$0xff] }
 0x1e8   :  { %v1144_v26 = vsel %vm1143_vm2, %v1139_v49, inf  ;;  %v4949_v49 = vsel %vm800_vm1, %v1111_v60, 2147483647  ;;  %vm1049_vm6 = vcmp.eq.f32.partialorder %v6313_v58, %v4869_v16  ;;  %v6315_v16 = vld [vmem:[#allocation13_spill] sm:$0xff] }
 0x1e9   :  { %1921 = vmin.xlane.f32.xlu1 %v4926_v57  ;;  %1145 = vmin.xlane.f32.xlu0 %v1144_v26  ;;  %6312 = vst [vmem:[#allocation11_spill] sm:$0xff] %v4949_v49  ;;  %v1933_v60 = vshra.s32 %v4949_v49, 16  ;;  %vm1052_vm8 = vcmp.eq.f32.partialorder %v6315_v16, %v4874_v22 }
 0x1ea   :  { %v4939_v35 = vpop.xlane.xlu1 %1171  ;;  %v4941_v32 = vpop.xlane.xlu0 %1126 }
 0x1eb   :  { %vm1128_vm4 = vcmp.eq.f32.partialorder %v4449_v17, %v4941_v32  ;;  %vm1173_vm5 = vcmp.eq.f32.partialorder %v4447_v20, %v4939_v35  ;;  %v6314_v20 = vld [vmem:[#allocation20_spill] sm:$0xff]  ;;  %v4975_v58 = vcvt.s32.f32 %v1933_v60 }
 0x1ec   :  { %v1129_v26 = vsel %vm1128_vm4, %v1124_v42, inf  ;;  %v4964_v42 = vsel %vm800_vm1, %v1114_v6, 2147483647  ;;  %v1197_v52 = vand.u32 65535, %v6314_v20 }
 0x1ed   :  { %1906 = vmin.xlane.f32.xlu1 %v4943_v29  ;;  %1130 = vmin.xlane.f32.xlu0 %v1129_v26  ;;  %v1174_v29 = vsel %vm1173_vm5, %v1169_v7, inf  ;;  %v1113_v26 = vsel %vm1049_vm6, %v4422_v0, 8  ;;  %6316 = vst [vmem:[#allocation12_spill] sm:$0xff] %v4975_v58  ;;  %v1978_v6 = vshra.s32 %v4964_v42, 16 }
 0x1ee   :  { %v4958_v17 = vpop.xlane.xlu0 %1156  ;;  %v4979_v7 = vsel %vm800_vm1, %v1113_v26, 2147483647  ;;  %v1199_v26 = vcvt.s32.f32 %v1197_v52  ;;  %v6322_v52 = vld [vmem:[#allocation15_spill] sm:$0xff] }
 0x1ef   :  { %vm1158_vm7 = vcmp.eq.f32.partialorder %v4464_v10, %v4958_v17  ;;  %6317 = vst [vmem:[#allocation20_spill] sm:$0xff] %v4979_v7  ;;  %v6318_v10 = vld [vmem:[#allocation19_spill] sm:$0xff]  ;;  %v4992_v16 = vcvt.s32.f32 %v1978_v6  ;;  %vm1054_vm12 = vcmp.eq.f32.partialorder %v6322_v52, %v4893_v27 }
 0x1f0   :  { %v1159_v49 = vsel %vm1158_vm7, %v1154_v5, inf  ;;  %v1182_v22 = vand.u32 65535, %v6318_v10  ;;  %v1963_v5 = vshra.s32 %v4979_v7, 16  ;;  %v1227_v10 = vand.u32 65535, %v6321_v15 }
 0x1f1   :  { %1951 = vmin.xlane.f32.xlu1 %v4960_v11  ;;  %1175 = vmin.xlane.f32.xlu0 %v1174_v29  ;;  %v1116_v29 = vsel %vm1052_vm8, %v4422_v0, 8  ;;  %6320 = vst [vmem:[#allocation13_spill] sm:$0xff] %v4992_v16 }
 0x1f2   :  { %v4973_v61 = vpop.xlane.xlu1 %1201  ;;  %v4988_v60 = vpop.xlane.xlu0 %1186  ;;  %v1184_v14 = vcvt.s32.f32 %v1182_v22  ;;  %v5007_v7 = vcvt.s32.f32 %v1963_v5  ;;  %v6326_v22 = vld [vmem:[#allocation16_spill] sm:$0xff] }
 0x1f3   :  { %vm1203_vm9 = vcmp.eq.f32.partialorder %v4479_v47, %v4973_v61  ;;  %v1115_v47 = vsel %vm1051_vm10, %v4422_v0, 8  ;;  %vm1188_vm11 = vcmp.eq.f32.partialorder %v4481_v33, %v4988_v60  ;;  %v6325_v33 = vld [vmem:[#allocation21_spill] sm:$0xff]  ;;  %vm1053_vm14 = vcmp.eq.f32.partialorder %v6326_v22, %v4904_v24  ;;  %v6329_v24 = vld [vmem:[#allocation24_spill] sm:$0xff] }
 0x1f4   :  { %6323 = vst [vmem:[#allocation19_spill] sm:$0xff] %v5007_v7  ;;  %v1212_v27 = vand.u32 65535, %v6325_v33  ;;  %v1257_v33 = vand.u32 65535, %v6329_v24 }
 0x1f5   :  { %1936 = vmin.xlane.f32.xlu1 %v4975_v58  ;;  %1160 = vmin.xlane.f32.xlu0 %v1159_v49  ;;  %v4996_v58 = vsel %vm800_vm1, %v1116_v29, 2147483647  ;;  %v1204_v49 = vsel %vm1203_vm9, %v1199_v26, inf  ;;  %v5011_v26 = vsel %vm800_vm1, %v1115_v47, 2147483647  ;;  %v1229_v47 = vcvt.s32.f32 %v1227_v10  ;;  %v6330_v10 = vld [vmem:[#allocation18_spill] sm:$0xff] }
 0x1f6   :  { %v4990_v20 = vpop.xlane.xlu1 %1231  ;;  %v2008_v29 = vshra.s32 %v4996_v58, 16  ;;  %6324 = vst [vmem:[#allocation14_spill] sm:$0xff] %v5011_v26  ;;  %v5020_v5 = vpop.xlane.xlu0 %1216  ;;  %vm1055_vm2 = vcmp.eq.f32.partialorder %v6330_v10, %v4922_v2  ;;  %v1214_v22 = vcvt.s32.f32 %v1212_v27  ;;  %v6335_v27 = vld [vmem:[#allocation17_spill] sm:$0xff] }
 0x1f7   :  { %vm1233_vm13 = vcmp.eq.f32.partialorder %v4497_v21, %v4990_v20  ;;  %v1117_v21 = vsel %vm1053_vm14, %v4422_v0, 8  ;;  %vm1218_vm15 = vcmp.eq.f32.partialorder %v4499_v56, %v5020_v5  ;;  %v6334_v56 = vld [vmem:[#allocation23_spill] sm:$0xff]  ;;  %vm1056_vm4 = vcmp.eq.f32.partialorder %v6335_v27, %v4910_v48  ;;  %v6339_v48 = vld [vmem:[#allocation26_spill] sm:$0xff] }
 0x1f8   :  { %v5024_v52 = vcvt.s32.f32 %v2008_v29  ;;  %v1242_v2 = vand.u32 65535, %v6334_v56  ;;  %v1287_v56 = vand.u32 65535, %v6339_v48 }
 0x1f9   :  { %1981 = vmin.xlane.f32.xlu1 %v4992_v16  ;;  %1205 = vmin.xlane.f32.xlu0 %v1204_v49  ;;  %v1189_v16 = vsel %vm1188_vm11, %v1184_v14, inf  ;;  %v1118_v49 = vsel %vm1054_vm12, %v4422_v0, 8  ;;  %v1993_v14 = vshra.s32 %v5011_v26, 16 }
 0x1fa   :  { %v5005_v6 = vpop.xlane.xlu1 %1261  ;;  %6328 = vst [vmem:[#allocation15_spill] sm:$0xff] %v5024_v52 }
 0x1fb   :  { %v5039_v26 = vcvt.s32.f32 %v1993_v14  ;;  %vm1263_vm3 = vcmp.eq.f32.partialorder %v4515_v28, %v5005_v6  ;;  %v5052_v14 = vpop.xlane.xlu0 %1246  ;;  %v1120_v28 = vsel %vm1056_vm4, %v4422_v0, 8 }
 0x1fc   :  { %vm1248_vm5 = vcmp.eq.f32.partialorder %v4517_v13, %v5052_v14  ;;  %v6341_v13 = vld [vmem:[#allocation25_spill] sm:$0xff] }
 0x1fd   :  { %1966 = vmin.xlane.f32.xlu1 %v5007_v7  ;;  %1190 = vmin.xlane.f32.xlu0 %v1189_v16  ;;  %v5028_v7 = vsel %vm800_vm1, %v1118_v49, 2147483647  ;;  %v1234_v16 = vsel %vm1233_vm13, %v1229_v47, inf  ;;  %6332 = vst [vmem:[#allocation16_spill] sm:$0xff] %v5039_v26  ;;  %v5043_v47 = vsel %vm800_vm1, %v1117_v21, 2147483647  ;;  %v1259_v21 = vcvt.s32.f32 %v1257_v33 }
 0x1fe   :  { %v5022_v15 = vpop.xlane.xlu1 %1291  ;;  %v2038_v49 = vshra.s32 %v5028_v7, 16  ;;  %6333 = vst [vmem:[#allocation24_spill] sm:$0xff] %v5043_v47  ;;  %v1244_v33 = vcvt.s32.f32 %v1242_v2  ;;  %v1289_v2 = vcvt.s32.f32 %v1287_v56 }
 0x1ff   :  { %6327 = vst [vmem:[#allocation22_spill] sm:$0xff] %v5022_v15  ;;  %vm1293_vm6 = vcmp.eq.f32.partialorder %v4533_v37, %v5022_v15  ;;  %v5079_v48 = vpop.xlane.xlu0 %1276 }
 0x200   :  { %v5056_v10 = vcvt.s32.f32 %v2038_v49  ;;  %vm1278_vm7 = vcmp.eq.f32.partialorder %v4535_v30, %v5079_v48 }
 0x201   :  { %2011 = vmin.xlane.f32.xlu1 %v5024_v52  ;;  %1235 = vmin.xlane.f32.xlu0 %v1234_v16  ;;  %v1219_v52 = vsel %vm1218_vm15, %v1214_v22, inf  ;;  %v1119_v16 = vsel %vm1055_vm2, %v4422_v0, 8  ;;  %v2023_v22 = vshra.s32 %v5043_v47, 16 }
 0x202   :  { %v5037_v29 = vpop.xlane.xlu1 %1321  ;;  %6337 = vst [vmem:[#allocation23_spill] sm:$0xff] %v5056_v10 }
 0x203   :  { %6331 = vst [vmem:[#allocation21_spill] sm:$0xff] %v5037_v29  ;;  %v5069_v49 = vcvt.s32.f32 %v2023_v22  ;;  %vm1323_vm8 = vcmp.eq.f32.partialorder %v4551_v25, %v5037_v29  ;;  %v6346_v25 = vld [vmem:[#allocation29_spill] sm:$0xff]  ;;  %v1557_v29 = vand.u32 65535, %v4684_v34 }
 0x205   :  { %1996 = vmin.xlane.f32.xlu1 %v5039_v26  ;;  %1220 = vmin.xlane.f32.xlu0 %v1219_v52  ;;  %v5060_v26 = vsel %vm800_vm1, %v1119_v16, 2147483647  ;;  %v1264_v52 = vsel %vm1263_vm3, %v1259_v21, inf  ;;  %6340 = vst [vmem:[#allocation26_spill] sm:$0xff] %v5069_v49  ;;  %v5073_v16 = vsel %vm800_vm1, %v1120_v28, 2147483647 }
 0x206   :  { %v5054_v24 = vpop.xlane.xlu1 %1351  ;;  %6338 = vst [vmem:[#allocation17_spill] sm:$0xff] %v5060_v26  ;;  %v2053_v47 = vshra.s32 %v5060_v26, 16  ;;  %v1249_v21 = vsel %vm1248_vm5, %v1244_v33, inf  ;;  %v2068_v26 = vshra.s32 %v5073_v16, 16  ;;  %v1294_v28 = vsel %vm1293_vm6, %v1289_v2, inf  ;;  %v6342_v33 = vld [vmem:[#allocation28_spill] sm:$0xff]  ;;  %v5098_v2 = vpop.xlane.xlu0 %1306 }
 0x207   :  { %6336 = vst [vmem:[#allocation18_spill] sm:$0xff] %v5054_v24  ;;  %v1317_v37 = vand.u32 65535, %v6342_v33  ;;  %vm1308_vm9 = vcmp.eq.f32.partialorder %v4553_v38, %v5098_v2  ;;  %vm1353_vm10 = vcmp.eq.f32.partialorder %v4569_v36, %v5054_v24  ;;  %v1559_v36 = vcvt.s32.f32 %v1557_v29 }
 0x208   :  { %v5083_v22 = vcvt.s32.f32 %v2053_v47  ;;  %v5092_v15 = vcvt.s32.f32 %v2068_v26  ;;  %v6344_v47 = vld [vmem:[#allocation27_spill] sm:$0xff]  ;;  %v6345_v26 = vld [vmem:[#allocation30_spill] sm:$0xff] }
 0x209   :  { %2041 = vmin.xlane.f32.xlu1 %v5056_v10  ;;  %1265 = vmin.xlane.f32.xlu0 %v1264_v52  ;;  %v1272_v52 = vand.u32 65535, %v6341_v13  ;;  %v1302_v56 = vand.u32 65535, %v6344_v47  ;;  %v1319_v30 = vcvt.s32.f32 %v1317_v37  ;;  %v1332_v47 = vand.u32 65535, %v6346_v25 }
 0x20a   :  { %v5067_v27 = vpop.xlane.xlu1 %1381  ;;  %6343 = vst [vmem:[#allocation25_spill] sm:$0xff] %v5092_v15  ;;  %v5111_v37 = vpop.xlane.xlu0 %1336 }
 0x20b   :  { %v1274_v13 = vcvt.s32.f32 %v1272_v52  ;;  %v1324_v33 = vsel %vm1323_vm8, %v1319_v30, inf  ;;  %v1347_v52 = vand.u32 65535, %v6345_v26  ;;  %vm1338_vm11 = vcmp.eq.f32.partialorder %v4571_v46, %v5111_v37 }
 0x20c   :  { %v1334_v25 = vcvt.s32.f32 %v1332_v47  ;;  %vm1383_vm13 = vcmp.eq.f32.partialorder %v4587_v9, %v5067_v27  ;;  %v6349_v9 = vld [vmem:[#allocation34_spill] sm:$0xff] }
 0x20d   :  { %2026 = vmin.xlane.f32.xlu1 %v5069_v49  ;;  %1250 = vmin.xlane.f32.xlu0 %v1249_v21  ;;  %v1279_v49 = vsel %vm1278_vm7, %v1274_v13, inf }
 0x20e   :  { %v5081_v10 = vpop.xlane.xlu1 %1411  ;;  %v1339_v24 = vsel %vm1338_vm11, %v1334_v25, inf }
 0x20f   :  { %vm1413_vm3 = vcmp.eq.f32.partialorder %v4605_v4, %v5081_v10  ;;  %v6351_v4 = vld [vmem:[#allocation36_spill] sm:$0xff] }
 0x211   :  { %2056 = vmin.xlane.f32.xlu1 %v5083_v22  ;;  %1295 = vmin.xlane.f32.xlu0 %v1294_v28 }
 0x212   :  { %v5090_v21 = vpop.xlane.xlu1 %1441 }
 0x213   :  { %vm1443_vm7 = vcmp.eq.f32.partialorder %v4623_v18, %v5090_v21 }
 0x215   :  { %2071 = vmin.xlane.f32.xlu1 %v5092_v15  ;;  %1280 = vmin.xlane.f32.xlu0 %v1279_v49  ;;  %v1304_v49 = vcvt.s32.f32 %v1302_v56  ;;  %v6347_v56 = vld [vmem:[#allocation32_spill] sm:$0xff] }
 0x216   :  { %v5100_v28 = vpop.xlane.xlu1 %1471  ;;  %v1377_v26 = vand.u32 65535, %v6347_v56 }
 0x217   :  { %v1309_v15 = vsel %vm1308_vm9, %v1304_v49, inf }
 0x218   :  { %v1379_v47 = vcvt.s32.f32 %v1377_v26 }
 0x219   :  { %1325 = vmin.xlane.f32.xlu0 %v1324_v33  ;;  %v1349_v33 = vcvt.s32.f32 %v1347_v52  ;;  %v6348_v52 = vld [vmem:[#allocation31_spill] sm:$0xff] }
 0x21a   :  { %v5105_v13 = vpop.xlane.xlu1 %1501  ;;  %v1362_v46 = vand.u32 65535, %v6348_v52  ;;  %v1384_v56 = vsel %vm1383_vm13, %v1379_v47, inf }
 0x21b   :  { %v1354_v38 = vsel %vm1353_vm10, %v1349_v33, inf  ;;  %v1617_v33 = vand.u32 65535, %v4720_v55  ;;  %vm1473_vm10 = vcmp.eq.f32.partialorder %v4641_v41, %v5100_v28 }
 0x21c   :  { %v1364_v25 = vcvt.s32.f32 %v1362_v46 }
 0x21d   :  { %1310 = vmin.xlane.f32.xlu0 %v1309_v15  ;;  %v1587_v15 = vand.u32 65535, %v4702_v44  ;;  %v1619_v55 = vcvt.s32.f32 %v1617_v33 }
 0x21e   :  { %v5113_v30 = vpop.xlane.xlu1 %1531 }
 0x21f   :  { %v1589_v29 = vcvt.s32.f32 %v1587_v15  ;;  %v6350_v15 = vld [vmem:[#allocation33_spill] sm:$0xff] }
 0x221   :  { %1355 = vmin.xlane.f32.xlu0 %v1354_v38  ;;  %v5127_v38 = vpop.xlane.xlu0 %1366 }
 0x222   :  { %v5119_v49 = vpop.xlane.xlu1 %1561  ;;  %vm1368_vm15 = vcmp.eq.f32.partialorder %v4589_v54, %v5127_v38  ;;  %v1392_v54 = vand.u32 65535, %v6350_v15 }
 0x223   :  { %vm1563_vm12 = vcmp.eq.f32.partialorder %v4695_v1, %v5119_v49 }
 0x224   :  { %v1564_v34 = vsel %vm1563_vm12, %v1559_v36, inf }
 0x225   :  { %1565 = vmin.xlane.f32.xlu1 %v1564_v34  ;;  %1340 = vmin.xlane.f32.xlu0 %v1339_v24  ;;  %v1407_v24 = vand.u32 65535, %v6349_v9  ;;  %v1647_v34 = vand.u32 65535, %v4737_v3  ;;  %v5144_v52 = vpop.xlane.xlu0 %1396  ;;  %v1677_v3 = vand.u32 65535, %v4754_v59 }
 0x226   :  { %v5129_v44 = vpop.xlane.xlu1 %1591  ;;  %vm1398_vm5 = vcmp.eq.f32.partialorder %v4607_v62, %v5144_v52 }
 0x227   :  { %vm1593_vm14 = vcmp.eq.f32.partialorder %v4713_v12, %v5129_v44  ;;  %v1369_v12 = vsel %vm1368_vm15, %v1364_v25, inf  ;;  %v1649_v33 = vcvt.s32.f32 %v1647_v34  ;;  %v1409_v46 = vcvt.s32.f32 %v1407_v24  ;;  %v6353_v25 = vld [vmem:[#allocation35_spill] sm:$0xff] }
 0x228   :  { %v1594_v1 = vsel %vm1593_vm14, %v1589_v29, inf  ;;  %v1679_v9 = vcvt.s32.f32 %v1677_v3  ;;  %v1422_v62 = vand.u32 65535, %v6353_v25 }
 0x229   :  { %1595 = vmin.xlane.f32.xlu1 %v1594_v1  ;;  %1385 = vmin.xlane.f32.xlu0 %v1384_v56  ;;  %v1414_v47 = vsel %vm1413_vm3, %v1409_v46, inf  ;;  %v1437_v1 = vand.u32 65535, %v6351_v4  ;;  %v5158_v59 = vpop.xlane.xlu0 %1426 }
 0x22a   :  { %v5136_v36 = vpop.xlane.xlu1 %1621  ;;  %vm1428_vm8 = vcmp.eq.f32.partialorder %v4625_v8, %v5158_v59  ;;  %v1424_v18 = vcvt.s32.f32 %v1422_v62 }
 0x22b   :  { %vm1623_vm2 = vcmp.eq.f32.partialorder %v4731_v23, %v5136_v36 }
 0x22c   :  { %v1624_v26 = vsel %vm1623_vm2, %v1619_v55, inf  ;;  %v1394_v55 = vcvt.s32.f32 %v1392_v54 }
 0x22d   :  { %1625 = vmin.xlane.f32.xlu1 %v1624_v26  ;;  %1370 = vmin.xlane.f32.xlu0 %v1369_v12  ;;  %v1439_v26 = vcvt.s32.f32 %v1437_v1  ;;  %v1707_v12 = vand.u32 65535, %v4766_v31  ;;  %v6357_v31 = vld [vmem:[#allocation37_spill] sm:$0xff] }
 0x22e   :  { %v5146_v29 = vpop.xlane.xlu1 %1651  ;;  %v1452_v8 = vand.u32 65535, %v6357_v31  ;;  %v6365_v31 = vld [vmem:[#allocation43_spill] sm:$0xff] }
 0x22f   :  { %vm1653_vm4 = vcmp.eq.f32.partialorder %v4746_v40, %v5146_v29  ;;  %v1399_v40 = vsel %vm1398_vm5, %v1394_v55, inf  ;;  %v1444_v15 = vsel %vm1443_vm7, %v1439_v26, inf  ;;  %v1709_v3 = vcvt.s32.f32 %v1707_v12  ;;  %v6361_v26 = vld [vmem:[#allocation60_spill] sm:$0xff] }
 0x230   :  { %v1654_v23 = vsel %vm1653_vm4, %v1649_v33, inf  ;;  %v5169_v33 = vpop.xlane.xlu0 %1456  ;;  %v1454_v41 = vcvt.s32.f32 %v1452_v8  ;;  %v6366_v8 = vld [vmem:[#allocation44_spill] sm:$0xff] }
 0x231   :  { %1655 = vmin.xlane.f32.xlu1 %v1654_v23  ;;  %1415 = vmin.xlane.f32.xlu0 %v1414_v47  ;;  %v1429_v47 = vsel %vm1428_vm8, %v1424_v18, inf  ;;  %vm1458_vm11 = vcmp.eq.f32.partialorder %v4643_v19, %v5169_v33 }
 0x232   :  { %v5154_v56 = vpop.xlane.xlu1 %1681 }
 0x233   :  { %6352 = vst [vmem:[#allocation28_spill] sm:$0xff] %v5154_v56  ;;  %vm1683_vm6 = vcmp.eq.f32.partialorder %v4762_v53, %v5154_v56  ;;  %v6355_v53 = vld [vmem:[#allocation38_spill] sm:$0xff]  ;;  %v6392_v56 = vld [vmem:[#allocation57_spill] sm:$0xff] }
 0x234   :  { %v1684_v24 = vsel %vm1683_vm6, %v1679_v9, inf  ;;  %v1467_v54 = vand.u32 65535, %v6355_v53  ;;  %v1737_v9 = vand.u32 65535, %v4784_v43  ;;  %v5181_v55 = vpop.xlane.xlu0 %1486  ;;  %v6362_v43 = vld [vmem:[#allocation42_spill] sm:$0xff]  ;;  %v6363_v53 = vld [vmem:[#allocation39_spill] sm:$0xff] }
 0x235   :  { %1685 = vmin.xlane.f32.xlu1 %v1684_v24  ;;  %1400 = vmin.xlane.f32.xlu0 %v1399_v40  ;;  %vm1503_vm13 = vcmp.eq.f32.partialorder %v6362_v43, %v5105_v13  ;;  %vm1488_vm14 = vcmp.eq.f32.partialorder %v6365_v31, %v5181_v55 }
 0x236   :  { %v5163_v34 = vpop.xlane.xlu1 %1666  ;;  %v1469_v1 = vcvt.s32.f32 %v1467_v54  ;;  %v1739_v62 = vcvt.s32.f32 %v1737_v9  ;;  %v1482_v54 = vand.u32 65535, %v6363_v53  ;;  %v6371_v53 = vld [vmem:[#allocation63_spill] sm:$0xff] }
 0x237   :  { %6354 = vst [vmem:[#allocation27_spill] sm:$0xff] %v5163_v34 }
 0x238   :  { %v1474_v24 = vsel %vm1473_vm10, %v1469_v1, inf  ;;  %v1527_v1 = vand.u32 65535, %v6366_v8 }
 0x239   :  { %1445 = vmin.xlane.f32.xlu0 %v1444_v15  ;;  %v1459_v15 = vsel %vm1458_vm11, %v1454_v41, inf }
 0x23a   :  { %v5171_v46 = vpop.xlane.xlu1 %1711  ;;  %v1529_v43 = vcvt.s32.f32 %v1527_v1 }
 0x23b   :  { %6356 = vst [vmem:[#allocation30_spill] sm:$0xff] %v5171_v46  ;;  %vm1713_vm9 = vcmp.eq.f32.partialorder %v4780_v45, %v5171_v46  ;;  %v6359_v45 = vld [vmem:[#allocation40_spill] sm:$0xff]  ;;  %v6386_v46 = vld [vmem:[#allocation54_spill] sm:$0xff] }
 0x23c   :  { %v1714_v23 = vsel %vm1713_vm9, %v1709_v3, inf  ;;  %v1497_v40 = vand.u32 65535, %v6359_v45  ;;  %v5193_v3 = vpop.xlane.xlu0 %1516  ;;  %v1484_v45 = vcvt.s32.f32 %v1482_v54 }
 0x23d   :  { %1715 = vmin.xlane.f32.xlu1 %v1714_v23  ;;  %1430 = vmin.xlane.f32.xlu0 %v1429_v47  ;;  %v1767_v23 = vand.u32 65535, %v4802_v63  ;;  %v6368_v63 = vld [vmem:[#allocation46_spill] sm:$0xff] }
 0x23e   :  { %v5178_v4 = vpop.xlane.xlu1 %1696  ;;  %v1499_v18 = vcvt.s32.f32 %v1497_v40  ;;  %v1489_v40 = vsel %vm1488_vm14, %v1484_v45, inf  ;;  %vm1533_vm2 = vcmp.eq.f32.partialorder %v6368_v63, %v5113_v30  ;;  %v6376_v63 = vld [vmem:[#allocation49_spill] sm:$0xff] }
 0x23f   :  { %6358 = vst [vmem:[#allocation29_spill] sm:$0xff] %v5178_v4  ;;  %v1534_v54 = vsel %vm1533_vm2, %v1529_v43, inf }
 0x240   :  { %v1504_v47 = vsel %vm1503_vm13, %v1499_v18, inf  ;;  %v1797_v18 = vand.u32 65535, %v6371_v53 }
 0x241   :  { %1475 = vmin.xlane.f32.xlu0 %v1474_v24  ;;  %v1769_v24 = vcvt.s32.f32 %v1767_v23  ;;  %v6373_v23 = vld [vmem:[#allocation45_spill] sm:$0xff] }
 0x242   :  { %v5186_v25 = vpop.xlane.xlu1 %1741 }
 0x243   :  { %6360 = vst [vmem:[#allocation32_spill] sm:$0xff] %v5186_v25  ;;  %vm1743_vm12 = vcmp.eq.f32.partialorder %v6361_v26, %v5186_v25  ;;  %v6369_v26 = vld [vmem:[#allocation41_spill] sm:$0xff]  ;;  %v6385_v25 = vld [vmem:[#allocation52_spill] sm:$0xff] }
 0x244   :  { %v1744_v12 = vsel %vm1743_vm12, %v1739_v62, inf  ;;  %v5205_v62 = vpop.xlane.xlu0 %1546 }
 0x245   :  { %1745 = vmin.xlane.f32.xlu1 %v1744_v12  ;;  %1460 = vmin.xlane.f32.xlu0 %v1459_v15  ;;  %v1512_v12 = vand.u32 65535, %v6369_v26  ;;  %vm1548_vm5 = vcmp.eq.f32.partialorder %v6376_v63, %v5205_v62  ;;  %v6377_v26 = vld [vmem:[#allocation48_spill] sm:$0xff]  ;;  %v6382_v63 = vld [vmem:[#allocation70_spill] sm:$0xff] }
 0x246   :  { %v5195_v19 = vpop.xlane.xlu1 %1726  ;;  %v1572_v43 = vand.u32 65535, %v6377_v26 }
 0x247   :  { %6364 = vst [vmem:[#allocation31_spill] sm:$0xff] %v5195_v19  ;;  %v1514_v45 = vcvt.s32.f32 %v1512_v12 }
 0x248   :  { %v5216_v31 = vpop.xlane.xlu0 %1576 }
 0x249   :  { %1505 = vmin.xlane.f32.xlu0 %v1504_v47  ;;  %v1542_v47 = vand.u32 65535, %v6373_v23 }
 0x24a   :  { %v5201_v9 = vpop.xlane.xlu1 %1771 }
 0x24b   :  { %6367 = vst [vmem:[#allocation34_spill] sm:$0xff] %v5201_v9  ;;  %vm1773_vm15 = vcmp.eq.f32.partialorder %v4816_v50, %v5201_v9  ;;  %v6372_v50 = vld [vmem:[#allocation47_spill] sm:$0xff] }
 0x24c   :  { %v1774_v41 = vsel %vm1773_vm15, %v1769_v24, inf  ;;  %vm1518_vm3 = vcmp.eq.f32.partialorder %v6372_v50, %v5193_v3  ;;  %v1799_v24 = vcvt.s32.f32 %v1797_v18  ;;  %v6378_v50 = vld [vmem:[#allocation67_spill] sm:$0xff]  ;;  %v5228_v9 = vpop.xlane.xlu0 %1606 }
 0x24d   :  { %1775 = vmin.xlane.f32.xlu1 %v1774_v41  ;;  %1490 = vmin.xlane.f32.xlu0 %v1489_v40  ;;  %v6375_v41 = vld [vmem:[#allocation66_spill] sm:$0xff]  ;;  %v1519_v1 = vsel %vm1518_vm3, %v1514_v45, inf  ;;  %v1827_v23 = vand.u32 65535, %v6378_v50  ;;  %v6379_v18 = vld [vmem:[#allocation51_spill] sm:$0xff]  ;;  %v6383_v50 = vld [vmem:[#allocation53_spill] sm:$0xff] }
 0x24e   :  { %v5210_v15 = vpop.xlane.xlu1 %1756  ;;  %vm1578_vm6 = vcmp.eq.f32.partialorder %v6379_v18, %v5216_v31  ;;  %vm1608_vm8 = vcmp.eq.f32.partialorder %v6383_v50, %v5228_v9  ;;  %v6389_v50 = vld [vmem:[#allocation6_spill] sm:$0xff] }
 0x24f   :  { %6370 = vst [vmem:[#allocation33_spill] sm:$0xff] %v5210_v15 }
 0x251   :  { %1535 = vmin.xlane.f32.xlu0 %v1534_v54  ;;  %v1544_v54 = vcvt.s32.f32 %v1542_v47 }
 0x252   :  { %v5218_v8 = vpop.xlane.xlu1 %1801 }
 0x253   :  { %6374 = vst [vmem:[#allocation36_spill] sm:$0xff] %v5218_v8  ;;  %vm1803_vm4 = vcmp.eq.f32.partialorder %v6375_v41, %v5218_v8  ;;  %v1549_v12 = vsel %vm1548_vm5, %v1544_v54, inf  ;;  %v5239_v54 = vpop.xlane.xlu0 %1636 }
 0x254   :  { %v1804_v40 = vsel %vm1803_vm4, %v1799_v24, inf  ;;  %v6380_v24 = vld [vmem:[#allocation50_spill] sm:$0xff]  ;;  %vm1638_vm9 = vcmp.eq.f32.partialorder %v6386_v46, %v5239_v54 }
 0x255   :  { %1805 = vmin.xlane.f32.xlu1 %v1804_v40  ;;  %1520 = vmin.xlane.f32.xlu0 %v1519_v1  ;;  %v1602_v45 = vand.u32 65535, %v6380_v24  ;;  %v1829_v40 = vcvt.s32.f32 %v1827_v23  ;;  %v1574_v1 = vcvt.s32.f32 %v1572_v43  ;;  %v6384_v24 = vld [vmem:[#allocation71_spill] sm:$0xff]  ;;  %v1632_v23 = vand.u32 65535, %v6385_v25 }
 0x256   :  { %v5225_v53 = vpop.xlane.xlu1 %1786  ;;  %v1857_v8 = vand.u32 65535, %v6384_v24  ;;  %v6390_v24 = vld [vmem:[#allocation56_spill] sm:$0xff] }
 0x257   :  { %v1579_v47 = vsel %vm1578_vm6, %v1574_v1, inf  ;;  %v1604_v18 = vcvt.s32.f32 %v1602_v45  ;;  %vm1668_vm11 = vcmp.eq.f32.partialorder %v6390_v24, %v5163_v34  ;;  %v6400_v34 = vld [vmem:[#allocation64_spill] sm:$0xff] }
 0x258   :  { %v1859_v1 = vcvt.s32.f32 %v1857_v8  ;;  %v1692_v8 = vand.u32 65535, %v6392_v56  ;;  %vm1758_vm15 = vcmp.eq.f32.partialorder %v6400_v34, %v5210_v15  ;;  %v6404_v34 = vld [vmem:[#allocation69_spill] sm:$0xff] }
 0x259   :  { %1550 = vmin.xlane.f32.xlu0 %v1549_v12  ;;  %v1609_v43 = vsel %vm1608_vm8, %v1604_v18, inf  ;;  %v6391_v18 = vld [vmem:[#allocation73_spill] sm:$0xff] }
 0x25a   :  { %v5233_v41 = vpop.xlane.xlu1 %1831 }
 0x25b   :  { %6381 = vst [vmem:[#allocation35_spill] sm:$0xff] %v5233_v41  ;;  %vm1833_vm7 = vcmp.eq.f32.partialorder %v6382_v63, %v5233_v41  ;;  %v1634_v63 = vcvt.s32.f32 %v1632_v23 }
 0x25c   :  { %v1834_v26 = vsel %vm1833_vm7, %v1829_v40, inf }
 0x25d   :  { %1835 = vmin.xlane.f32.xlu1 %v1834_v26  ;;  %1580 = vmin.xlane.f32.xlu0 %v1579_v47  ;;  %v6388_v26 = vld [vmem:[#allocation55_spill] sm:$0xff]  ;;  %v1639_v45 = vsel %vm1638_vm9, %v1634_v63, inf  ;;  %v1694_v63 = vcvt.s32.f32 %v1692_v8 }
 0x25e   :  { %v5241_v12 = vpop.xlane.xlu1 %1816  ;;  %v1662_v47 = vand.u32 65535, %v6388_v26  ;;  %v6393_v26 = vld [vmem:[#allocation58_spill] sm:$0xff] }
 0x25f   :  { %vm1698_vm12 = vcmp.eq.f32.partialorder %v6393_v26, %v5178_v4  ;;  %v6399_v4 = vld [vmem:[#allocation62_spill] sm:$0xff] }
 0x260   :  { %v1664_v46 = vcvt.s32.f32 %v1662_v47  ;;  %v1699_v47 = vsel %vm1698_vm12, %v1694_v63, inf }
 0x261   :  { %1610 = vmin.xlane.f32.xlu0 %v1609_v43  ;;  %v1887_v43 = vand.u32 65535, %v6391_v18  ;;  %v6397_v18 = vld [vmem:[#allocation61_spill] sm:$0xff] }
 0x262   :  { %v5247_v40 = vpop.xlane.xlu1 %1861  ;;  %v1669_v23 = vsel %vm1668_vm11, %v1664_v46, inf  ;;  %vm1728_vm14 = vcmp.eq.f32.partialorder %v6397_v18, %v5195_v19 }
 0x263   :  { %6387 = vst [vmem:[#allocation38_spill] sm:$0xff] %v5247_v40  ;;  %vm1863_vm10 = vcmp.eq.f32.partialorder %v6389_v50, %v5247_v40  ;;  %v6395_v40 = vld [vmem:[#allocation59_spill] sm:$0xff] }
 0x264   :  { %v1864_v41 = vsel %vm1863_vm10, %v1859_v1, inf  ;;  %v1889_v1 = vcvt.s32.f32 %v1887_v43  ;;  %v1722_v24 = vand.u32 65535, %v6395_v40  ;;  %v1752_v43 = vand.u32 65535, %v6399_v4 }
 0x265   :  { %1865 = vmin.xlane.f32.xlu1 %v1864_v41  ;;  %1640 = vmin.xlane.f32.xlu0 %v1639_v45  ;;  %v6396_v41 = vld [vmem:[#allocation8_spill] sm:$0xff]  ;;  %v1148_v40 = vcvt.f32.s32 %v4924_v39 }
 0x266   :  { %v5254_v25 = vpop.xlane.xlu1 %1846  ;;  %v1724_v46 = vcvt.s32.f32 %v1722_v24  ;;  %v1133_v24 = vcvt.f32.s32 %v4941_v32  ;;  %v1947_v32 = vand.u32 65535, %v4932_v51 }
 0x267   :  { %v1149_v39 = vshll.u32 %v1148_v40, 16  ;;  %v6405_v40 = vld [vmem:[#allocation5_spill] sm:$0xff] }
 0x268   :  { %v1729_v8 = vsel %vm1728_vm14, %v1724_v46, inf  ;;  %v1134_v15 = vshll.u32 %v1133_v24, 16  ;;  %vm1818_vm4 = vcmp.eq.f32.partialorder %v6405_v40, %v5241_v12 }
 0x269   :  { %1670 = vmin.xlane.f32.xlu0 %v1669_v23  ;;  %v6398_v23 = vld [vmem:[#allocation75_spill] sm:$0xff] }
 0x26a   :  { %v5260_v50 = vpop.xlane.xlu1 %1891  ;;  %v1917_v26 = vand.u32 65535, %v6398_v23 }
 0x26b   :  { %6394 = vst [vmem:[#allocation37_spill] sm:$0xff] %v5260_v50  ;;  %vm1893_vm13 = vcmp.eq.f32.partialorder %v6396_v41, %v5260_v50  ;;  %v6403_v50 = vld [vmem:[#allocation68_spill] sm:$0xff] }
 0x26c   :  { %v1894_v45 = vsel %vm1893_vm13, %v1889_v1, inf  ;;  %v1919_v41 = vcvt.s32.f32 %v1917_v26  ;;  %vm1788_vm3 = vcmp.eq.f32.partialorder %v6403_v50, %v5225_v53 }
 0x26d   :  { %1895 = vmin.xlane.f32.xlu1 %v1894_v45  ;;  %1700 = vmin.xlane.f32.xlu0 %v1699_v47  ;;  %v1754_v45 = vcvt.s32.f32 %v1752_v43  ;;  %v6402_v47 = vld [vmem:[#allocation65_spill] sm:$0xff] }
 0x26e   :  { %v5267_v56 = vpop.xlane.xlu1 %1876  ;;  %v1782_v18 = vand.u32 65535, %v6402_v47 }
 0x26f   :  { %v1759_v23 = vsel %vm1758_vm15, %v1754_v45, inf }
 0x270   :  { %v1784_v47 = vcvt.s32.f32 %v1782_v18  ;;  %v1949_v18 = vcvt.s32.f32 %v1947_v32  ;;  %v6408_v32 = vld [vmem:[#allocation74_spill] sm:$0xff] }
 0x271   :  { %1730 = vmin.xlane.f32.xlu0 %v1729_v8  ;;  %v1812_v8 = vand.u32 65535, %v6404_v34 }
 0x272   :  { %v5274_v1 = vpop.xlane.xlu1 %1921  ;;  %v1146_v63 = vpop.xlane.xlu0 %1145 }
 0x273   :  { %6401 = vst [vmem:[#allocation40_spill] sm:$0xff] %v5274_v1  ;;  %vm1923_vm2 = vcmp.eq.f32.partialorder %v4926_v57, %v5274_v1  ;;  %v1147_v4 = vcvt.f32.s32 %v1146_v63  ;;  %v1789_v63 = vsel %vm1788_vm3, %v1784_v47, inf  ;;  %v1814_v45 = vcvt.s32.f32 %v1812_v8  ;;  %v6406_v1 = vld [vmem:[#allocation72_spill] sm:$0xff]  ;;  %v6407_v8 = vld [vmem:[#allocation7_spill] sm:$0xff] }
 0x274   :  { %v1924_v46 = vsel %vm1923_vm2, %v1919_v41, inf  ;;  %v1178_v41 = vcvt.f32.s32 %v4939_v35  ;;  %v1842_v51 = vand.u32 65535, %v6406_v1  ;;  %vm1848_vm8 = vcmp.eq.f32.partialorder %v6407_v8, %v5254_v25 }
 0x275   :  { %1925 = vmin.xlane.f32.xlu1 %v1924_v46  ;;  %1760 = vmin.xlane.f32.xlu0 %v1759_v23  ;;  %v1150_v19 = vadd.s32 %v1149_v39, %v1147_v4  ;;  %v1163_v46 = vcvt.f32.s32 %v4958_v17  ;;  %v3809_v4 = vmov 0.0  }
 0x276   :  { %v5283_v26 = vpop.xlane.xlu1 %1906  ;;  %v1131_v43 = vpop.xlane.xlu0 %1130  ;;  %v1179_v17 = vshll.u32 %v1178_v41, 16  ;;  %v1844_v47 = vcvt.s32.f32 %v1842_v51 }
 0x277   :  { %v1132_v57 = vcvt.f32.s32 %v1131_v43  ;;  %vm2082_vm7 = vcmp.eq.s32.totalorder %v4422_v0, %v1150_v19  ;;  %v1977_v19 = vand.u32 65535, %v4964_v42 }
 0x279   :  { %v1135_v50 = vadd.s32 %v1134_v15, %v1132_v57  ;;  %1790 = vmin.xlane.f32.xlu0 %v1789_v63  ;;  %v1819_v15 = vsel %vm1818_vm4, %v1814_v45, inf  ;;  %v1872_v57 = vand.u32 65535, %v6408_v32  ;;  %v1164_v63 = vshll.u32 %v1163_v46, 16  ;;  %v6410_v46 = vld [vmem:[#allocation76_spill] sm:$0xff] }
 0x27a   :  { %v5290_v23 = vpop.xlane.xlu1 %1951  ;;  %v1176_v34 = vpop.xlane.xlu0 %1175  ;;  %v1208_v45 = vcvt.f32.s32 %v4973_v61 }
 0x27b   :  { %vm1953_vm5 = vcmp.eq.f32.partialorder %v4960_v11, %v5290_v23  ;;  %v1177_v24 = vcvt.f32.s32 %v1176_v34  ;;  %vm2081_vm6 = vcmp.eq.s32.totalorder %v4422_v0, %v1135_v50  ;;  %v3266_v11 = vsel %vm2082_vm7, 1.0, %v3809_v4  ;;  %v6409_v34 = vld [vmem:[#allocation9_spill] sm:$0xff] }
 0x27c   :  { %v1954_v35 = vsel %vm1953_vm5, %v1949_v18, inf  ;;  %v3265_v39 = vsel %vm2081_vm6, 1.0, %v3809_v4  ;;  %v1849_v50 = vsel %vm1848_vm8, %v1844_v47, inf  ;;  %vm1878_vm9 = vcmp.eq.f32.partialorder %v6409_v34, %v5267_v56  ;;  %v6412_v47 = vld [vmem:[#allocation10_spill] sm:$0xff] }
 0x27d   :  { %1955 = vmin.xlane.f32.xlu1 %v1954_v35  ;;  %1820 = vmin.xlane.f32.xlu0 %v1819_v15  ;;  %v1180_v40 = vadd.s32 %v1179_v17, %v1177_v24  ;;  %v1193_v35 = vcvt.f32.s32 %v4988_v60  ;;  %v1979_v15 = vcvt.s32.f32 %v1977_v19  ;;  %v1902_v24 = vand.u32 65535, %v6410_v46  ;;  %v6411_v17 = vld [vmem:[#allocation13_spill] sm:$0xff] }
 0x27e   :  { %3623 = vmatprep.mubr.msk.f32.mxu1 %vm800_vm1, %v3265_v39  ;;  %v5301_v1 = vpop.xlane.xlu1 %1936  ;;  %v1161_v43 = vpop.xlane.xlu0 %1160  ;;  %v1874_v39 = vcvt.s32.f32 %v1872_v57  ;;  %v1209_v60 = vshll.u32 %v1208_v45, 16  ;;  %vm1908_vm13 = vcmp.eq.f32.partialorder %v6412_v47, %v5283_v26 }
 0x27f   :  { %3624 = vmatmul.mubr.msk.f32.vlgmr.msra.gmra.mxu1 %vm800_vm1, %v3266_v11  ;;  %v1162_v41 = vcvt.f32.s32 %v1161_v43  ;;  %vm2084_vm12 = vcmp.eq.s32.totalorder %v4422_v0, %v1180_v40  ;;  %v2007_v40 = vand.u32 65535, %v4996_v58  ;;  %v1194_v34 = vshll.u32 %v1193_v35, 16  ;;  %v6415_v35 = vld [vmem:[#allocation20_spill] sm:$0xff] }
 0x280   :  { %v1879_v11 = vsel %vm1878_vm9, %v1874_v39, inf  ;;  %v3268_v32 = vsel %vm2084_vm12, 1.0, %v3809_v4  ;;  %v6414_v39 = vld [vmem:[#allocation12_spill] sm:$0xff] }
 0x281   :  { %v1165_v18 = vadd.s32 %v1164_v63, %v1162_v41  ;;  %1850 = vmin.xlane.f32.xlu0 %v1849_v50  ;;  %v1904_v63 = vcvt.s32.f32 %v1902_v24  ;;  %v6413_v41 = vld [vmem:[#allocation11_spill] sm:$0xff]  ;;  %vm1938_vm14 = vcmp.eq.f32.partialorder %v6414_v39, %v5301_v1 }
 0x282   :  { %v5311_v51 = vpop.xlane.xlu1 %1981  ;;  %v1206_v42 = vpop.xlane.xlu0 %1205  ;;  %v1932_v50 = vand.u32 65535, %v6413_v41 }
 0x283   :  { %vm1983_vm10 = vcmp.eq.f32.partialorder %v6411_v17, %v5311_v51  ;;  %v1207_v8 = vcvt.f32.s32 %v1206_v42  ;;  %vm2083_vm11 = vcmp.eq.s32.totalorder %v4422_v0, %v1165_v18  ;;  %v1909_v42 = vsel %vm1908_vm13, %v1904_v63, inf }
 0x284   :  { %v1984_v61 = vsel %vm1983_vm10, %v1979_v15, inf  ;;  %v3267_v43 = vsel %vm2083_vm11, 1.0, %v3809_v4  ;;  %v1238_v15 = vcvt.f32.s32 %v4990_v20  ;;  %v1223_v17 = vcvt.f32.s32 %v5020_v5 }
 0x285   :  { %1985 = vmin.xlane.f32.xlu1 %v1984_v61  ;;  %1880 = vmin.xlane.f32.xlu0 %v1879_v11  ;;  %v1210_v18 = vadd.s32 %v1209_v60, %v1207_v8  ;;  %v2009_v61 = vcvt.s32.f32 %v2007_v40  ;;  %v1934_v11 = vcvt.s32.f32 %v1932_v50  ;;  %v1962_v8 = vand.u32 65535, %v6415_v35 }
 0x286   :  { %3626 = vmatprep.mubr.msk.f32.mxu1 %vm800_vm1, %v3267_v43  ;;  %v5322_v19 = vpop.xlane.xlu1 %1966  ;;  %v1191_v57 = vpop.xlane.xlu0 %1190  ;;  %v6416_v43 = vld [vmem:[#allocation15_spill] sm:$0xff]  ;;  %v1239_v5 = vshll.u32 %v1238_v15, 16  ;;  %v1253_v35 = vcvt.f32.s32 %v5052_v14 }
 0x287   :  { %3627 = vmatmul.mubr.msk.f32.gmra.mxu1 %vm800_vm1, %v3268_v32  ;;  %v1192_v45 = vcvt.f32.s32 %v1191_v57  ;;  %vm2086_vm3 = vcmp.eq.s32.totalorder %v4422_v0, %v1210_v18  ;;  %v1939_v47 = vsel %vm1938_vm14, %v1934_v11, inf  ;;  %v6417_v57 = vld [vmem:[#allocation19_spill] sm:$0xff]  ;;  %v1964_v50 = vcvt.s32.f32 %v1962_v8  ;;  %v6418_v18 = vld [vmem:[#allocation14_spill] sm:$0xff] }
 0x288   :  { %vm1968_vm4 = vcmp.eq.f32.partialorder %v6417_v57, %v5322_v19  ;;  %v3270_v40 = vsel %vm2086_vm3, 1.0, %v3809_v4 }
 0x289   :  { %v1195_v46 = vadd.s32 %v1194_v34, %v1192_v45  ;;  %1910 = vmin.xlane.f32.xlu0 %v1909_v42  ;;  %v2037_v34 = vand.u32 65535, %v5028_v7  ;;  %v1992_v45 = vand.u32 65535, %v6418_v18  ;;  %v1224_v42 = vshll.u32 %v1223_v17, 16  ;;  %v6420_v17 = vld [vmem:[#allocation24_spill] sm:$0xff] }
 0x28a   :  { %v5332_v24 = vpop.xlane.xlu1 %2011  ;;  %v1236_v58 = vpop.xlane.xlu0 %1235 }
 0x28b   :  { %vm2013_vm15 = vcmp.eq.f32.partialorder %v6416_v43, %v5332_v24  ;;  %v1237_v60 = vcvt.f32.s32 %v1236_v58  ;;  %vm2085_vm2 = vcmp.eq.s32.totalorder %v4422_v0, %v1195_v46  ;;  %v1268_v46 = vcvt.f32.s32 %v5005_v6 }
 0x28c   :  { %v2014_v20 = vsel %vm2013_vm15, %v2009_v61, inf  ;;  %v3269_v32 = vsel %vm2085_vm2, 1.0, %v3809_v4  ;;  %v1969_v58 = vsel %vm1968_vm4, %v1964_v50, inf  ;;  %v6419_v61 = vld [vmem:[#allocation16_spill] sm:$0xff]  ;;  %v2039_v43 = vcvt.s32.f32 %v2037_v34 }
 0x28d   :  { %2015 = vmin.xlane.f32.xlu1 %v2014_v20  ;;  %1940 = vmin.xlane.f32.xlu0 %v1939_v47  ;;  %v1240_v39 = vadd.s32 %v1239_v5, %v1237_v60  ;;  %v1994_v20 = vcvt.s32.f32 %v1992_v45  ;;  %v2022_v60 = vand.u32 65535, %v6420_v17  ;;  %v6421_v47 = vld [vmem:[#allocation23_spill] sm:$0xff]  ;;  %v1269_v6 = vshll.u32 %v1268_v46, 16  ;;  %v6422_v45 = vld [vmem:[#allocation17_spill] sm:$0xff] }
 0x28e   :  { %3629 = vmatprep.mubr.msk.f32.mxu1 %vm800_vm1, %v3269_v32  ;;  %v5343_v63 = vpop.xlane.xlu1 %1996  ;;  %v1221_v41 = vpop.xlane.xlu0 %1220 }
 0x28f   :  { %3630 = vmatmul.mubr.msk.f32.gmra.mxu1 %vm800_vm1, %v3270_v40  ;;  %v1222_v15 = vcvt.f32.s32 %v1221_v41  ;;  %vm1998_vm5 = vcmp.eq.f32.partialorder %v6419_v61, %v5343_v63  ;;  %vm2088_vm8 = vcmp.eq.s32.totalorder %v4422_v0, %v1240_v39  ;;  %v2024_v18 = vcvt.s32.f32 %v2022_v60  ;;  %v6423_v39 = vld [vmem:[#allocation26_spill] sm:$0xff] }
 0x290   :  { %v1999_v57 = vsel %vm1998_vm5, %v1994_v20, inf  ;;  %v3272_v50 = vsel %vm2088_vm8, 1.0, %v3809_v4  ;;  %v2067_v60 = vand.u32 65535, %v5073_v16 }
 0x291   :  { %v1225_v11 = vadd.s32 %v1224_v42, %v1222_v15  ;;  %1970 = vmin.xlane.f32.xlu0 %v1969_v58  ;;  %v2052_v42 = vand.u32 65535, %v6422_v45  ;;  %v1254_v15 = vshll.u32 %v1253_v35, 16  ;;  %v6424_v58 = vld [vmem:[#allocation22_spill] sm:$0xff]  ;;  %v1283_v35 = vcvt.f32.s32 %v5079_v48 }
 0x292   :  { %v5353_v8 = vpop.xlane.xlu1 %2041  ;;  %v1266_v7 = vpop.xlane.xlu0 %1265  ;;  %v1298_v61 = vcvt.f32.s32 %v6424_v58  ;;  %v2069_v48 = vcvt.s32.f32 %v2067_v60 }
 0x293   :  { %vm2043_vm6 = vcmp.eq.f32.partialorder %v6421_v47, %v5353_v8  ;;  %v1267_v32 = vcvt.f32.s32 %v1266_v7  ;;  %vm2087_vm7 = vcmp.eq.s32.totalorder %v4422_v0, %v1225_v11  ;;  %v2054_v17 = vcvt.s32.f32 %v2052_v42 }
 0x294   :  { %v2044_v5 = vsel %vm2043_vm6, %v2039_v43, inf  ;;  %v3271_v14 = vsel %vm2087_vm7, 1.0, %v3809_v4 }
 0x295   :  { %2045 = vmin.xlane.f32.xlu1 %v2044_v5  ;;  %2000 = vmin.xlane.f32.xlu0 %v1999_v57  ;;  %v1270_v40 = vadd.s32 %v1269_v6, %v1267_v32  ;;  %v1299_v32 = vshll.u32 %v1298_v61, 16 }
 0x296   :  { %3632 = vmatprep.mubr.msk.f32.mxu1 %vm800_vm1, %v3271_v14  ;;  %v5362_v41 = vpop.xlane.xlu1 %2026  ;;  %v1251_v34 = vpop.xlane.xlu0 %1250 }
 0x297   :  { %vm2028_vm9 = vcmp.eq.f32.partialorder %v6423_v39, %v5362_v41  ;;  %3633 = vmatmul.mubr.msk.f32.gmra.mxu1 %vm800_vm1, %v3272_v50  ;;  %v1252_v46 = vcvt.f32.s32 %v1251_v34  ;;  %vm2090_vm10 = vcmp.eq.s32.totalorder %v4422_v0, %v1270_v40  ;;  %v6425_v50 = vld [vmem:[#allocation25_spill] sm:$0xff] }
 0x298   :  { %v2029_v11 = vsel %vm2028_vm9, %v2024_v18, inf  ;;  %v3274_v57 = vsel %vm2090_vm10, 1.0, %v3809_v4  ;;  %v6426_v18 = vld [vmem:[#allocation21_spill] sm:$0xff] }
 0x299   :  { %v1255_v7 = vadd.s32 %v1254_v15, %v1252_v46  ;;  %2030 = vmin.xlane.f32.xlu0 %v2029_v11  ;;  %v1328_v45 = vcvt.f32.s32 %v6426_v18  ;;  %v1313_v46 = vcvt.f32.s32 %v5098_v2 }
 0x29a   :  { %v5370_v43 = vpop.xlane.xlu1 %2056  ;;  %v1296_v20 = vpop.xlane.xlu0 %1295 }
 0x29b   :  { %vm2058_vm11 = vcmp.eq.f32.partialorder %v5083_v22, %v5370_v43  ;;  %v1297_v47 = vcvt.f32.s32 %v1296_v20  ;;  %vm2089_vm12 = vcmp.eq.s32.totalorder %v4422_v0, %v1255_v7  ;;  %v1284_v22 = vshll.u32 %v1283_v35, 16 }
 0x29c   :  { %v2059_v6 = vsel %vm2058_vm11, %v2054_v17, inf  ;;  %v3273_v5 = vsel %vm2089_vm12, 1.0, %v3809_v4  ;;  %v1329_v61 = vshll.u32 %v1328_v45, 16  ;;  %v1314_v60 = vshll.u32 %v1313_v46, 16 }
 0x29d   :  { %2060 = vmin.xlane.f32.xlu0 %v2059_v6  ;;  %3635 = vmatprep.mubr.msk.f32.mxu1 %vm800_vm1, %v3273_v5  ;;  %v1300_v14 = vadd.s32 %v1299_v32, %v1297_v47  ;;  %v6427_v47 = vld [vmem:[#allocation18_spill] sm:$0xff]  ;;  %v1343_v5 = vcvt.f32.s32 %v5111_v37  ;;  %v1388_v45 = vcvt.f32.s32 %v5067_v27 }
 0x29e   :  { %v5381_v40 = vpop.xlane.xlu1 %2071  ;;  %3636 = vmatmul.mubr.msk.f32.gmra.mxu1 %vm800_vm1, %v3274_v57  ;;  %v1281_v16 = vpop.xlane.xlu0 %1280  ;;  %v1358_v32 = vcvt.f32.s32 %v6427_v47 }
 0x29f   :  { %vm2073_vm13 = vcmp.eq.f32.partialorder %v6425_v50, %v5381_v40  ;;  %v1282_v34 = vcvt.f32.s32 %v1281_v16  ;;  %vm2092_vm14 = vcmp.eq.s32.totalorder %v4422_v0, %v1300_v14  ;;  %v1389_v46 = vshll.u32 %v1388_v45, 16 }
 0x2a0   :  { %v2074_v42 = vsel %vm2073_vm13, %v2069_v48, inf  ;;  %v3276_v7 = vsel %vm2092_vm14, 1.0, %v3809_v4  ;;  %v1359_v14 = vshll.u32 %v1358_v32, 16 }
 0x2a1   :  { %v1285_v15 = vadd.s32 %v1284_v22, %v1282_v34  ;;  %2075 = vmin.xlane.f32.xlu1 %v2074_v42  ;;  %v1344_v34 = vshll.u32 %v1343_v5, 16 }
 0x2a2   :  { %v1326_v39 = vpop.xlane.xlu0 %1325 }
 0x2a3   :  { %v1327_v58 = vcvt.f32.s32 %v1326_v39  ;;  %vm2091_vm15 = vcmp.eq.s32.totalorder %v4422_v0, %v1285_v15  ;;  %v1373_v15 = vcvt.f32.s32 %v5127_v38 }
 0x2a4   :  { %v3275_v11 = vsel %vm2091_vm15, 1.0, %v3809_v4 }
 0x2a5   :  { %3638 = vmatprep.mubr.msk.f32.mxu1 %vm800_vm1, %v3275_v11  ;;  %v1330_v20 = vadd.s32 %v1329_v61, %v1327_v58 }
 0x2a6   :  { %3639 = vmatmul.mubr.msk.f32.gmra.mxu1 %vm800_vm1, %v3276_v7  ;;  %v1311_v17 = vpop.xlane.xlu0 %1310  ;;  %v1374_v7 = vshll.u32 %v1373_v15, 16 }
 0x2a7   :  { %v1312_v35 = vcvt.f32.s32 %v1311_v17  ;;  %vm2094_vm2 = vcmp.eq.s32.totalorder %v4422_v0, %v1330_v20  ;;  %v1418_v17 = vcvt.f32.s32 %v5081_v10 }
 0x2a8   :  { %v3278_v48 = vsel %vm2094_vm2, 1.0, %v3809_v4 }
 0x2a9   :  { %v1315_v6 = vadd.s32 %v1314_v60, %v1312_v35  ;;  %v1403_v35 = vcvt.f32.s32 %v5144_v52  ;;  %v1419_v32 = vshll.u32 %v1418_v17, 16 }
 0x2aa   :  { %v1356_v2 = vpop.xlane.xlu0 %1355 }
 0x2ab   :  { %v1357_v57 = vcvt.f32.s32 %v1356_v2  ;;  %vm2093_vm3 = vcmp.eq.s32.totalorder %v4422_v0, %v1315_v6 }
 0x2ac   :  { %v3277_v16 = vsel %vm2093_vm3, 1.0, %v3809_v4 }
 0x2ad   :  { %3641 = vmatprep.mubr.msk.f32.mxu1 %vm800_vm1, %v3277_v16  ;;  %v1360_v22 = vadd.s32 %v1359_v14, %v1357_v57  ;;  %v1404_v57 = vshll.u32 %v1403_v35, 16  ;;  %v1448_v16 = vcvt.f32.s32 %v5090_v21 }
 0x2ae   :  { %3642 = vmatmul.mubr.msk.f32.gmra.mxu1 %vm800_vm1, %v3278_v48  ;;  %v1341_v50 = vpop.xlane.xlu0 %1340 }
 0x2af   :  { %v1342_v18 = vcvt.f32.s32 %v1341_v50  ;;  %vm2096_vm4 = vcmp.eq.s32.totalorder %v4422_v0, %v1360_v22  ;;  %v1433_v22 = vcvt.f32.s32 %v5158_v59 }
 0x2b0   :  { %v3280_v61 = vsel %vm2096_vm4, 1.0, %v3809_v4 }
 0x2b1   :  { %v1345_v42 = vadd.s32 %v1344_v34, %v1342_v18  ;;  %v1449_v34 = vshll.u32 %v1448_v16, 16 }
 0x2b2   :  { %v1386_v37 = vpop.xlane.xlu0 %1385 }
 0x2b3   :  { %v1387_v39 = vcvt.f32.s32 %v1386_v37  ;;  %vm2095_vm5 = vcmp.eq.s32.totalorder %v4422_v0, %v1345_v42  ;;  %v1434_v37 = vshll.u32 %v1433_v22, 16 }
 0x2b4   :  { %v3279_v58 = vsel %vm2095_vm5, 1.0, %v3809_v4 }
 0x2b5   :  { %3644 = vmatprep.mubr.msk.f32.mxu1 %vm800_vm1, %v3279_v58  ;;  %v1390_v11 = vadd.s32 %v1389_v46, %v1387_v39  ;;  %v1478_v39 = vcvt.f32.s32 %v5100_v28  ;;  %v1463_v58 = vcvt.f32.s32 %v5169_v33 }
 0x2b6   :  { %3645 = vmatmul.mubr.msk.f32.gmra.mxu1 %vm800_vm1, %v3280_v61  ;;  %v1371_v27 = vpop.xlane.xlu0 %1370 }
 0x2b7   :  { %v1372_v20 = vcvt.f32.s32 %v1371_v27  ;;  %vm2098_vm6 = vcmp.eq.s32.totalorder %v4422_v0, %v1390_v11  ;;  %v1479_v11 = vshll.u32 %v1478_v39, 16  ;;  %v1464_v17 = vshll.u32 %v1463_v58, 16 }
 0x2b8   :  { %v3282_v2 = vsel %vm2098_vm6, 1.0, %v3809_v4 }
 0x2b9   :  { %v1375_v60 = vadd.s32 %v1374_v7, %v1372_v20 }
 0x2ba   :  { %v1416_v38 = vpop.xlane.xlu0 %1415 }
 0x2bb   :  { %v1417_v47 = vcvt.f32.s32 %v1416_v38  ;;  %vm2097_vm7 = vcmp.eq.s32.totalorder %v4422_v0, %v1375_v60  ;;  %v1508_v38 = vcvt.f32.s32 %v5105_v13 }
 0x2bc   :  { %v3281_v6 = vsel %vm2097_vm7, 1.0, %v3809_v4 }
 0x2bd   :  { %3647 = vmatprep.mubr.msk.f32.mxu1 %vm800_vm1, %v3281_v6  ;;  %v1420_v5 = vadd.s32 %v1419_v32, %v1417_v47  ;;  %v1493_v47 = vcvt.f32.s32 %v5181_v55  ;;  %v1566_v32 = vpop.xlane.xlu1 %1565 }
 0x2be   :  { %3648 = vmatmul.mubr.msk.f32.gmra.mxu1 %vm800_vm1, %v3282_v2  ;;  %v1401_v10 = vpop.xlane.xlu0 %1400  ;;  %v1509_v2 = vshll.u32 %v1508_v38, 16 }
 0x2bf   :  { %v1402_v14 = vcvt.f32.s32 %v1401_v10  ;;  %vm2100_vm8 = vcmp.eq.s32.totalorder %v4422_v0, %v1420_v5 }
 0x2c0   :  { %v3284_v45 = vsel %vm2100_vm8, 1.0, %v3809_v4 }
 0x2c1   :  { %v1405_v48 = vadd.s32 %v1404_v57, %v1402_v14  ;;  %v1494_v14 = vshll.u32 %v1493_v47, 16  ;;  %v1596_v55 = vpop.xlane.xlu1 %1595 }
 0x2c2   :  { %v1446_v52 = vpop.xlane.xlu0 %1445 }
 0x2c3   :  { %v1447_v50 = vcvt.f32.s32 %v1446_v52  ;;  %vm2099_vm9 = vcmp.eq.s32.totalorder %v4422_v0, %v1405_v48  ;;  %v1538_v48 = vcvt.f32.s32 %v5113_v30  ;;  %v1567_v30 = vcvt.f32.s32 %v1566_v32 }
 0x2c4   :  { %v3283_v18 = vsel %vm2099_vm9, 1.0, %v3809_v4 }
 0x2c5   :  { %3650 = vmatprep.mubr.msk.f32.mxu1 %vm800_vm1, %v3283_v18  ;;  %v1450_v42 = vadd.s32 %v1449_v34, %v1447_v50  ;;  %v1523_v50 = vcvt.f32.s32 %v5193_v3  ;;  %v1539_v18 = vshll.u32 %v1538_v48, 16  ;;  %v1553_v3 = vcvt.f32.s32 %v5205_v62 }
 0x2c6   :  { %3651 = vmatmul.mubr.msk.f32.gmra.mxu1 %vm800_vm1, %v3284_v45  ;;  %v1431_v21 = vpop.xlane.xlu0 %1430  ;;  %v1568_v45 = vcvt.f32.s32 %v5119_v49  ;;  %v1628_v62 = vcvt.f32.s32 %v5136_v36 }
 0x2c7   :  { %v1432_v15 = vcvt.f32.s32 %v1431_v21  ;;  %vm2102_vm10 = vcmp.eq.s32.totalorder %v4422_v0, %v1450_v42  ;;  %v1524_v39 = vshll.u32 %v1523_v50, 16 }
 0x2c8   :  { %v3286_v7 = vsel %vm2102_vm10, 1.0, %v3809_v4  ;;  %v1569_v58 = vshll.u32 %v1568_v45, 16  ;;  %v1629_v36 = vshll.u32 %v1628_v62, 16  ;;  %v6431_v62 = vld [vmem:[#allocation29_spill] sm:$0xff] }
 0x2c9   :  { %v1435_v46 = vadd.s32 %v1434_v37, %v1432_v15 }
 0x2ca   :  { %v1476_v59 = vpop.xlane.xlu0 %1475 }
 0x2cb   :  { %v1477_v61 = vcvt.f32.s32 %v1476_v59  ;;  %vm2101_vm11 = vcmp.eq.s32.totalorder %v4422_v0, %v1435_v46  ;;  %v1626_v46 = vpop.xlane.xlu1 %1625 }
 0x2cc   :  { %v3285_v27 = vsel %vm2101_vm11, 1.0, %v3809_v4  ;;  %v1627_v32 = vcvt.f32.s32 %v1626_v46 }
 0x2cd   :  { %3653 = vmatprep.mubr.msk.f32.mxu1 %vm800_vm1, %v3285_v27  ;;  %v1480_v20 = vadd.s32 %v1479_v11, %v1477_v61  ;;  %v1598_v61 = vcvt.f32.s32 %v5129_v44  ;;  %v1570_v11 = vadd.s32 %v1569_v58, %v1567_v30  ;;  %v1597_v27 = vcvt.f32.s32 %v1596_v55 }
 0x2ce   :  { %3654 = vmatmul.mubr.msk.f32.gmra.mxu1 %vm800_vm1, %v3286_v7  ;;  %v1461_v28 = vpop.xlane.xlu0 %1460 }
 0x2cf   :  { %v1462_v60 = vcvt.f32.s32 %v1461_v28  ;;  %vm2104_vm12 = vcmp.eq.s32.totalorder %v4422_v0, %v1480_v20  ;;  %v1554_v20 = vshll.u32 %v1553_v3, 16  ;;  %v1583_v28 = vcvt.f32.s32 %v5216_v31 }
 0x2d0   :  { %v3288_v10 = vsel %vm2104_vm12, 1.0, %v3809_v4  ;;  %vm2110_vm4 = vcmp.eq.s32.totalorder %v4422_v0, %v1570_v11 }
 0x2d1   :  { %v1465_v35 = vadd.s32 %v1464_v17, %v1462_v60  ;;  %v1599_v60 = vshll.u32 %v1598_v61, 16  ;;  %v1584_v31 = vshll.u32 %v1583_v28, 16  ;;  %v6430_v61 = vld [vmem:[#allocation30_spill] sm:$0xff] }
 0x2d2   :  { %v1506_v33 = vpop.xlane.xlu0 %1505 }
 0x2d3   :  { %v1507_v6 = vcvt.f32.s32 %v1506_v33  ;;  %vm2103_vm13 = vcmp.eq.s32.totalorder %v4422_v0, %v1465_v35  ;;  %v1656_v35 = vpop.xlane.xlu1 %1655  ;;  %v1600_v47 = vadd.s32 %v1599_v60, %v1597_v27 }
 0x2d4   :  { %v3287_v5 = vsel %vm2103_vm13, 1.0, %v3809_v4  ;;  %v1657_v48 = vcvt.f32.s32 %v1656_v35 }
 0x2d5   :  { %3656 = vmatprep.mubr.msk.f32.mxu1 %vm800_vm1, %v3287_v5  ;;  %v1510_v57 = vadd.s32 %v1509_v2, %v1507_v6  ;;  %v1613_v2 = vcvt.f32.s32 %v5228_v9  ;;  %vm2112_vm6 = vcmp.eq.s32.totalorder %v4422_v0, %v1600_v47  ;;  %v6432_v47 = vld [vmem:[#allocation32_spill] sm:$0xff] }
 0x2d6   :  { %3657 = vmatmul.mubr.msk.f32.gmra.mxu1 %vm800_vm1, %v3288_v10  ;;  %v1491_v13 = vpop.xlane.xlu0 %1490  ;;  %v1658_v10 = vcvt.f32.s32 %v5146_v29 }
 0x2d7   :  { %v1492_v16 = vcvt.f32.s32 %v1491_v13  ;;  %vm2106_vm14 = vcmp.eq.s32.totalorder %v4422_v0, %v1510_v57  ;;  %v1614_v9 = vshll.u32 %v1613_v2, 16 }
 0x2d8   :  { %v3290_v21 = vsel %vm2106_vm14, 1.0, %v3809_v4  ;;  %v1659_v29 = vshll.u32 %v1658_v10, 16 }
 0x2d9   :  { %v1495_v52 = vadd.s32 %v1494_v14, %v1492_v16  ;;  %v3294_v14 = vsel %vm2110_vm4, 1.0, %v3809_v4  ;;  %v1630_v16 = vadd.s32 %v1629_v36, %v1627_v32  ;;  %v1748_v32 = vcvt.f32.s32 %v6432_v47 }
 0x2da   :  { %v1536_v22 = vpop.xlane.xlu0 %1535  ;;  %v1660_v30 = vadd.s32 %v1659_v29, %v1657_v48 }
 0x2db   :  { %v1537_v34 = vcvt.f32.s32 %v1536_v22  ;;  %vm2105_vm15 = vcmp.eq.s32.totalorder %v4422_v0, %v1495_v52  ;;  %v1643_v52 = vcvt.f32.s32 %v5239_v54  ;;  %v1686_v22 = vpop.xlane.xlu1 %1685  ;;  %vm2114_vm8 = vcmp.eq.s32.totalorder %v4422_v0, %v1630_v16 }
 0x2dc   :  { %v3289_v42 = vsel %vm2105_vm15, 1.0, %v3809_v4  ;;  %vm2116_vm10 = vcmp.eq.s32.totalorder %v4422_v0, %v1660_v30 }
 0x2dd   :  { %3659 = vmatprep.mubr.msk.f32.mxu1 %vm800_vm1, %v3289_v42  ;;  %v1540_v37 = vadd.s32 %v1539_v18, %v1537_v34  ;;  %v6428_v34 = vld [vmem:[#allocation28_spill] sm:$0xff]  ;;  %v1644_v54 = vshll.u32 %v1643_v52, 16  ;;  %v3300_v2 = vsel %vm2116_vm10, 1.0, %v3809_v4 }
 0x2de   :  { %3660 = vmatmul.mubr.msk.f32.gmra.mxu1 %vm800_vm1, %v3290_v21  ;;  %v1521_v15 = vpop.xlane.xlu0 %1520  ;;  %v1688_v18 = vcvt.f32.s32 %v6428_v34  ;;  %v3296_v21 = vsel %vm2112_vm6, 1.0, %v3809_v4 }
 0x2df   :  { %v1522_v59 = vcvt.f32.s32 %v1521_v15  ;;  %vm2108_vm2 = vcmp.eq.s32.totalorder %v4422_v0, %v1540_v37  ;;  %v1687_v37 = vcvt.f32.s32 %v1686_v22  ;;  %v1716_v46 = vpop.xlane.xlu1 %1715 }
 0x2e0   :  { %v3292_v44 = vsel %vm2108_vm2, 1.0, %v3809_v4  ;;  %v1689_v58 = vshll.u32 %v1688_v18, 16  ;;  %v1717_v28 = vcvt.f32.s32 %v1716_v46 }
 0x2e1   :  { %v1525_v49 = vadd.s32 %v1524_v39, %v1522_v59  ;;  %v6429_v39 = vld [vmem:[#allocation27_spill] sm:$0xff] }
 0x2e2   :  { %v1551_v7 = vpop.xlane.xlu0 %1550  ;;  %v1673_v3 = vcvt.f32.s32 %v6429_v39  ;;  %v6436_v39 = vld [vmem:[#allocation36_spill] sm:$0xff] }
 0x2e3   :  { %v1552_v17 = vcvt.f32.s32 %v1551_v7  ;;  %vm2107_vm3 = vcmp.eq.s32.totalorder %v4422_v0, %v1525_v49  ;;  %v1718_v49 = vcvt.f32.s32 %v6430_v61  ;;  %v3298_v7 = vsel %vm2114_vm8, 1.0, %v3809_v4  ;;  %v1746_v35 = vpop.xlane.xlu1 %1745 }
 0x2e4   :  { %v3291_v38 = vsel %vm2107_vm3, 1.0, %v3809_v4  ;;  %v1674_v60 = vshll.u32 %v1673_v3, 16  ;;  %v1747_v36 = vcvt.f32.s32 %v1746_v35  ;;  %v1808_v3 = vcvt.f32.s32 %v6436_v39 }
 0x2e5   :  { %v1555_v33 = vadd.s32 %v1554_v20, %v1552_v17  ;;  %3662 = vmatprep.mubr.msk.f32.mxu1 %vm800_vm1, %v3291_v38  ;;  %v1690_v20 = vadd.s32 %v1689_v58, %v1687_v37  ;;  %v1703_v38 = vcvt.f32.s32 %v6431_v62 }
 0x2e6   :  { %3663 = vmatmul.mubr.msk.f32.gmra.mxu1 %vm800_vm1, %v3292_v44  ;;  %v1581_v6 = vpop.xlane.xlu0 %1580  ;;  %v1719_v44 = vshll.u32 %v1718_v49, 16 }
 0x2e7   :  { %v1582_v5 = vcvt.f32.s32 %v1581_v6  ;;  %vm2109_vm5 = vcmp.eq.s32.totalorder %v4422_v0, %v1555_v33  ;;  %vm2118_vm12 = vcmp.eq.s32.totalorder %v4422_v0, %v1690_v20  ;;  %v1776_v16 = vpop.xlane.xlu1 %1775 }
 0x2e8   :  { %v3293_v57 = vsel %vm2109_vm5, 1.0, %v3809_v4  ;;  %v3302_v29 = vsel %vm2118_vm12, 1.0, %v3809_v4  ;;  %v1777_v18 = vcvt.f32.s32 %v1776_v16 }
 0x2e9   :  { %v1585_v13 = vadd.s32 %v1584_v31, %v1582_v5  ;;  %3665 = vmatprep.mubr.msk.f32.mxu1 %vm800_vm1, %v3293_v57  ;;  %v1720_v5 = vadd.s32 %v1719_v44, %v1717_v28  ;;  %v1704_v57 = vshll.u32 %v1703_v38, 16 }
 0x2ea   :  { %3666 = vmatmul.mubr.msk.f32.gmra.mxu1 %vm800_vm1, %v3294_v14  ;;  %v1611_v55 = vpop.xlane.xlu0 %1610 }
 0x2eb   :  { %v1612_v50 = vcvt.f32.s32 %v1611_v55  ;;  %vm2111_vm7 = vcmp.eq.s32.totalorder %v4422_v0, %v1585_v13  ;;  %v6433_v13 = vld [vmem:[#allocation31_spill] sm:$0xff]  ;;  %v1749_v55 = vshll.u32 %v1748_v32, 16  ;;  %vm2120_vm14 = vcmp.eq.s32.totalorder %v4422_v0, %v1720_v5  ;;  %v1806_v37 = vpop.xlane.xlu1 %1805 }
 0x2ec   :  { %v3295_v45 = vsel %vm2111_vm7, 1.0, %v3809_v4  ;;  %v1733_v14 = vcvt.f32.s32 %v6433_v13  ;;  %v3304_v58 = vsel %vm2120_vm14, 1.0, %v3809_v4  ;;  %v1807_v49 = vcvt.f32.s32 %v1806_v37 }
 0x2ed   :  { %v1615_v42 = vadd.s32 %v1614_v9, %v1612_v50  ;;  %3668 = vmatprep.mubr.msk.f32.mxu1 %vm800_vm1, %v3295_v45  ;;  %v6434_v9 = vld [vmem:[#allocation34_spill] sm:$0xff]  ;;  %v1750_v34 = vadd.s32 %v1749_v55, %v1747_v36 }
 0x2ee   :  { %3669 = vmatmul.mubr.msk.f32.gmra.mxu1 %vm800_vm1, %v3296_v21  ;;  %v1641_v15 = vpop.xlane.xlu0 %1640  ;;  %v1778_v52 = vcvt.f32.s32 %v6434_v9  ;;  %v6435_v21 = vld [vmem:[#allocation33_spill] sm:$0xff]  ;;  %v6438_v36 = vld [vmem:[#allocation38_spill] sm:$0xff]  ;;  %v1853_v9 = vcvt.f32.s32 %v5254_v25 }
 0x2ef   :  { %v1642_v59 = vcvt.f32.s32 %v1641_v15  ;;  %vm2113_vm9 = vcmp.eq.s32.totalorder %v4422_v0, %v1615_v42  ;;  %v1734_v42 = vshll.u32 %v1733_v14, 16  ;;  %v1763_v30 = vcvt.f32.s32 %v6435_v21  ;;  %v1836_v20 = vpop.xlane.xlu1 %1835 }
 0x2f0   :  { %v3297_v11 = vsel %vm2113_vm9, 1.0, %v3809_v4  ;;  %vm2122_vm2 = vcmp.eq.s32.totalorder %v4422_v0, %v1750_v34  ;;  %v1837_v47 = vcvt.f32.s32 %v1836_v20  ;;  %v1854_v25 = vshll.u32 %v1853_v9, 16 }
 0x2f1   :  { %v1645_v27 = vadd.s32 %v1644_v54, %v1642_v59  ;;  %3671 = vmatprep.mubr.msk.f32.mxu1 %vm800_vm1, %v3297_v11  ;;  %v1779_v54 = vshll.u32 %v1778_v52, 16  ;;  %v1913_v20 = vcvt.f32.s32 %v5283_v26 }
 0x2f2   :  { %3672 = vmatmul.mubr.msk.f32.gmra.mxu1 %vm800_vm1, %v3298_v7  ;;  %v1671_v17 = vpop.xlane.xlu0 %1670  ;;  %v1793_v7 = vcvt.f32.s32 %v5225_v53 }
 0x2f3   :  { %v1672_v33 = vcvt.f32.s32 %v1671_v17  ;;  %vm2115_vm11 = vcmp.eq.s32.totalorder %v4422_v0, %v1645_v27  ;;  %v1780_v61 = vadd.s32 %v1779_v54, %v1777_v18  ;;  %v1764_v27 = vshll.u32 %v1763_v30, 16 }
 0x2f4   :  { %v3299_v6 = vsel %vm2115_vm11, 1.0, %v3809_v4  ;;  %v1809_v17 = vshll.u32 %v1808_v3, 16  ;;  %v1794_v53 = vshll.u32 %v1793_v7, 16  ;;  %v1914_v26 = vshll.u32 %v1913_v20, 16 }
 0x2f5   :  { %v1675_v31 = vadd.s32 %v1674_v60, %v1672_v33  ;;  %3674 = vmatprep.mubr.msk.f32.mxu1 %vm800_vm1, %v3299_v6  ;;  %v6437_v60 = vld [vmem:[#allocation35_spill] sm:$0xff]  ;;  %v3306_v33 = vsel %vm2122_vm2, 1.0, %v3809_v4  ;;  %vm2124_vm4 = vcmp.eq.s32.totalorder %v4422_v0, %v1780_v61  ;;  %v1823_v6 = vcvt.f32.s32 %v5241_v12 }
 0x2f6   :  { %3675 = vmatmul.mubr.msk.f32.gmra.mxu1 %vm800_vm1, %v3300_v2  ;;  %v1701_v10 = vpop.xlane.xlu0 %1700  ;;  %v1838_v62 = vcvt.f32.s32 %v6437_v60  ;;  %v1810_v44 = vadd.s32 %v1809_v17, %v1807_v49  ;;  %v3308_v14 = vsel %vm2124_vm4, 1.0, %v3809_v4 }
 0x2f7   :  { %v1702_v48 = vcvt.f32.s32 %v1701_v10  ;;  %vm2117_vm13 = vcmp.eq.s32.totalorder %v4422_v0, %v1675_v31  ;;  %v1866_v31 = vpop.xlane.xlu1 %1865  ;;  %v1868_v10 = vcvt.f32.s32 %v6438_v36  ;;  %v1824_v12 = vshll.u32 %v1823_v6, 16 }
 0x2f8   :  { %v3301_v22 = vsel %vm2117_vm13, 1.0, %v3809_v4  ;;  %v1839_v5 = vshll.u32 %v1838_v62, 16  ;;  %vm2126_vm6 = vcmp.eq.s32.totalorder %v4422_v0, %v1810_v44  ;;  %v1958_v62 = vcvt.f32.s32 %v5290_v23 }
 0x2f9   :  { %v1705_v50 = vadd.s32 %v1704_v57, %v1702_v48  ;;  %3677 = vmatprep.mubr.msk.f32.mxu1 %vm800_vm1, %v3301_v22  ;;  %v1867_v48 = vcvt.f32.s32 %v1866_v31 }
 0x2fa   :  { %3678 = vmatmul.mubr.msk.f32.gmra.mxu1 %vm800_vm1, %v3302_v29  ;;  %v1731_v45 = vpop.xlane.xlu0 %1730  ;;  %v1840_v16 = vadd.s32 %v1839_v5, %v1837_v47  ;;  %v6439_v29 = vld [vmem:[#allocation37_spill] sm:$0xff]  ;;  %v1959_v23 = vshll.u32 %v1958_v62, 16  ;;  %v2078_v62 = vcvt.f32.s32 %v5381_v40 }
 0x2fb   :  { %v1732_v15 = vcvt.f32.s32 %v1731_v45  ;;  %vm2119_vm15 = vcmp.eq.s32.totalorder %v4422_v0, %v1705_v50  ;;  %v1896_v52 = vpop.xlane.xlu1 %1895  ;;  %v1869_v50 = vshll.u32 %v1868_v10, 16  ;;  %v1898_v34 = vcvt.f32.s32 %v6439_v29 }
 0x2fc   :  { %v3303_v46 = vsel %vm2119_vm15, 1.0, %v3809_v4  ;;  %v1897_v30 = vcvt.f32.s32 %v1896_v52  ;;  %vm2128_vm8 = vcmp.eq.s32.totalorder %v4422_v0, %v1840_v16  ;;  %v1973_v16 = vcvt.f32.s32 %v5322_v19 }
 0x2fd   :  { %v1735_v59 = vadd.s32 %v1734_v42, %v1732_v15  ;;  %3680 = vmatprep.mubr.msk.f32.mxu1 %vm800_vm1, %v3303_v46  ;;  %v3310_v42 = vsel %vm2126_vm6, 1.0, %v3809_v4  ;;  %v1870_v21 = vadd.s32 %v1869_v50, %v1867_v48  ;;  %v1883_v15 = vcvt.f32.s32 %v5267_v56  ;;  %v6440_v46 = vld [vmem:[#allocation40_spill] sm:$0xff] }
 0x2fe   :  { %3681 = vmatmul.mubr.msk.f32.gmra.mxu1 %vm800_vm1, %v3304_v58  ;;  %v1761_v11 = vpop.xlane.xlu0 %1760  ;;  %v1899_v3 = vshll.u32 %v1898_v34, 16  ;;  %v3312_v49 = vsel %vm2128_vm8, 1.0, %v3809_v4  ;;  %v2003_v50 = vcvt.f32.s32 %v5343_v63 }
 0x2ff   :  { %v1762_v28 = vcvt.f32.s32 %v1761_v11  ;;  %vm2121_vm3 = vcmp.eq.s32.totalorder %v4422_v0, %v1735_v59  ;;  %v1926_v54 = vpop.xlane.xlu1 %1925  ;;  %v1928_v59 = vcvt.f32.s32 %v6440_v46  ;;  %vm2130_vm10 = vcmp.eq.s32.totalorder %v4422_v0, %v1870_v21 }
 0x300   :  { %v3305_v38 = vsel %vm2121_vm3, 1.0, %v3809_v4  ;;  %v1900_v11 = vadd.s32 %v1899_v3, %v1897_v30  ;;  %v1884_v56 = vshll.u32 %v1883_v15, 16 }
 0x301   :  { %v1765_v35 = vadd.s32 %v1764_v27, %v1762_v28  ;;  %3683 = vmatprep.mubr.msk.f32.mxu1 %vm800_vm1, %v3305_v38  ;;  %v1927_v27 = vcvt.f32.s32 %v1926_v54  ;;  %v1929_v60 = vshll.u32 %v1928_v59, 16 }
 0x302   :  { %3684 = vmatmul.mubr.msk.f32.gmra.mxu1 %vm800_vm1, %v3306_v33  ;;  %v1791_v32 = vpop.xlane.xlu0 %1790  ;;  %v3314_v33 = vsel %vm2130_vm10, 1.0, %v3809_v4  ;;  %vm2132_vm12 = vcmp.eq.s32.totalorder %v4422_v0, %v1900_v11 }
 0x303   :  { %v1792_v2 = vcvt.f32.s32 %v1791_v32  ;;  %vm2123_vm5 = vcmp.eq.s32.totalorder %v4422_v0, %v1765_v35  ;;  %v1930_v44 = vadd.s32 %v1929_v60, %v1927_v27  ;;  %v3316_v10 = vsel %vm2132_vm12, 1.0, %v3809_v4 }
 0x304   :  { %v3307_v57 = vsel %vm2123_vm5, 1.0, %v3809_v4 }
 0x305   :  { %v1795_v13 = vadd.s32 %v1794_v53, %v1792_v2  ;;  %3686 = vmatprep.mubr.msk.f32.mxu1 %vm800_vm1, %v3307_v57  ;;  %v1943_v53 = vcvt.f32.s32 %v5301_v1  ;;  %v1988_v2 = vcvt.f32.s32 %v5311_v51  ;;  %vm2134_vm14 = vcmp.eq.s32.totalorder %v4422_v0, %v1930_v44 }
 0x306   :  { %3687 = vmatmul.mubr.msk.f32.gmra.mxu1 %vm800_vm1, %v3308_v14  ;;  %v1821_v55 = vpop.xlane.xlu0 %1820  ;;  %v1956_v28 = vpop.xlane.xlu1 %1955 }
 0x307   :  { %v1822_v22 = vcvt.f32.s32 %v1821_v55  ;;  %vm2125_vm7 = vcmp.eq.s32.totalorder %v4422_v0, %v1795_v13  ;;  %v1957_v47 = vcvt.f32.s32 %v1956_v28  ;;  %v1944_v1 = vshll.u32 %v1943_v53, 16 }
 0x308   :  { %v3309_v18 = vsel %vm2125_vm7, 1.0, %v3809_v4  ;;  %v1989_v51 = vshll.u32 %v1988_v2, 16 }
 0x309   :  { %v1825_v45 = vadd.s32 %v1824_v12, %v1822_v22  ;;  %3689 = vmatprep.mubr.msk.f32.mxu1 %vm800_vm1, %v3309_v18  ;;  %v1960_v57 = vadd.s32 %v1959_v23, %v1957_v47  ;;  %v2018_v12 = vcvt.f32.s32 %v5332_v24  ;;  %v3318_v22 = vsel %vm2134_vm14, 1.0, %v3809_v4 }
 0x30a   :  { %3690 = vmatmul.mubr.msk.f32.gmra.mxu1 %vm800_vm1, %v3310_v42  ;;  %v1851_v37 = vpop.xlane.xlu0 %1850  ;;  %v1974_v18 = vshll.u32 %v1973_v16, 16  ;;  %v2048_v42 = vcvt.f32.s32 %v5353_v8  ;;  %v2079_v47 = vshll.u32 %v2078_v62, 16 }
 0x30b   :  { %v1852_v39 = vcvt.f32.s32 %v1851_v37  ;;  %vm2127_vm9 = vcmp.eq.s32.totalorder %v4422_v0, %v1825_v45  ;;  %vm2136_vm2 = vcmp.eq.s32.totalorder %v4422_v0, %v1960_v57  ;;  %v2019_v24 = vshll.u32 %v2018_v12, 16 }
 0x30c   :  { %v3311_v58 = vsel %vm2127_vm9, 1.0, %v3809_v4  ;;  %v3320_v63 = vsel %vm2136_vm2, 1.0, %v3809_v4  ;;  %v2004_v37 = vshll.u32 %v2003_v50, 16  ;;  %v2049_v8 = vshll.u32 %v2048_v42, 16 }
 0x30d   :  { %v1855_v61 = vadd.s32 %v1854_v25, %v1852_v39  ;;  %3692 = vmatprep.mubr.msk.f32.mxu1 %vm800_vm1, %v3311_v58  ;;  %v2033_v39 = vcvt.f32.s32 %v5362_v41  ;;  %v2063_v41 = vcvt.f32.s32 %v5370_v43 }
 0x30e   :  { %3693 = vmatmul.mubr.msk.f32.gmra.mxu1 %vm800_vm1, %v3312_v49  ;;  %v1881_v7 = vpop.xlane.xlu0 %1880  ;;  %v1986_v6 = vpop.xlane.xlu1 %1985 }
 0x30f   :  { %v1882_v17 = vcvt.f32.s32 %v1881_v7  ;;  %vm2129_vm11 = vcmp.eq.s32.totalorder %v4422_v0, %v1855_v61  ;;  %v1987_v13 = vcvt.f32.s32 %v1986_v6  ;;  %v2034_v27 = vshll.u32 %v2033_v39, 16 }
 0x310   :  { %v3313_v38 = vsel %vm2129_vm11, 1.0, %v3809_v4  ;;  %v2064_v60 = vshll.u32 %v2063_v41, 16 }
 0x311   :  { %v1885_v35 = vadd.s32 %v1884_v56, %v1882_v17  ;;  %3695 = vmatprep.mubr.msk.f32.mxu1 %vm800_vm1, %v3313_v38  ;;  %v1990_v29 = vadd.s32 %v1989_v51, %v1987_v13  ;;  %v3724_v13 = vld [vmem:[%s6115_s0 + $0x8] sm:$0xff] }
 0x312   :  { %3696 = vmatmul.mubr.msk.f32.gmra.mxu1 %vm800_vm1, %v3314_v33  ;;  %v1911_v32 = vpop.xlane.xlu0 %1910 }
 0x313   :  { %v1912_v31 = vcvt.f32.s32 %v1911_v32  ;;  %vm2131_vm13 = vcmp.eq.s32.totalorder %v4422_v0, %v1885_v35  ;;  %vm2138_vm4 = vcmp.eq.s32.totalorder %v4422_v0, %v1990_v29  ;;  %v3727_v29 = vld [vmem:[%s6115_s0 + $0x20] sm:$0xff] }
 0x314   :  { %v3315_v5 = vsel %vm2131_vm13, 1.0, %v3809_v4  ;;  %v3322_v61 = vsel %vm2138_vm4, 1.0, %v3809_v4 }
 0x315   :  { %v1915_v36 = vadd.s32 %v1914_v26, %v1912_v31  ;;  %3698 = vmatprep.mubr.msk.f32.mxu1 %vm800_vm1, %v3315_v5 }
 0x316   :  { %3699 = vmatmul.mubr.msk.f32.gmra.mxu1 %vm800_vm1, %v3316_v10  ;;  %v1941_v14 = vpop.xlane.xlu0 %1940  ;;  %v2016_v48 = vpop.xlane.xlu1 %2015 }
 0x317   :  { %v1942_v55 = vcvt.f32.s32 %v1941_v14  ;;  %vm2133_vm15 = vcmp.eq.s32.totalorder %v4422_v0, %v1915_v36  ;;  %v2017_v34 = vcvt.f32.s32 %v2016_v48  ;;  %v3723_v36 = vld [vmem:[%s6115_s0] sm:$0xff] }
 0x318   :  { %v3317_v9 = vsel %vm2133_vm15, 1.0, %v3809_v4 }
 0x319   :  { %v1945_v52 = vadd.s32 %v1944_v1, %v1942_v55  ;;  %3701 = vmatprep.mubr.msk.f32.mxu1 %vm800_vm1, %v3317_v9  ;;  %v2020_v25 = vadd.s32 %v2019_v24, %v2017_v34  ;;  %v3725_v1 = vld [vmem:[%s6115_s0 + $0x10] sm:$0xff] }
 0x31a   :  { %3702 = vmatmul.mubr.msk.f32.gmra.mxu1 %vm800_vm1, %v3318_v22  ;;  %v1971_v19 = vpop.xlane.xlu0 %1970  ;;  %v3726_v22 = vld [vmem:[%s6115_s0 + $0x18] sm:$0xff] }
 0x31b   :  { %v1972_v45 = vcvt.f32.s32 %v1971_v19  ;;  %vm2135_vm3 = vcmp.eq.s32.totalorder %v4422_v0, %v1945_v52  ;;  %vm2140_vm6 = vcmp.eq.s32.totalorder %v4422_v0, %v2020_v25  ;;  %v3729_v25 = vld [vmem:[%s6115_s0 + $0x30] sm:$0xff] }
 0x31c   :  { %v3319_v21 = vsel %vm2135_vm3, 1.0, %v3809_v4  ;;  %v3324_v28 = vsel %vm2140_vm6, 1.0, %v3809_v4 }
 0x31d   :  { %v1975_v30 = vadd.s32 %v1974_v18, %v1972_v45  ;;  %3704 = vmatprep.mubr.msk.f32.mxu1 %vm800_vm1, %v3319_v21 }
 0x31e   :  { %v2046_v15 = vpop.xlane.xlu1 %2045  ;;  %3705 = vmatmul.mubr.msk.f32.gmra.mxu1 %vm800_vm1, %v3320_v63  ;;  %v2001_v54 = vpop.xlane.xlu0 %2000  ;;  %v3728_v63 = vld [vmem:[%s6115_s0 + $0x28] sm:$0xff] }
 0x31f   :  { %v2047_v3 = vcvt.f32.s32 %v2046_v15  ;;  %v2002_v46 = vcvt.f32.s32 %v2001_v54  ;;  %vm2137_vm5 = vcmp.eq.s32.totalorder %v4422_v0, %v1975_v30 }
 0x320   :  { %v3321_v59 = vsel %vm2137_vm5, 1.0, %v3809_v4 }
 0x321   :  { %v2005_v58 = vadd.s32 %v2004_v37, %v2002_v46  ;;  %3707 = vmatprep.mubr.msk.f32.mxu1 %vm800_vm1, %v3321_v59  ;;  %v2050_v49 = vadd.s32 %v2049_v8, %v2047_v3 }
 0x322   :  { %3708 = vmatmul.mubr.msk.f32.gmra.mxu1 %vm800_vm1, %v3322_v61  ;;  %v2031_v11 = vpop.xlane.xlu0 %2030  ;;  %v3730_v61 = vld [vmem:[%s6115_s0 + $0x38] sm:$0xff] }
 0x323   :  { %v2032_v7 = vcvt.f32.s32 %v2031_v11  ;;  %vm2139_vm7 = vcmp.eq.s32.totalorder %v4422_v0, %v2005_v58  ;;  %vm2142_vm8 = vcmp.eq.s32.totalorder %v4422_v0, %v2050_v49  ;;  %v3731_v11 = vld [vmem:[%s6115_s0 + $0x40] sm:$0xff] }
 0x324   :  { %v3323_v56 = vsel %vm2139_vm7, 1.0, %v3809_v4  ;;  %v3326_v33 = vsel %vm2142_vm8, 1.0, %v3809_v4 }
 0x325   :  { %v2035_v20 = vadd.s32 %v2034_v27, %v2032_v7  ;;  %3710 = vmatprep.mubr.msk.f32.mxu1 %vm800_vm1, %v3323_v56 }
 0x326   :  { %3711 = vmatmul.mubr.msk.f32.gmra.mxu1 %vm800_vm1, %v3324_v28  ;;  %v2061_v17 = vpop.xlane.xlu0 %2060 }
 0x327   :  { %v2062_v38 = vcvt.f32.s32 %v2061_v17  ;;  %vm2141_vm9 = vcmp.eq.s32.totalorder %v4422_v0, %v2035_v20 }
 0x328   :  { %v3325_v43 = vsel %vm2141_vm9, 1.0, %v3809_v4 }
 0x329   :  { %v2065_v35 = vadd.s32 %v2064_v60, %v2062_v38  ;;  %3713 = vmatprep.mubr.msk.f32.mxu1 %vm800_vm1, %v3325_v43  ;;  %v3732_v38 = vld [vmem:[%s6115_s0 + $0x48] sm:$0xff] }
 0x32a   :  { %v2076_v44 = vpop.xlane.xlu1 %2075  ;;  %3714 = vmatmul.mubr.msk.f32.gmra.mxu1 %vm800_vm1, %v3326_v33 }
 0x32b   :  { %v2077_v32 = vcvt.f32.s32 %v2076_v44  ;;  %vm2143_vm10 = vcmp.eq.s32.totalorder %v4422_v0, %v2065_v35  ;;  %v3733_v35 = vld [vmem:[%s6115_s0 + $0x50] sm:$0xff] }
 0x32c   :  { %v3327_v26 = vsel %vm2143_vm10, 1.0, %v3809_v4 }
 0x32d   :  { %v2080_v40 = vadd.s32 %v2079_v47, %v2077_v32  ;;  %3716 = vmatprep.mubr.msk.f32.mxu1 %vm800_vm1, %v3327_v26 }
 0x32f   :  { %vm2144_vm11 = vcmp.eq.s32.totalorder %v4422_v0, %v2080_v40 }
 0x330   :  { %v3328_v53 = vsel %vm2144_vm11, 1.0, %v3809_v4 }
 0x331   :  { %3717 = vmatmul.mubr.msk.f32.gmra.mxu1 %vm800_vm1, %v3328_v53  ;;  %vm3179_vm1 = vcmask 0  }
 0x33f   :  { %v3625_v6 = vpop.f32.mrf.mxu1 }
 0x340   :  { %2851 = vst.msk [vmem:[%s6118_s3 + $0x8] sm:$0xff] %vm83_vm0, %v3625_v6  ;;  %v2915_v14 = vsub.f32 %v3625_v6, %v3724_v13 }
 0x341   :  { %v2531_v31 = vpop.f32.mrf.mxu1 }
 0x342   :  { %2850 = vst.msk [vmem:[%s6118_s3] sm:$0xff] %vm83_vm0, %v2531_v31  ;;  %v2914_v10 = vsub.f32 %v2531_v31, %v3723_v36  ;;  %v2979_v51 = vmul.f32 %v2915_v14, %v2915_v14 }
 0x344   :  { %v2978_v48 = vmul.f32 %v2914_v10, %v2914_v10  ;;  %v3043_v19 = vsel %vm83_vm0, %v2979_v51, 0.0 }
 0x346   :  { %v3042_v52 = vsel %vm83_vm0, %v2978_v48, 0.0 }
 0x347   :  { %v3628_v23 = vpop.f32.mrf.mxu1  ;;  %v3044_v45 = vadd.f32 %v3043_v19, %v3042_v52  ;;  %v3738_v19 = vld [vmem:[%s6115_s0 + $0x78] sm:$0xff] }
 0x348   :  { %2853 = vst.msk [vmem:[%s6118_s3 + $0x18] sm:$0xff] %vm83_vm0, %v3628_v23  ;;  %v2917_v50 = vsub.f32 %v3628_v23, %v3726_v22  ;;  %v3734_v23 = vld [vmem:[%s6115_s0 + $0x58] sm:$0xff] }
 0x349   :  { %v2541_v0 = vpop.f32.mrf.mxu1 }
 0x34a   :  { %2852 = vst.msk [vmem:[%s6118_s3 + $0x10] sm:$0xff] %vm83_vm0, %v2541_v0  ;;  %v2916_v16 = vsub.f32 %v2541_v0, %v3725_v1  ;;  %v2981_v24 = vmul.f32 %v2917_v50, %v2917_v50 }
 0x34c   :  { %v2980_v12 = vmul.f32 %v2916_v16, %v2916_v16  ;;  %v3047_v39 = vsel %vm83_vm0, %v2981_v24, 0.0  ;;  %v3736_v16 = vld [vmem:[%s6115_s0 + $0x68] sm:$0xff] }
 0x34e   :  { %v3045_v18 = vsel %vm83_vm0, %v2980_v12, 0.0 }
 0x34f   :  { %v3631_v4 = vpop.f32.mrf.mxu1  ;;  %v3046_v21 = vadd.f32 %v3045_v18, %v3044_v45  ;;  %v3739_v45 = vld [vmem:[%s6115_s0 + $0x80] sm:$0xff] }
 0x350   :  { %2855 = vst.msk [vmem:[%s6118_s3 + $0x28] sm:$0xff] %vm83_vm0, %v3631_v4  ;;  %v2919_v37 = vsub.f32 %v3631_v4, %v3728_v63  ;;  %v3735_v4 = vld [vmem:[%s6115_s0 + $0x60] sm:$0xff] }
 0x351   :  { %v2551_v2 = vpop.f32.mrf.mxu1  ;;  %v3048_v46 = vadd.f32 %v3047_v39, %v3046_v21  ;;  %v3740_v39 = vld [vmem:[%s6115_s0 + $0x88] sm:$0xff] }
 0x352   :  { %2854 = vst.msk [vmem:[%s6118_s3 + $0x20] sm:$0xff] %vm83_vm0, %v2551_v2  ;;  %v2918_v34 = vsub.f32 %v2551_v2, %v3727_v29  ;;  %v2983_v8 = vmul.f32 %v2919_v37, %v2919_v37 }
 0x354   :  { %v2982_v42 = vmul.f32 %v2918_v34, %v2918_v34  ;;  %v3051_v7 = vsel %vm83_vm0, %v2983_v8, 0.0 }
 0x356   :  { %v3049_v3 = vsel %vm83_vm0, %v2982_v42, 0.0 }
 0x357   :  { %v3634_v5 = vpop.f32.mrf.mxu1  ;;  %v3050_v58 = vadd.f32 %v3049_v3, %v3048_v46  ;;  %v3741_v46 = vld [vmem:[%s6115_s0 + $0x90] sm:$0xff] }
 0x358   :  { %2857 = vst.msk [vmem:[%s6118_s3 + $0x38] sm:$0xff] %vm83_vm0, %v3634_v5  ;;  %v2921_v49 = vsub.f32 %v3634_v5, %v3730_v61 }
 0x359   :  { %v2561_v57 = vpop.f32.mrf.mxu1  ;;  %v3052_v20 = vadd.f32 %v3051_v7, %v3050_v58 }
 0x35a   :  { %2856 = vst.msk [vmem:[%s6118_s3 + $0x30] sm:$0xff] %vm83_vm0, %v2561_v57  ;;  %v2920_v15 = vsub.f32 %v2561_v57, %v3729_v25  ;;  %v2985_v17 = vmul.f32 %v2921_v49, %v2921_v49 }
 0x35c   :  { %v2984_v59 = vmul.f32 %v2920_v15, %v2920_v15  ;;  %v3055_v44 = vsel %vm83_vm0, %v2985_v17, 0.0 }
 0x35e   :  { %v3637_v55 = vpop.f32.mrf.mxu1  ;;  %v3053_v56 = vsel %vm83_vm0, %v2984_v59, 0.0 }
 0x35f   :  { %2859 = vst.msk [vmem:[%s6118_s3 + $0x48] sm:$0xff] %vm83_vm0, %v3637_v55  ;;  %v3054_v62 = vadd.f32 %v3053_v56, %v3052_v20  ;;  %v2923_v43 = vsub.f32 %v3637_v55, %v3732_v38  ;;  %v3737_v55 = vld [vmem:[%s6115_s0 + $0x70] sm:$0xff]  ;;  %v3742_v56 = vld [vmem:[%s6115_s0 + $0x98] sm:$0xff] }
 0x360   :  { %v2571_v9 = vpop.f32.mrf.mxu1 }
 0x361   :  { %2858 = vst.msk [vmem:[%s6118_s3 + $0x40] sm:$0xff] %vm83_vm0, %v2571_v9  ;;  %v2922_v27 = vsub.f32 %v2571_v9, %v3731_v11  ;;  %v3056_v32 = vadd.f32 %v3055_v44, %v3054_v62  ;;  %v2987_v40 = vmul.f32 %v2923_v43, %v2923_v43 }
 0x363   :  { %v2986_v60 = vmul.f32 %v2922_v27, %v2922_v27  ;;  %v3059_v5 = vsel %vm83_vm0, %v2987_v40, 0.0 }
 0x365   :  { %v3057_v47 = vsel %vm83_vm0, %v2986_v60, 0.0 }
 0x366   :  { %v3640_v30 = vpop.f32.mrf.mxu1  ;;  %v3058_v6 = vadd.f32 %v3057_v47, %v3056_v32  ;;  %v3744_v47 = vld [vmem:[%s6115_s0 + $0xa8] sm:$0xff] }
 0x367   :  { %2861 = vst.msk [vmem:[%s6118_s3 + $0x58] sm:$0xff] %vm83_vm0, %v3640_v30  ;;  %v2925_v0 = vsub.f32 %v3640_v30, %v3734_v23 }
 0x368   :  { %v2581_v54 = vpop.f32.mrf.mxu1  ;;  %v3060_v10 = vadd.f32 %v3059_v5, %v3058_v6  ;;  %v3745_v6 = vld [vmem:[%s6115_s0 + $0xb0] sm:$0xff]  ;;  %v3746_v5 = vld [vmem:[%s6115_s0 + $0xb8] sm:$0xff] }
 0x369   :  { %2860 = vst.msk [vmem:[%s6118_s3 + $0x50] sm:$0xff] %vm83_vm0, %v2581_v54  ;;  %v2924_v33 = vsub.f32 %v2581_v54, %v3733_v35  ;;  %v2989_v57 = vmul.f32 %v2925_v0, %v2925_v0 }
 0x36b   :  { %v2988_v53 = vmul.f32 %v2924_v33, %v2924_v33  ;;  %v3063_v9 = vsel %vm83_vm0, %v2989_v57, 0.0 }
 0x36d   :  { %v3061_v36 = vsel %vm83_vm0, %v2988_v53, 0.0 }
 0x36e   :  { %v3643_v41 = vpop.f32.mrf.mxu1  ;;  %v3062_v14 = vadd.f32 %v3061_v36, %v3060_v10 }
 0x36f   :  { %2863 = vst.msk [vmem:[%s6118_s3 + $0x68] sm:$0xff] %vm83_vm0, %v3643_v41  ;;  %v2927_v48 = vsub.f32 %v3643_v41, %v3736_v16 }
 0x370   :  { %v2591_v28 = vpop.f32.mrf.mxu1  ;;  %v3064_v22 = vadd.f32 %v3063_v9, %v3062_v14 }
 0x371   :  { %2862 = vst.msk [vmem:[%s6118_s3 + $0x60] sm:$0xff] %vm83_vm0, %v2591_v28  ;;  %v2926_v2 = vsub.f32 %v2591_v28, %v3735_v4  ;;  %v2991_v50 = vmul.f32 %v2927_v48, %v2927_v48  ;;  %v3743_v28 = vld [vmem:[%s6115_s0 + $0xa0] sm:$0xff] }
 0x372   :  { %v3747_v48 = vld [vmem:[%s6115_s0 + $0xc0] sm:$0xff] }
 0x373   :  { %v2990_v13 = vmul.f32 %v2926_v2, %v2926_v2  ;;  %v3067_v21 = vsel %vm83_vm0, %v2991_v50, 0.0 }
 0x375   :  { %v3065_v52 = vsel %vm83_vm0, %v2990_v13, 0.0 }
 0x376   :  { %v3646_v26 = vpop.f32.mrf.mxu1  ;;  %v3066_v34 = vadd.f32 %v3065_v52, %v3064_v22 }
 0x377   :  { %2865 = vst.msk [vmem:[%s6118_s3 + $0x78] sm:$0xff] %vm83_vm0, %v3646_v26  ;;  %v2929_v18 = vsub.f32 %v3646_v26, %v3738_v19 }
 0x378   :  { %v2601_v31 = vpop.f32.mrf.mxu1  ;;  %v3068_v63 = vadd.f32 %v3067_v21, %v3066_v34  ;;  %v3750_v21 = vld [vmem:[%s6115_s0 + $0xd0] sm:$0xff] }
 0x379   :  { %2864 = vst.msk [vmem:[%s6118_s3 + $0x70] sm:$0xff] %vm83_vm0, %v2601_v31  ;;  %v2928_v51 = vsub.f32 %v2601_v31, %v3737_v55  ;;  %v2993_v25 = vmul.f32 %v2929_v18, %v2929_v18  ;;  %v3749_v18 = vld [vmem:[%s6115_s0 + $0xd8] sm:$0xff] }
 0x37b   :  { %v2992_v29 = vmul.f32 %v2928_v51, %v2928_v51  ;;  %v3071_v59 = vsel %vm83_vm0, %v2993_v25, 0.0 }
 0x37d   :  { %v3069_v30 = vsel %vm83_vm0, %v2992_v29, 0.0 }
 0x37e   :  { %v3649_v1 = vpop.f32.mrf.mxu1  ;;  %v3070_v54 = vadd.f32 %v3069_v30, %v3068_v63 }
 0x37f   :  { %2867 = vst.msk [vmem:[%s6118_s3 + $0x88] sm:$0xff] %vm83_vm0, %v3649_v1  ;;  %v2931_v3 = vsub.f32 %v3649_v1, %v3740_v39 }
 0x380   :  { %v2611_v12 = vpop.f32.mrf.mxu1  ;;  %v3072_v61 = vadd.f32 %v3071_v59, %v3070_v54  ;;  %v3751_v54 = vld [vmem:[%s6115_s0 + $0xe8] sm:$0xff]  ;;  %v3752_v59 = vld [vmem:[%s6115_s0 + $0xe0] sm:$0xff] }
 0x381   :  { %2866 = vst.msk [vmem:[%s6118_s3 + $0x80] sm:$0xff] %vm83_vm0, %v2611_v12  ;;  %v2930_v24 = vsub.f32 %v2611_v12, %v3739_v45  ;;  %v2995_v11 = vmul.f32 %v2931_v3, %v2931_v3  ;;  %v3748_v12 = vld [vmem:[%s6115_s0 + $0xc8] sm:$0xff] }
 0x383   :  { %v2994_v15 = vmul.f32 %v2930_v24, %v2930_v24  ;;  %v3075_v60 = vsel %vm83_vm0, %v2995_v11, 0.0 }
 0x385   :  { %v3073_v58 = vsel %vm83_vm0, %v2994_v15, 0.0 }
 0x386   :  { %v3652_v42 = vpop.f32.mrf.mxu1  ;;  %v3074_v41 = vadd.f32 %v3073_v58, %v3072_v61 }
 0x387   :  { %2869 = vst.msk [vmem:[%s6118_s3 + $0x98] sm:$0xff] %vm83_vm0, %v3652_v42  ;;  %v2933_v20 = vsub.f32 %v3652_v42, %v3742_v56 }
 0x388   :  { %v2621_v37 = vpop.f32.mrf.mxu1  ;;  %v3076_v38 = vadd.f32 %v3075_v60, %v3074_v41  ;;  %v3754_v60 = vld [vmem:[%s6115_s0 + $0xf0] sm:$0xff] }
 0x389   :  { %2868 = vst.msk [vmem:[%s6118_s3 + $0x90] sm:$0xff] %vm83_vm0, %v2621_v37  ;;  %v2932_v8 = vsub.f32 %v2621_v37, %v3741_v46  ;;  %v2997_v43 = vmul.f32 %v2933_v20, %v2933_v20 }
 0x38b   :  { %v2996_v27 = vmul.f32 %v2932_v8, %v2932_v8  ;;  %v3079_v40 = vsel %vm83_vm0, %v2997_v43, 0.0 }
 0x38d   :  { %v3077_v62 = vsel %vm83_vm0, %v2996_v27, 0.0 }
 0x38e   :  { %v3655_v49 = vpop.f32.mrf.mxu1  ;;  %v3078_v33 = vadd.f32 %v3077_v62, %v3076_v38 }
 0x38f   :  { %2871 = vst.msk [vmem:[%s6118_s3 + $0xa8] sm:$0xff] %vm83_vm0, %v3655_v49  ;;  %v2935_v32 = vsub.f32 %v3655_v49, %v3744_v47  ;;  %v3755_v47 = vld [vmem:[%s6115_s0 + $0x108] sm:$0xff] }
 0x390   :  { %v2631_v7 = vpop.f32.mrf.mxu1  ;;  %v3080_v23 = vadd.f32 %v3079_v40, %v3078_v33 }
 0x391   :  { %2870 = vst.msk [vmem:[%s6118_s3 + $0xa0] sm:$0xff] %vm83_vm0, %v2631_v7  ;;  %v2934_v17 = vsub.f32 %v2631_v7, %v3743_v28  ;;  %v2999_v0 = vmul.f32 %v2935_v32, %v2935_v32  ;;  %v3753_v7 = vld [vmem:[%s6115_s0 + $0xf8] sm:$0xff] }
 0x393   :  { %v2998_v35 = vmul.f32 %v2934_v17, %v2934_v17  ;;  %v3083_v57 = vsel %vm83_vm0, %v2999_v0, 0.0 }
 0x395   :  { %v3081_v53 = vsel %vm83_vm0, %v2998_v35, 0.0 }
 0x396   :  { %v3658_v44 = vpop.f32.mrf.mxu1  ;;  %v3082_v2 = vadd.f32 %v3081_v53, %v3080_v23 }
 0x397   :  { %2873 = vst.msk [vmem:[%s6118_s3 + $0xb8] sm:$0xff] %vm83_vm0, %v3658_v44  ;;  %v2937_v36 = vsub.f32 %v3658_v44, %v3746_v5 }
 0x398   :  { %v2641_v26 = vpop.f32.mrf.mxu1  ;;  %v3084_v14 = vadd.f32 %v3083_v57, %v3082_v2 }
 0x399   :  { %2872 = vst.msk [vmem:[%s6118_s3 + $0xb0] sm:$0xff] %vm83_vm0, %v2641_v26  ;;  %v2936_v31 = vsub.f32 %v2641_v26, %v3745_v6  ;;  %v3001_v16 = vmul.f32 %v2937_v36, %v2937_v36  ;;  %v3756_v6 = vld [vmem:[%s6115_s0 + $0x100] sm:$0xff]  ;;  %v3757_v36 = vld [vmem:[%s6115_s0 + $0x118] sm:$0xff] }
 0x39b   :  { %v3000_v4 = vmul.f32 %v2936_v31, %v2936_v31  ;;  %v3087_v22 = vsel %vm83_vm0, %v3001_v16, 0.0 }
 0x39d   :  { %v3085_v13 = vsel %vm83_vm0, %v3000_v4, 0.0 }
 0x39e   :  { %v3661_v10 = vpop.f32.mrf.mxu1  ;;  %v3086_v51 = vadd.f32 %v3085_v13, %v3084_v14 }
 0x39f   :  { %2875 = vst.msk [vmem:[%s6118_s3 + $0xc8] sm:$0xff] %vm83_vm0, %v3661_v10  ;;  %v2939_v9 = vsub.f32 %v3661_v10, %v3748_v12 }
 0x3a0   :  { %v2651_v1 = vpop.f32.mrf.mxu1  ;;  %v3088_v29 = vadd.f32 %v3087_v22, %v3086_v51 }
 0x3a1   :  { %2874 = vst.msk [vmem:[%s6118_s3 + $0xc0] sm:$0xff] %vm83_vm0, %v2651_v1  ;;  %v2938_v55 = vsub.f32 %v2651_v1, %v3747_v48  ;;  %v3003_v19 = vmul.f32 %v2939_v9, %v2939_v9  ;;  %v3758_v1 = vld [vmem:[%s6115_s0 + $0x110] sm:$0xff] }
 0x3a3   :  { %v3002_v52 = vmul.f32 %v2938_v55, %v2938_v55  ;;  %v3091_v37 = vsel %vm83_vm0, %v3003_v19, 0.0  ;;  %v3760_v19 = vld [vmem:[%s6115_s0 + $0x120] sm:$0xff] }
 0x3a5   :  { %v3089_v50 = vsel %vm83_vm0, %v3002_v52, 0.0  ;;  %v3759_v52 = vld [vmem:[%s6115_s0 + $0x128] sm:$0xff] }
 0x3a6   :  { %v3664_v34 = vpop.f32.mrf.mxu1  ;;  %v3090_v24 = vadd.f32 %v3089_v50, %v3088_v29 }
 0x3a7   :  { %2877 = vst.msk [vmem:[%s6118_s3 + $0xd8] sm:$0xff] %vm83_vm0, %v3664_v34  ;;  %v2941_v45 = vsub.f32 %v3664_v34, %v3749_v18 }
 0x3a8   :  { %v2661_v42 = vpop.f32.mrf.mxu1  ;;  %v3092_v3 = vadd.f32 %v3091_v37, %v3090_v24 }
 0x3a9   :  { %2876 = vst.msk [vmem:[%s6118_s3 + $0xd0] sm:$0xff] %vm83_vm0, %v2661_v42  ;;  %v2940_v30 = vsub.f32 %v2661_v42, %v3750_v21  ;;  %v3005_v25 = vmul.f32 %v2941_v45, %v2941_v45 }
 0x3aa   :  { %v3667_v63 = vpop.f32.mrf.mxu1 }
 0x3ab   :  { %v3004_v15 = vmul.f32 %v2940_v30, %v2940_v30  ;;  %2879 = vst.msk [vmem:[%s6118_s3 + $0xe8] sm:$0xff] %vm83_vm0, %v3667_v63  ;;  %v2943_v39 = vsub.f32 %v3667_v63, %v3751_v54  ;;  %v3095_v11 = vsel %vm83_vm0, %v3005_v25, 0.0  ;;  %v3761_v63 = vld [vmem:[%s6115_s0 + $0x138] sm:$0xff] }
 0x3ac   :  { %v2671_v46 = vpop.f32.mrf.mxu1 }
 0x3ad   :  { %v3093_v8 = vsel %vm83_vm0, %v3004_v15, 0.0  ;;  %2878 = vst.msk [vmem:[%s6118_s3 + $0xe0] sm:$0xff] %vm83_vm0, %v2671_v46  ;;  %v2942_v58 = vsub.f32 %v2671_v46, %v3752_v59  ;;  %v3007_v27 = vmul.f32 %v2943_v39, %v2943_v39  ;;  %v3762_v39 = vld [vmem:[%s6115_s0 + $0x130] sm:$0xff] }
 0x3ae   :  { %v3094_v61 = vadd.f32 %v3093_v8, %v3092_v3  ;;  %v3670_v49 = vpop.f32.mrf.mxu1 }
 0x3af   :  { %v3006_v41 = vmul.f32 %v2942_v58, %v2942_v58  ;;  %2881 = vst.msk [vmem:[%s6118_s3 + $0xf8] sm:$0xff] %vm83_vm0, %v3670_v49  ;;  %v2945_v56 = vsub.f32 %v3670_v49, %v3753_v7  ;;  %v3099_v35 = vsel %vm83_vm0, %v3007_v27, 0.0  ;;  %v3763_v49 = vld [vmem:[%s6115_s0 + $0x148] sm:$0xff] }
 0x3b0   :  { %v3096_v20 = vadd.f32 %v3095_v11, %v3094_v61  ;;  %v2681_v28 = vpop.f32.mrf.mxu1 }
 0x3b1   :  { %v3097_v17 = vsel %vm83_vm0, %v3006_v41, 0.0  ;;  %2880 = vst.msk [vmem:[%s6118_s3 + $0xf0] sm:$0xff] %vm83_vm0, %v2681_v28  ;;  %v2944_v62 = vsub.f32 %v2681_v28, %v3754_v60  ;;  %v3009_v33 = vmul.f32 %v2945_v56, %v2945_v56  ;;  %v3764_v56 = vld [vmem:[%s6115_s0 + $0x140] sm:$0xff] }
 0x3b2   :  { %v3098_v38 = vadd.f32 %v3097_v17, %v3096_v20  ;;  %v3673_v43 = vpop.f32.mrf.mxu1 }
 0x3b3   :  { %v3008_v44 = vmul.f32 %v2944_v62, %v2944_v62  ;;  %2883 = vst.msk [vmem:[%s6118_s3 + $0x108] sm:$0xff] %vm83_vm0, %v3673_v43  ;;  %v2947_v32 = vsub.f32 %v3673_v43, %v3755_v47  ;;  %v3103_v4 = vsel %vm83_vm0, %v3009_v33, 0.0  ;;  %v3765_v43 = vld [vmem:[%s6115_s0 + $0x158] sm:$0xff] }
 0x3b4   :  { %v3100_v26 = vadd.f32 %v3099_v35, %v3098_v38  ;;  %v2691_v40 = vpop.f32.mrf.mxu1 }
 0x3b5   :  { %v3101_v53 = vsel %vm83_vm0, %v3008_v44, 0.0  ;;  %2882 = vst.msk [vmem:[%s6118_s3 + $0x100] sm:$0xff] %vm83_vm0, %v2691_v40  ;;  %v2946_v31 = vsub.f32 %v2691_v40, %v3756_v6  ;;  %v3011_v2 = vmul.f32 %v2947_v32, %v2947_v32  ;;  %v3766_v32 = vld [vmem:[%s6115_s0 + $0x150] sm:$0xff] }
 0x3b6   :  { %v3102_v23 = vadd.f32 %v3101_v53, %v3100_v26  ;;  %v3676_v0 = vpop.f32.mrf.mxu1 }
 0x3b7   :  { %v3010_v5 = vmul.f32 %v2946_v31, %v2946_v31  ;;  %2885 = vst.msk [vmem:[%s6118_s3 + $0x118] sm:$0xff] %vm83_vm0, %v3676_v0  ;;  %v2949_v10 = vsub.f32 %v3676_v0, %v3757_v36  ;;  %v3107_v51 = vsel %vm83_vm0, %v3011_v2, 0.0  ;;  %v3767_v0 = vld [vmem:[%s6115_s0 + $0x168] sm:$0xff] }
 0x3b8   :  { %v3104_v57 = vadd.f32 %v3103_v4, %v3102_v23  ;;  %v2701_v13 = vpop.f32.mrf.mxu1 }
 0x3b9   :  { %v3105_v14 = vsel %vm83_vm0, %v3010_v5, 0.0  ;;  %2884 = vst.msk [vmem:[%s6118_s3 + $0x110] sm:$0xff] %vm83_vm0, %v2701_v13  ;;  %v2948_v16 = vsub.f32 %v2701_v13, %v3758_v1  ;;  %v3013_v12 = vmul.f32 %v2949_v10, %v2949_v10  ;;  %v3768_v10 = vld [vmem:[%s6115_s0 + $0x160] sm:$0xff] }
 0x3ba   :  { %v3106_v48 = vadd.f32 %v3105_v14, %v3104_v57  ;;  %v3679_v55 = vpop.f32.mrf.mxu1 }
 0x3bb   :  { %v3012_v9 = vmul.f32 %v2948_v16, %v2948_v16  ;;  %2887 = vst.msk [vmem:[%s6118_s3 + $0x128] sm:$0xff] %vm83_vm0, %v3679_v55  ;;  %v2951_v22 = vsub.f32 %v3679_v55, %v3759_v52  ;;  %v3111_v42 = vsel %vm83_vm0, %v3013_v12, 0.0  ;;  %v3769_v55 = vld [vmem:[%s6115_s0 + $0x178] sm:$0xff] }
 0x3bc   :  { %v3108_v50 = vadd.f32 %v3107_v51, %v3106_v48  ;;  %v2711_v29 = vpop.f32.mrf.mxu1 }
 0x3bd   :  { %v3109_v34 = vsel %vm83_vm0, %v3012_v9, 0.0  ;;  %2886 = vst.msk [vmem:[%s6118_s3 + $0x120] sm:$0xff] %vm83_vm0, %v2711_v29  ;;  %v2950_v18 = vsub.f32 %v2711_v29, %v3760_v19  ;;  %v3015_v21 = vmul.f32 %v2951_v22, %v2951_v22  ;;  %v3770_v22 = vld [vmem:[%s6115_s0 + $0x170] sm:$0xff] }
 0x3be   :  { %v3110_v45 = vadd.f32 %v3109_v34, %v3108_v50  ;;  %v3682_v24 = vpop.f32.mrf.mxu1 }
 0x3bf   :  { %v3014_v30 = vmul.f32 %v2950_v18, %v2950_v18  ;;  %2889 = vst.msk [vmem:[%s6118_s3 + $0x138] sm:$0xff] %vm83_vm0, %v3682_v24  ;;  %v2953_v37 = vsub.f32 %v3682_v24, %v3761_v63  ;;  %v3115_v59 = vsel %vm83_vm0, %v3015_v21, 0.0  ;;  %v3771_v24 = vld [vmem:[%s6115_s0 + $0x188] sm:$0xff] }
 0x3c0   :  { %v3112_v25 = vadd.f32 %v3111_v42, %v3110_v45  ;;  %v2721_v15 = vpop.f32.mrf.mxu1 }
 0x3c1   :  { %v3113_v54 = vsel %vm83_vm0, %v3014_v30, 0.0  ;;  %2888 = vst.msk [vmem:[%s6118_s3 + $0x130] sm:$0xff] %vm83_vm0, %v2721_v15  ;;  %v2952_v3 = vsub.f32 %v2721_v15, %v3762_v39  ;;  %v3017_v58 = vmul.f32 %v2953_v37, %v2953_v37  ;;  %v3772_v37 = vld [vmem:[%s6115_s0 + $0x180] sm:$0xff] }
 0x3c2   :  { %v3114_v46 = vadd.f32 %v3113_v54, %v3112_v25  ;;  %v3685_v8 = vpop.f32.mrf.mxu1 }
 0x3c3   :  { %v3016_v61 = vmul.f32 %v2952_v3, %v2952_v3  ;;  %2891 = vst.msk [vmem:[%s6118_s3 + $0x148] sm:$0xff] %vm83_vm0, %v3685_v8  ;;  %v2955_v11 = vsub.f32 %v3685_v8, %v3763_v49  ;;  %v3119_v60 = vsel %vm83_vm0, %v3017_v58, 0.0  ;;  %v3773_v8 = vld [vmem:[%s6115_s0 + $0x198] sm:$0xff] }
 0x3c4   :  { %v3116_v27 = vadd.f32 %v3115_v59, %v3114_v46  ;;  %v2731_v41 = vpop.f32.mrf.mxu1 }
 0x3c5   :  { %v3117_v7 = vsel %vm83_vm0, %v3016_v61, 0.0  ;;  %2890 = vst.msk [vmem:[%s6118_s3 + $0x140] sm:$0xff] %vm83_vm0, %v2731_v41  ;;  %v2954_v20 = vsub.f32 %v2731_v41, %v3764_v56  ;;  %v3019_v62 = vmul.f32 %v2955_v11, %v2955_v11  ;;  %v3774_v11 = vld [vmem:[%s6115_s0 + $0x190] sm:$0xff] }
 0x3c6   :  { %v3118_v28 = vadd.f32 %v3117_v7, %v3116_v27  ;;  %v3688_v17 = vpop.f32.mrf.mxu1 }
 0x3c7   :  { %v3018_v38 = vmul.f32 %v2954_v20, %v2954_v20  ;;  %2893 = vst.msk [vmem:[%s6118_s3 + $0x158] sm:$0xff] %vm83_vm0, %v3688_v17  ;;  %v2957_v35 = vsub.f32 %v3688_v17, %v3765_v43  ;;  %v3123_v6 = vsel %vm83_vm0, %v3019_v62, 0.0  ;;  %v3775_v17 = vld [vmem:[%s6115_s0 + $0x1a8] sm:$0xff] }
 0x3c8   :  { %v3120_v33 = vadd.f32 %v3119_v60, %v3118_v28  ;;  %v2741_v44 = vpop.f32.mrf.mxu1 }
 0x3c9   :  { %v3121_v47 = vsel %vm83_vm0, %v3018_v38, 0.0  ;;  %2892 = vst.msk [vmem:[%s6118_s3 + $0x150] sm:$0xff] %vm83_vm0, %v2741_v44  ;;  %v2956_v26 = vsub.f32 %v2741_v44, %v3766_v32  ;;  %v3021_v31 = vmul.f32 %v2957_v35, %v2957_v35  ;;  %v3776_v35 = vld [vmem:[%s6115_s0 + $0x1a0] sm:$0xff] }
 0x3ca   :  { %v3122_v40 = vadd.f32 %v3121_v47, %v3120_v33  ;;  %v3691_v53 = vpop.f32.mrf.mxu1 }
 0x3cb   :  { %v3020_v23 = vmul.f32 %v2956_v26, %v2956_v26  ;;  %2895 = vst.msk [vmem:[%s6118_s3 + $0x168] sm:$0xff] %vm83_vm0, %v3691_v53  ;;  %v2959_v4 = vsub.f32 %v3691_v53, %v3767_v0  ;;  %v3127_v1 = vsel %vm83_vm0, %v3021_v31, 0.0  ;;  %v3777_v53 = vld [vmem:[%s6115_s0 + $0x1b8] sm:$0xff] }
 0x3cc   :  { %v3124_v2 = vadd.f32 %v3123_v6, %v3122_v40  ;;  %v2751_v5 = vpop.f32.mrf.mxu1 }
 0x3cd   :  { %v3125_v36 = vsel %vm83_vm0, %v3020_v23, 0.0  ;;  %2894 = vst.msk [vmem:[%s6118_s3 + $0x160] sm:$0xff] %vm83_vm0, %v2751_v5  ;;  %v2958_v57 = vsub.f32 %v2751_v5, %v3768_v10  ;;  %v3023_v16 = vmul.f32 %v2959_v4, %v2959_v4  ;;  %v3778_v4 = vld [vmem:[%s6115_s0 + $0x1b0] sm:$0xff] }
 0x3ce   :  { %v3126_v13 = vadd.f32 %v3125_v36, %v3124_v2  ;;  %v3694_v14 = vpop.f32.mrf.mxu1 }
 0x3cf   :  { %v3022_v48 = vmul.f32 %v2958_v57, %v2958_v57  ;;  %2897 = vst.msk [vmem:[%s6118_s3 + $0x178] sm:$0xff] %vm83_vm0, %v3694_v14  ;;  %v2961_v51 = vsub.f32 %v3694_v14, %v3769_v55  ;;  %v3131_v19 = vsel %vm83_vm0, %v3023_v16, 0.0  ;;  %v3779_v14 = vld [vmem:[%s6115_s0 + $0x1c8] sm:$0xff] }
 0x3d0   :  { %v3128_v12 = vadd.f32 %v3127_v1, %v3126_v13  ;;  %v2761_v9 = vpop.f32.mrf.mxu1 }
 0x3d1   :  { %v3129_v52 = vsel %vm83_vm0, %v3022_v48, 0.0  ;;  %2896 = vst.msk [vmem:[%s6118_s3 + $0x170] sm:$0xff] %vm83_vm0, %v2761_v9  ;;  %v2960_v50 = vsub.f32 %v2761_v9, %v3770_v22  ;;  %v3025_v18 = vmul.f32 %v2961_v51, %v2961_v51  ;;  %v3780_v51 = vld [vmem:[%s6115_s0 + $0x1c0] sm:$0xff] }
 0x3d2   :  { %v3130_v29 = vadd.f32 %v3129_v52, %v3128_v12  ;;  %v3697_v34 = vpop.f32.mrf.mxu1 }
 0x3d3   :  { %v3024_v45 = vmul.f32 %v2960_v50, %v2960_v50  ;;  %2899 = vst.msk [vmem:[%s6118_s3 + $0x188] sm:$0xff] %vm83_vm0, %v3697_v34  ;;  %v2963_v42 = vsub.f32 %v3697_v34, %v3771_v24  ;;  %v3135_v39 = vsel %vm83_vm0, %v3025_v18, 0.0  ;;  %v3781_v34 = vld [vmem:[%s6115_s0 + $0x1d8] sm:$0xff] }
 0x3d4   :  { %v3132_v21 = vadd.f32 %v3131_v19, %v3130_v29  ;;  %v2771_v30 = vpop.f32.mrf.mxu1 }
 0x3d5   :  { %v3133_v63 = vsel %vm83_vm0, %v3024_v45, 0.0  ;;  %2898 = vst.msk [vmem:[%s6118_s3 + $0x180] sm:$0xff] %vm83_vm0, %v2771_v30  ;;  %v2962_v25 = vsub.f32 %v2771_v30, %v3772_v37  ;;  %v3027_v3 = vmul.f32 %v2963_v42, %v2963_v42  ;;  %v3782_v42 = vld [vmem:[%s6115_s0 + $0x1d0] sm:$0xff] }
 0x3d6   :  { %v3134_v15 = vadd.f32 %v3133_v63, %v3132_v21  ;;  %v3700_v54 = vpop.f32.mrf.mxu1 }
 0x3d7   :  { %v3026_v46 = vmul.f32 %v2962_v25, %v2962_v25  ;;  %2901 = vst.msk [vmem:[%s6118_s3 + $0x198] sm:$0xff] %vm83_vm0, %v3700_v54  ;;  %v2965_v59 = vsub.f32 %v3700_v54, %v3773_v8  ;;  %v3139_v56 = vsel %vm83_vm0, %v3027_v3, 0.0 }
 0x3d8   :  { %v3136_v58 = vadd.f32 %v3135_v39, %v3134_v15  ;;  %v2781_v61 = vpop.f32.mrf.mxu1 }
 0x3d9   :  { %v3137_v49 = vsel %vm83_vm0, %v3026_v46, 0.0  ;;  %2900 = vst.msk [vmem:[%s6118_s3 + $0x190] sm:$0xff] %vm83_vm0, %v2781_v61  ;;  %v2964_v27 = vsub.f32 %v2781_v61, %v3774_v11  ;;  %v3029_v20 = vmul.f32 %v2965_v59, %v2965_v59  ;;  %v3783_v46 = vld [vmem:[%s6115_s0 + $0x1e0] sm:$0xff] }
 0x3da   :  { %v3138_v41 = vadd.f32 %v3137_v49, %v3136_v58  ;;  %v3703_v7 = vpop.f32.mrf.mxu1  ;;  %v3784_v58 = vld [vmem:[%s6115_s0 + $0x1e8] sm:$0xff] }
 0x3db   :  { %v3028_v28 = vmul.f32 %v2964_v27, %v2964_v27  ;;  %2903 = vst.msk [vmem:[%s6118_s3 + $0x1a8] sm:$0xff] %vm83_vm0, %v3703_v7  ;;  %v2967_v60 = vsub.f32 %v3703_v7, %v3775_v17  ;;  %v3143_v32 = vsel %vm83_vm0, %v3029_v20, 0.0  ;;  %v3785_v20 = vld [vmem:[%s6115_s0 + $0x1f8] sm:$0xff] }
 0x3dc   :  { %v3140_v62 = vadd.f32 %v3139_v56, %v3138_v41  ;;  %v2791_v38 = vpop.f32.mrf.mxu1 }
 0x3dd   :  { %v3141_v43 = vsel %vm83_vm0, %v3028_v28, 0.0  ;;  %2902 = vst.msk [vmem:[%s6118_s3 + $0x1a0] sm:$0xff] %vm83_vm0, %v2791_v38  ;;  %v2966_v33 = vsub.f32 %v2791_v38, %v3776_v35  ;;  %v3031_v26 = vmul.f32 %v2967_v60, %v2967_v60 }
 0x3de   :  { %v3142_v44 = vadd.f32 %v3141_v43, %v3140_v62  ;;  %v3706_v47 = vpop.f32.mrf.mxu1  ;;  %v3786_v62 = vld [vmem:[%s6115_s0 + $0x1f0] sm:$0xff]  ;;  %s3810_s0 = smov [#allocation2]  }
 0x3df   :  { %v3030_v40 = vmul.f32 %v2966_v33, %v2966_v33  ;;  %2905 = vst.msk [vmem:[%s6118_s3 + $0x1b8] sm:$0xff] %vm83_vm0, %v3706_v47  ;;  %v2969_v6 = vsub.f32 %v3706_v47, %v3777_v53  ;;  %v3147_v10 = vsel %vm83_vm0, %v3031_v26, 0.0 }
 0x3e0   :  { %v3144_v31 = vadd.f32 %v3143_v32, %v3142_v44  ;;  %v2801_v23 = vpop.f32.mrf.mxu1 }
 0x3e1   :  { %v3145_v0 = vsel %vm83_vm0, %v3030_v40, 0.0  ;;  %2904 = vst.msk [vmem:[%s6118_s3 + $0x1b0] sm:$0xff] %vm83_vm0, %v2801_v23  ;;  %v2968_v2 = vsub.f32 %v2801_v23, %v3778_v4  ;;  %v3033_v57 = vmul.f32 %v2969_v6, %v2969_v6 }
 0x3e2   :  { %v3146_v5 = vadd.f32 %v3145_v0, %v3144_v31  ;;  %v3709_v36 = vpop.f32.mrf.mxu1 }
 0x3e3   :  { %v3032_v13 = vmul.f32 %v2968_v2, %v2968_v2  ;;  %2907 = vst.msk [vmem:[%s6118_s3 + $0x1c8] sm:$0xff] %vm83_vm0, %v3709_v36  ;;  %v2971_v1 = vsub.f32 %v3709_v36, %v3779_v14  ;;  %v3151_v22 = vsel %vm83_vm0, %v3033_v57, 0.0 }
 0x3e4   :  { %v3148_v16 = vadd.f32 %v3147_v10, %v3146_v5  ;;  %v2811_v48 = vpop.f32.mrf.mxu1 }
 0x3e5   :  { %v3149_v55 = vsel %vm83_vm0, %v3032_v13, 0.0  ;;  %2906 = vst.msk [vmem:[%s6118_s3 + $0x1c0] sm:$0xff] %vm83_vm0, %v2811_v48  ;;  %v2970_v12 = vsub.f32 %v2811_v48, %v3780_v51  ;;  %v3035_v50 = vmul.f32 %v2971_v1, %v2971_v1 }
 0x3e6   :  { %v3150_v9 = vadd.f32 %v3149_v55, %v3148_v16  ;;  %v3712_v52 = vpop.f32.mrf.mxu1 }
 0x3e7   :  { %v3034_v29 = vmul.f32 %v2970_v12, %v2970_v12  ;;  %2909 = vst.msk [vmem:[%s6118_s3 + $0x1d8] sm:$0xff] %vm83_vm0, %v3712_v52  ;;  %v2973_v19 = vsub.f32 %v3712_v52, %v3781_v34  ;;  %v3155_v37 = vsel %vm83_vm0, %v3035_v50, 0.0 }
 0x3e8   :  { %v3152_v18 = vadd.f32 %v3151_v22, %v3150_v9  ;;  %v2821_v45 = vpop.f32.mrf.mxu1 }
 0x3e9   :  { %v3153_v24 = vsel %vm83_vm0, %v3034_v29, 0.0  ;;  %2908 = vst.msk [vmem:[%s6118_s3 + $0x1d0] sm:$0xff] %vm83_vm0, %v2821_v45  ;;  %v2972_v21 = vsub.f32 %v2821_v45, %v3782_v42  ;;  %v3037_v25 = vmul.f32 %v2973_v19, %v2973_v19 }
 0x3ea   :  { %v3154_v30 = vadd.f32 %v3153_v24, %v3152_v18  ;;  %v3715_v63 = vpop.f32.mrf.mxu1 }
 0x3eb   :  { %v3036_v15 = vmul.f32 %v2972_v21, %v2972_v21  ;;  %2911 = vst.msk [vmem:[%s6118_s3 + $0x1e8] sm:$0xff] %vm83_vm0, %v3715_v63  ;;  %v2975_v61 = vsub.f32 %v3715_v63, %v3784_v58  ;;  %v3159_v49 = vsel %vm83_vm0, %v3037_v25, 0.0 }
 0x3ec   :  { %v3156_v54 = vadd.f32 %v3155_v37, %v3154_v30  ;;  %v2831_v39 = vpop.f32.mrf.mxu1 }
 0x3ed   :  { %v3157_v3 = vsel %vm83_vm0, %v3036_v15, 0.0  ;;  %2910 = vst.msk [vmem:[%s6118_s3 + $0x1e0] sm:$0xff] %vm83_vm0, %v2831_v39  ;;  %v2974_v8 = vsub.f32 %v2831_v39, %v3783_v46  ;;  %v3039_v56 = vmul.f32 %v2975_v61, %v2975_v61 }
 0x3ee   :  { %v3158_v59 = vadd.f32 %v3157_v3, %v3156_v54 }
 0x3ef   :  { %v3038_v11 = vmul.f32 %v2974_v8, %v2974_v8  ;;  %v3163_v43 = vsel %vm83_vm0, %v3039_v56, 0.0 }
 0x3f0   :  { %v3160_v27 = vadd.f32 %v3159_v49, %v3158_v59 }
 0x3f1   :  { %v3161_v41 = vsel %vm83_vm0, %v3038_v11, 0.0  ;;  %v3718_v7 = vpop.f32.mrf.mxu1 }
 0x3f2   :  { %2913 = vst.msk [vmem:[%s6118_s3 + $0x1f8] sm:$0xff] %vm83_vm0, %v3718_v7  ;;  %v2977_v28 = vsub.f32 %v3718_v7, %v3785_v20  ;;  %v3162_v17 = vadd.f32 %v3161_v41, %v3160_v27 }
 0x3f3   :  { %v2841_v60 = vpop.f32.mrf.mxu1 }
 0x3f4   :  { %2912 = vst.msk [vmem:[%s6118_s3 + $0x1f0] sm:$0xff] %vm83_vm0, %v2841_v60  ;;  %v2976_v38 = vsub.f32 %v2841_v60, %v3786_v62  ;;  %v3041_v35 = vmul.f32 %v2977_v28, %v2977_v28  ;;  %v3164_v44 = vadd.f32 %v3163_v43, %v3162_v17  ;;  %s3189_s3 = sshll.u32 %s3810_s0, 4  ;;  %s3190_s3 = int_to_ptr.vmem [resolvable:$true] %s3189_s3 }
 0x3f5   :  { %s3787_s16 = scalar_lea.vmem %s3190_s3, 16  ;;  %s3791_s17 = scalar_lea.vmem %s3190_s3, 32 }
 0x3f6   :  { %v3040_v33 = vmul.f32 %v2976_v38, %v2976_v38  ;;  %v3167_v26 = vsel %vm83_vm0, %v3041_v35, 0.0  ;;  %p3788_p0 = scmp.ne.s32.totalorder %s3190_s3, %s3787_s16  ;;  %p3792_p1 = scmp.lt.s32.totalorder %s3190_s3, %s3190_s3 }
 0x3f7   :  { %p3793_p2 = scmp.lt.s32.totalorder %s3791_s17, %s3787_s16 }
 0x3f8   :  { %v3165_v47 = vsel %vm83_vm0, %v3040_v33, 0.0 }
 0x3f9   :  { %v3166_v32 = vadd.f32 %v3165_v47, %v3164_v44  ;;  %p3794_p3 = por %p3793_p2, %p3792_p1 }
 0x3fb   :  { %v3168_v40 = vadd.f32 %v3167_v26, %v3166_v32  ;;  %p3795_p4 = pnand %p3794_p3, %p3788_p0 }
 0x3fd   :  { %3169 = vadd.xlane.f32.xlu0 %v3168_v40 }
 0x486   :  { %v3170_v53 = vpop.xlane.xlu0 %3169 }
 0x487   :  { %v3171_v6 = vrot.slane %v3170_v53, 4 }
 0x489   :  { %v3172_v31 = vadd.f32 %v3171_v6, %v3170_v53 }
 0x48b   :  { %v3173_v23 = vrot.slane %v3172_v31, 2 }
 0x48d   :  { %v3174_v0 = vadd.f32 %v3173_v23, %v3172_v31 }
 0x48f   :  { %v3175_v4 = vrot.slane %v3174_v0, 1 }
 0x491   :  { %v3176_v2 = vadd.f32 %v3175_v4, %v3174_v0 }
 0x493   :  { %3719 = vpush %v3176_v2 }
 0x4c4   :  { %s3720_s15 = spop %3719 }
 0x4c5   :  { %v3178_v5 = vstv %s3720_s15 }
 0x4c6   :  { %3180 = vst.msk [vmem:[#allocation2] sm:$0x1] %vm3179_vm1, %v3178_v5 }
 0x4c7   :  { %3798 = shalt.err (!%p3795_p4)
}
 0x4c8   :  { %3192 = dma.vmem_to_hbm [thread:$0]  %s3190_s3, 16, %s6119_s4, [#allocation3]  }
 0x4c9   :  { %3807 = dma.done.wait [#allocation3], 16  }
 0x4ca   :  { %3808 = vsyncadd [#allocation3], 4294967280 }
 0x4cb   :  { %3198 = vsyncpa [#allocation3], 1 }

</bundles_post_ra>
